<compile_context>
chip_gen: v7x
topology: tpu7x:2x2x1
jax: 0.10.0
libtpu: 0.0.40
codegen_flags: <defaults>
</compile_context>

<pallas_src>
import jax
import jax.numpy as jnp
from jax.experimental import pallas as pl
from jax.experimental.pallas import tpu as pltpu

BN_EPS = 1e-5
LEAKY_SLOPE = 0.2
_VMEM_LIMIT = 48 * 1024 * 1024  # below v7x's 64 MiB physical VMEM; ample on v5e/v6e (128 MiB)


def _round_up(x, m):
    return (x + m - 1) // m * m


def _row_block_pass1(oh):
    """Conv-output rows computed (Python-unrolled) per pass-1 grid step."""
    if oh % 8 == 0:
        return 8
    for d in range(min(oh, 16), 0, -1):  # largest divisor <= 16 bounds the unroll
        if oh % d == 0:
            return d
    return 1


def _row_block_pass2(oh, row_bytes):
    """Rows per pass-2 block: as large as possible under a ~4 MiB per-block budget."""
    budget = 4 * 1024 * 1024
    fallback = _row_block_pass1(oh)
    for d in range(oh, fallback, -1):
        if oh % d == 0 and (d == oh or d % 8 == 0) and d * row_bytes <= budget:
            return d
    return fallback


@jax.jit
def downsample_forward(x_nchw, w_oihw, bias, gamma, beta):
    """Conv2d(4, stride=2, pad=1) + train-mode BatchNorm2d + LeakyReLU(0.2).

    x_nchw: (N, Cin, H, W) f32 -> (N, Cout, H//2, W//2) f32.
    """
    N, Cin, H, W = x_nchw.shape
    Cout = w_oihw.shape[0]
    OH, OW = H // 2, W // 2
    HP2, WP2 = OH + 1, OW + 1          # parity-field spatial dims: ((H+2)/2, (W+2)/2)
    M = N * OH * OW                    # per-channel element count for the batch stats
    csub = _round_up(Cout, 8)          # sublane-aligned channel count

    # Conv bias is cancelled exactly by train-mode BN mean-centering -> drop it.
    del bias

    # ---- wrapper glue (input-sized, bf16): pad + parity split ----------------------------
    xp = jnp.pad(x_nchw.astype(jnp.bfloat16), ((0, 0), (0, 0), (1, 1), (1, 1)))
    xr = xp.reshape(N, Cin, HP2, 2, WP2, 2)
    fields = jnp.transpose(xr, (3, 5, 0, 2, 1, 4))          # (ph, pw, N, HP2, Cin, WP2)
    fields = fields.reshape(2, 2, N * HP2, Cin, WP2)
    f00, f01, f10, f11 = fields[0, 0], fields[0, 1], fields[1, 0], fields[1, 1]

    # Weights as 16 per-tap (csub, Cin) bf16 matrices, tap index t = kh*4 + kw.
    w_taps = jnp.transpose(w_oihw, (2, 3, 0, 1)).reshape(16, Cout, Cin)
    w_taps = jnp.pad(w_taps, ((0, 0), (0, csub - Cout), (0, 0))).astype(jnp.bfloat16)

    tr = _row_block_pass1(OH)
    rb_count = OH // tr

    # ---- pass 1: in-kernel patch formation + conv (MXU) + per-step partial stats ---------
    def conv_stats_kernel(w_ref, f00_ref, f01_ref, f10_ref, f11_ref, conv_ref, stats_ref):
        rb = pl.program_id(1)
        fld = ((f00_ref, f01_ref), (f10_ref, f11_ref))
        wt = [w_ref[t] for t in range(16)]                   # 16 x (csub, Cin), loaded once
        s = jnp.zeros((csub, 1), jnp.float32)
        ss = jnp.zeros((csub, 1), jnp.float32)
        for r in range(tr):                                  # static unroll over the row block
            row0 = rb * tr + r
            acc = jnp.zeros((csub, OW), jnp.float32)
            for ph in range(2):
                for ah in range(2):
                    ridx = row0 + ah                         # dynamic leading-axis index
                    for pw in range(2):
                        frow = fld[ph][pw][ridx]             # (Cin, WP2) bf16, contiguous
                        for aw in range(2):
                            t = (2 * ah + ph) * 4 + (2 * aw + pw)
                            acc += jnp.dot(wt[t], frow[:, aw:aw + OW],
                                           preferred_element_type=jnp.float32)
            conv_ref[0, :, r, :] = acc.astype(conv_ref.dtype)        # bf16 intermediate
            s = s + jnp.sum(acc, axis=1, keepdims=True)              # stats from f32 values
            ss = ss + jnp.sum(acc * acc, axis=1, keepdims=True)
        stats_ref[0, 0, :, 0:1] = s                                  # two plain slice stores
        stats_ref[0, 0, :, 1:2] = ss

    conv, stats = pl.pallas_call(
        conv_stats_kernel,
        out_shape=(jax.ShapeDtypeStruct((N, csub, OH, OW), jnp.bfloat16),
                   jax.ShapeDtypeStruct((N, rb_count, csub, 2), jnp.float32)),
        grid=(N, rb_count),
        in_specs=[
            pl.BlockSpec((16, csub, Cin), lambda n, rb: (0, 0, 0)),   # resident weights
            pl.BlockSpec((HP2, Cin, WP2), lambda n, rb: (n, 0, 0)),   # per-sample parity fields
            pl.BlockSpec((HP2, Cin, WP2), lambda n, rb: (n, 0, 0)),   # (revisited across rb)
            pl.BlockSpec((HP2, Cin, WP2), lambda n, rb: (n, 0, 0)),
            pl.BlockSpec((HP2, Cin, WP2), lambda n, rb: (n, 0, 0)),
        ],
        out_specs=(
            pl.BlockSpec((1, csub, tr, OW), lambda n, rb: (n, 0, rb, 0)),
            pl.BlockSpec((1, 1, csub, 2), lambda n, rb: (n, rb, 0, 0)),
        ),
        compiler_params=pltpu.CompilerParams(
            dimension_semantics=("parallel", "parallel"),   # per-step partial stats -> no ordering
            vmem_limit_bytes=_VMEM_LIMIT),
    )(w_taps, f00, f01, f10, f11)

    # ---- tiny per-channel fold: batch stats -> folded BN scale / shift (f32) -------------
    # NOTE: var = E[x^2] - E[x]^2 on f32 partials; adequate here since sums come from the
    #       f32 pre-cast conv values.  For huge M consider Welford-style per-tile merging.
    tot = jnp.sum(stats, axis=(0, 1))                       # (csub, 2)
    mean = tot[:, 0] / M
    var = jnp.maximum(tot[:, 1] / M - mean * mean, 0.0)
    inv_std = jax.lax.rsqrt(var + BN_EPS)
    gamma_p = jnp.pad(gamma.astype(jnp.float32), (0, csub - Cout))
    beta_p = jnp.pad(beta.astype(jnp.float32), (0, csub - Cout))
    scale_c = gamma_p * inv_std
    shift_c = beta_p - mean * scale_c
    scale_b = jnp.broadcast_to(scale_c[:, None], (csub, OW))
    shift_b = jnp.broadcast_to(shift_c[:, None], (csub, OW))

    # ---- pass 2: folded BN affine + LeakyReLU, written straight in (N, C, OH, OW) --------
    tr2 = _row_block_pass2(OH, csub * OW * (2 + 4))

    def bn_lrelu_kernel(scale_ref, shift_ref, conv_ref, out_ref):
        sc = scale_ref[...][:, None, :]                      # (csub, 1, OW)
        sh = shift_ref[...][:, None, :]
        y = conv_ref[0].astype(jnp.float32) * sc + sh
        out_ref[0] = jnp.where(y >= 0, y, LEAKY_SLOPE * y)

    out_full = pl.pallas_call(
        bn_lrelu_kernel,
        out_shape=jax.ShapeDtypeStruct((N, csub, OH, OW), jnp.float32),
        grid=(N, OH // tr2),
        in_specs=[
            pl.BlockSpec((csub, OW), lambda n, rb: (0, 0)),
            pl.BlockSpec((csub, OW), lambda n, rb: (0, 0)),
            pl.BlockSpec((1, csub, tr2, OW), lambda n, rb: (n, 0, rb, 0)),
        ],
        out_specs=pl.BlockSpec((1, csub, tr2, OW), lambda n, rb: (n, 0, rb, 0)),
        compiler_params=pltpu.CompilerParams(
            dimension_semantics=("parallel", "parallel"),
            vmem_limit_bytes=_VMEM_LIMIT),
    )(scale_b, shift_b, conv)

    # Final layout already (N, C, OH, OW): just drop padded channels (no transpose).
    return out_full[:, :Cout]


def _reference_forward(x_nchw, w_oihw, bias, gamma, beta):
    """Pure-JAX reference mirroring PyTorch train-mode semantics (bias included)."""
    y = jax.lax.conv_general_dilated(
        x_nchw, w_oihw, window_strides=(2, 2), padding=((1, 1), (1, 1)),
        dimension_numbers=("NCHW", "OIHW", "NCHW"))
    y = y + bias[None, :, None, None]
    mean = jnp.mean(y, axis=(0, 2, 3), keepdims=True)
    var = jnp.var(y, axis=(0, 2, 3), keepdims=True)   # biased, matches BN normalization
    yn = (y - mean) / jnp.sqrt(var + BN_EPS)
    yn = yn * gamma[None, :, None, None] + beta[None, :, None, None]
    return jnp.where(yn >= 0, yn, LEAKY_SLOPE * yn)


if __name__ == "__main__":
    key = jax.random.PRNGKey(0)
    k_x, k_w, k_b, k_g, k_be = jax.random.split(key, 5)

    # Small shapes: N=2 exercises the parallel sample axis, OH=16 gives 2 row-blocks in
    # pass 1, and Cout=6 exercises the channel-padding (csub=8) path.
    N, Cin, H, W = 2, 4, 32, 32
    Cout = 6

    x = jax.random.normal(k_x, (N, Cin, H, W), dtype=jnp.float32)
    w = 0.1 * jax.random.normal(k_w, (Cout, Cin, 4, 4), dtype=jnp.float32)
    b = 0.05 * jax.random.normal(k_b, (Cout,), dtype=jnp.float32)
    gamma = 1.0 + 0.1 * jax.random.normal(k_g, (Cout,), dtype=jnp.float32)
    beta = 0.1 * jax.random.normal(k_be, (Cout,), dtype=jnp.float32)

    out = downsample_forward(x, w, b, gamma, beta)
    out = jax.block_until_ready(out)

    ref = _reference_forward(x, w, b, gamma, beta)
    assert out.shape == (N, Cout, H // 2, W // 2), out.shape
    err = float(jnp.max(jnp.abs(out - ref)))
    # bf16 streams (inputs, weights, conv intermediate) vs f32 reference -> loosened tolerance.
    assert err < 5e-2, f"max abs err = {err}"

    print("KERNEL_OK")
</pallas_src>

<mosaic_0001>
module attributes {stable_mosaic.version = 11 : i64} {
  func.func @bn_lrelu_kernel(%arg0: i32, %arg1: i32, %arg2: memref<8x16xf32, #tpu.memory_space<vmem>>, %arg3: memref<8x16xf32, #tpu.memory_space<vmem>>, %arg4: memref<1x8x16x16xbf16, #tpu.memory_space<vmem>>, %arg5: memref<1x8x16x16xf32, #tpu.memory_space<vmem>>) attributes {dimension_semantics = [#tpu.dimension_semantics<parallel>, #tpu.dimension_semantics<parallel>], iteration_bounds = array<i64: 2, 1>, scalar_prefetch = 0 : i64, scratch_operands = 0 : i64, tpu.core_type = #tpu.core_type<tc>, window_params = [{pipeline_mode = #tpu.pipeline_mode<synchronous>, transform_indices = @transform_0, window_bounds = array<i64: 8, 16>}, {pipeline_mode = #tpu.pipeline_mode<synchronous>, transform_indices = @transform_1, window_bounds = array<i64: 8, 16>}, {transform_indices = @transform_2, window_bounds = array<i64: 1, 8, 16, 16>}, {transform_indices = @transform_3, window_bounds = array<i64: 1, 8, 16, 16>}]} {
    %c0 = arith.constant 0 : index
    %c0_0 = arith.constant 0 : index
    %0 = vector.load %arg2[%c0, %c0_0] : memref<8x16xf32, #tpu.memory_space<vmem>>, vector<8x16xf32>
    %1 = vector.shape_cast %0 : vector<8x16xf32> to vector<8x1x16xf32>
    %c0_1 = arith.constant 0 : index
    %c0_2 = arith.constant 0 : index
    %2 = vector.load %arg3[%c0_1, %c0_2] : memref<8x16xf32, #tpu.memory_space<vmem>>, vector<8x16xf32>
    %3 = vector.shape_cast %2 : vector<8x16xf32> to vector<8x1x16xf32>
    %c0_3 = arith.constant 0 : index
    %c0_4 = arith.constant 0 : index
    %c0_5 = arith.constant 0 : index
    %c0_6 = arith.constant 0 : index
    %4 = vector.load %arg4[%c0_3, %c0_4, %c0_5, %c0_6] : memref<1x8x16x16xbf16, #tpu.memory_space<vmem>>, vector<1x8x16x16xbf16>
    %5 = vector.shape_cast %4 : vector<1x8x16x16xbf16> to vector<8x16x16xbf16>
    %6 = arith.extf %5 : vector<8x16x16xbf16> to vector<8x16x16xf32>
    %7 = vector.broadcast %1 : vector<8x1x16xf32> to vector<8x16x16xf32>
    %8 = arith.mulf %6, %7 : vector<8x16x16xf32>
    %9 = vector.broadcast %3 : vector<8x1x16xf32> to vector<8x16x16xf32>
    %10 = arith.addf %8, %9 : vector<8x16x16xf32>
    %cst = arith.constant 0.000000e+00 : f32
    %11 = vector.broadcast %cst : f32 to vector<8x16x16xf32>
    %12 = arith.cmpf oge, %10, %11 : vector<8x16x16xf32>
    %cst_7 = arith.constant 2.000000e-01 : f32
    %13 = vector.broadcast %cst_7 : f32 to vector<8x16x16xf32>
    %14 = arith.mulf %13, %10 : vector<8x16x16xf32>
    %15 = arith.select %12, %10, %14 : vector<8x16x16xi1>, vector<8x16x16xf32>
    %c0_8 = arith.constant 0 : index
    %c0_9 = arith.constant 0 : index
    %c0_10 = arith.constant 0 : index
    %c0_11 = arith.constant 0 : index
    %16 = vector.load %arg5[%c0_8, %c0_9, %c0_10, %c0_11] : memref<1x8x16x16xf32, #tpu.memory_space<vmem>>, vector<1x8x16x16xf32>
    %17 = vector.shape_cast %16 : vector<1x8x16x16xf32> to vector<8x16x16xf32>
    %18 = vector.shape_cast %15 : vector<8x16x16xf32> to vector<1x8x16x16xf32>
    tpu.vector_store %arg5[%c0_8, %c0_9, %c0_10, %c0_11], %18 {strides = array<i32>} : memref<1x8x16x16xf32, #tpu.memory_space<vmem>>, vector<1x8x16x16xf32>,
    return
  }
  func.func @transform_0(%arg0: i32, %arg1: i32) -> (i32, i32) {
    %c0_i32 = arith.constant 0 : i32
    %c0_i32_0 = arith.constant 0 : i32
    %c0_i32_1 = arith.constant 0 : i32
    return %c0_i32, %c0_i32_0 : i32, i32
  }
  func.func @transform_1(%arg0: i32, %arg1: i32) -> (i32, i32) {
    %c0_i32 = arith.constant 0 : i32
    %c0_i32_0 = arith.constant 0 : i32
    %c0_i32_1 = arith.constant 0 : i32
    return %c0_i32, %c0_i32_0 : i32, i32
  }
  func.func @transform_2(%arg0: i32, %arg1: i32) -> (i32, i32, i32, i32) {
    %c0_i32 = arith.constant 0 : i32
    %c0_i32_0 = arith.constant 0 : i32
    %c0_i32_1 = arith.constant 0 : i32
    return %arg0, %c0_i32, %arg1, %c0_i32_0 : i32, i32, i32, i32
  }
  func.func @transform_3(%arg0: i32, %arg1: i32) -> (i32, i32, i32, i32) {
    %c0_i32 = arith.constant 0 : i32
    %c0_i32_0 = arith.constant 0 : i32
    %c0_i32_1 = arith.constant 0 : i32
    return %arg0, %c0_i32, %arg1, %c0_i32_0 : i32, i32, i32, i32
  }
}

module attributes {stable_mosaic.version = 11 : i64} {
  func.func @conv_stats_kernel(%arg0: i32, %arg1: i32, %arg2: memref<16x8x4xbf16, #tpu.memory_space<vmem>>, %arg3: memref<17x4x17xbf16, #tpu.memory_space<vmem>>, %arg4: memref<17x4x17xbf16, #tpu.memory_space<vmem>>, %arg5: memref<17x4x17xbf16, #tpu.memory_space<vmem>>, %arg6: memref<17x4x17xbf16, #tpu.memory_space<vmem>>, %arg7: memref<1x8x8x16xbf16, #tpu.memory_space<vmem>>, %arg8: memref<1x1x8x2xf32, #tpu.memory_space<vmem>>) attributes {dimension_semantics = [#tpu.dimension_semantics<parallel>, #tpu.dimension_semantics<parallel>], iteration_bounds = array<i64: 2, 2>, scalar_prefetch = 0 : i64, scratch_operands = 0 : i64, tpu.core_type = #tpu.core_type<tc>, window_params = [{pipeline_mode = #tpu.pipeline_mode<synchronous>, transform_indices = @transform_0, window_bounds = array<i64: 16, 8, 4>}, {transform_indices = @transform_1, window_bounds = array<i64: 17, 4, 17>}, {transform_indices = @transform_2, window_bounds = array<i64: 17, 4, 17>}, {transform_indices = @transform_3, window_bounds = array<i64: 17, 4, 17>}, {transform_indices = @transform_4, window_bounds = array<i64: 17, 4, 17>}, {transform_indices = @transform_5, window_bounds = array<i64: 1, 8, 8, 16>}, {transform_indices = @transform_6, window_bounds = array<i64: 1, 1, 8, 2>}]} {
    %c0 = arith.constant 0 : index
    %c0_0 = arith.constant 0 : index
    %c0_1 = arith.constant 0 : index
    %0 = vector.load %arg2[%c0, %c0_0, %c0_1] : memref<16x8x4xbf16, #tpu.memory_space<vmem>>, vector<1x8x4xbf16>
    %1 = vector.shape_cast %0 : vector<1x8x4xbf16> to vector<8x4xbf16>
    %c1 = arith.constant 1 : index
    %c0_2 = arith.constant 0 : index
    %c0_3 = arith.constant 0 : index
    %2 = vector.load %arg2[%c1, %c0_2, %c0_3] : memref<16x8x4xbf16, #tpu.memory_space<vmem>>, vector<1x8x4xbf16>
    %3 = vector.shape_cast %2 : vector<1x8x4xbf16> to vector<8x4xbf16>
    %c2 = arith.constant 2 : index
    %c0_4 = arith.constant 0 : index
    %c0_5 = arith.constant 0 : index
    %4 = vector.load %arg2[%c2, %c0_4, %c0_5] : memref<16x8x4xbf16, #tpu.memory_space<vmem>>, vector<1x8x4xbf16>
    %5 = vector.shape_cast %4 : vector<1x8x4xbf16> to vector<8x4xbf16>
    %c3 = arith.constant 3 : index
    %c0_6 = arith.constant 0 : index
    %c0_7 = arith.constant 0 : index
    %6 = vector.load %arg2[%c3, %c0_6, %c0_7] : memref<16x8x4xbf16, #tpu.memory_space<vmem>>, vector<1x8x4xbf16>
    %7 = vector.shape_cast %6 : vector<1x8x4xbf16> to vector<8x4xbf16>
    %c4 = arith.constant 4 : index
    %c0_8 = arith.constant 0 : index
    %c0_9 = arith.constant 0 : index
    %8 = vector.load %arg2[%c4, %c0_8, %c0_9] : memref<16x8x4xbf16, #tpu.memory_space<vmem>>, vector<1x8x4xbf16>
    %9 = vector.shape_cast %8 : vector<1x8x4xbf16> to vector<8x4xbf16>
    %c5 = arith.constant 5 : index
    %c0_10 = arith.constant 0 : index
    %c0_11 = arith.constant 0 : index
    %10 = vector.load %arg2[%c5, %c0_10, %c0_11] : memref<16x8x4xbf16, #tpu.memory_space<vmem>>, vector<1x8x4xbf16>
    %11 = vector.shape_cast %10 : vector<1x8x4xbf16> to vector<8x4xbf16>
    %c6 = arith.constant 6 : index
    %c0_12 = arith.constant 0 : index
    %c0_13 = arith.constant 0 : index
    %12 = vector.load %arg2[%c6, %c0_12, %c0_13] : memref<16x8x4xbf16, #tpu.memory_space<vmem>>, vector<1x8x4xbf16>
    %13 = vector.shape_cast %12 : vector<1x8x4xbf16> to vector<8x4xbf16>
    %c7 = arith.constant 7 : index
    %c0_14 = arith.constant 0 : index
    %c0_15 = arith.constant 0 : index
    %14 = vector.load %arg2[%c7, %c0_14, %c0_15] : memref<16x8x4xbf16, #tpu.memory_space<vmem>>, vector<1x8x4xbf16>
    %15 = vector.shape_cast %14 : vector<1x8x4xbf16> to vector<8x4xbf16>
    %c8 = arith.constant 8 : index
    %c0_16 = arith.constant 0 : index
    %c0_17 = arith.constant 0 : index
    %16 = vector.load %arg2[%c8, %c0_16, %c0_17] : memref<16x8x4xbf16, #tpu.memory_space<vmem>>, vector<1x8x4xbf16>
    %17 = vector.shape_cast %16 : vector<1x8x4xbf16> to vector<8x4xbf16>
    %c9 = arith.constant 9 : index
    %c0_18 = arith.constant 0 : index
    %c0_19 = arith.constant 0 : index
    %18 = vector.load %arg2[%c9, %c0_18, %c0_19] : memref<16x8x4xbf16, #tpu.memory_space<vmem>>, vector<1x8x4xbf16>
    %19 = vector.shape_cast %18 : vector<1x8x4xbf16> to vector<8x4xbf16>
    %c10 = arith.constant 10 : index
    %c0_20 = arith.constant 0 : index
    %c0_21 = arith.constant 0 : index
    %20 = vector.load %arg2[%c10, %c0_20, %c0_21] : memref<16x8x4xbf16, #tpu.memory_space<vmem>>, vector<1x8x4xbf16>
    %21 = vector.shape_cast %20 : vector<1x8x4xbf16> to vector<8x4xbf16>
    %c11 = arith.constant 11 : index
    %c0_22 = arith.constant 0 : index
    %c0_23 = arith.constant 0 : index
    %22 = vector.load %arg2[%c11, %c0_22, %c0_23] : memref<16x8x4xbf16, #tpu.memory_space<vmem>>, vector<1x8x4xbf16>
    %23 = vector.shape_cast %22 : vector<1x8x4xbf16> to vector<8x4xbf16>
    %c12 = arith.constant 12 : index
    %c0_24 = arith.constant 0 : index
    %c0_25 = arith.constant 0 : index
    %24 = vector.load %arg2[%c12, %c0_24, %c0_25] : memref<16x8x4xbf16, #tpu.memory_space<vmem>>, vector<1x8x4xbf16>
    %25 = vector.shape_cast %24 : vector<1x8x4xbf16> to vector<8x4xbf16>
    %c13 = arith.constant 13 : index
    %c0_26 = arith.constant 0 : index
    %c0_27 = arith.constant 0 : index
    %26 = vector.load %arg2[%c13, %c0_26, %c0_27] : memref<16x8x4xbf16, #tpu.memory_space<vmem>>, vector<1x8x4xbf16>
    %27 = vector.shape_cast %26 : vector<1x8x4xbf16> to vector<8x4xbf16>
    %c14 = arith.constant 14 : index
    %c0_28 = arith.constant 0 : index
    %c0_29 = arith.constant 0 : index
    %28 = vector.load %arg2[%c14, %c0_28, %c0_29] : memref<16x8x4xbf16, #tpu.memory_space<vmem>>, vector<1x8x4xbf16>
    %29 = vector.shape_cast %28 : vector<1x8x4xbf16> to vector<8x4xbf16>
    %c15 = arith.constant 15 : index
    %c0_30 = arith.constant 0 : index
    %c0_31 = arith.constant 0 : index
    %30 = vector.load %arg2[%c15, %c0_30, %c0_31] : memref<16x8x4xbf16, #tpu.memory_space<vmem>>, vector<1x8x4xbf16>
    %31 = vector.shape_cast %30 : vector<1x8x4xbf16> to vector<8x4xbf16>
    %cst = arith.constant 0.000000e+00 : f32
    %32 = vector.broadcast %cst : f32 to vector<8x1xf32>
    %cst_32 = arith.constant 0.000000e+00 : f32
    %33 = vector.broadcast %cst_32 : f32 to vector<8x1xf32>
    %c8_i32 = arith.constant 8 : i32
    %34 = arith.muli %arg1, %c8_i32 : i32
    %c0_i32 = arith.constant 0 : i32
    %35 = arith.addi %34, %c0_i32 : i32
    %cst_33 = arith.constant 0.000000e+00 : f32
    %36 = vector.broadcast %cst_33 : f32 to vector<8x16xf32>
    %c0_i32_34 = arith.constant 0 : i32
    %37 = arith.addi %35, %c0_i32_34 : i32
    %38 = arith.index_cast %37 : i32 to index
    %c0_35 = arith.constant 0 : index
    %c0_36 = arith.constant 0 : index
    %39 = vector.load %arg3[%38, %c0_35, %c0_36] : memref<17x4x17xbf16, #tpu.memory_space<vmem>>, vector<1x4x17xbf16>
    %40 = vector.shape_cast %39 : vector<1x4x17xbf16> to vector<4x17xbf16>
    %41 = vector.extract_strided_slice %40 {offsets = [0, 0], sizes = [4, 16], strides = [1, 1]} : vector<4x17xbf16> to vector<4x16xbf16>
    %cst_37 = arith.constant dense<0.000000e+00> : vector<8x16xf32>
    %42 = tpu.matmul %1, %41, %cst_37 {dimension_numbers = #tpu.dot_dimension_numbers<[1], [0], [0], [1], [0, 0, 1, 1], [], []>} : vector<8x4xbf16>, vector<4x16xbf16>, vector<8x16xf32> -> vector<8x16xf32>
    %43 = arith.addf %36, %42 : vector<8x16xf32>
    %44 = vector.extract_strided_slice %40 {offsets = [0, 1], sizes = [4, 16], strides = [1, 1]} : vector<4x17xbf16> to vector<4x16xbf16>
    %cst_38 = arith.constant dense<0.000000e+00> : vector<8x16xf32>
    %45 = tpu.matmul %5, %44, %cst_38 {dimension_numbers = #tpu.dot_dimension_numbers<[1], [0], [0], [1], [0, 0, 1, 1], [], []>} : vector<8x4xbf16>, vector<4x16xbf16>, vector<8x16xf32> -> vector<8x16xf32>
    %46 = arith.addf %43, %45 : vector<8x16xf32>
    %47 = arith.index_cast %37 : i32 to index
    %c0_39 = arith.constant 0 : index
    %c0_40 = arith.constant 0 : index
    %48 = vector.load %arg4[%47, %c0_39, %c0_40] : memref<17x4x17xbf16, #tpu.memory_space<vmem>>, vector<1x4x17xbf16>
    %49 = vector.shape_cast %48 : vector<1x4x17xbf16> to vector<4x17xbf16>
    %50 = vector.extract_strided_slice %49 {offsets = [0, 0], sizes = [4, 16], strides = [1, 1]} : vector<4x17xbf16> to vector<4x16xbf16>
    %cst_41 = arith.constant dense<0.000000e+00> : vector<8x16xf32>
    %51 = tpu.matmul %3, %50, %cst_41 {dimension_numbers = #tpu.dot_dimension_numbers<[1], [0], [0], [1], [0, 0, 1, 1], [], []>} : vector<8x4xbf16>, vector<4x16xbf16>, vector<8x16xf32> -> vector<8x16xf32>
    %52 = arith.addf %46, %51 : vector<8x16xf32>
    %53 = vector.extract_strided_slice %49 {offsets = [0, 1], sizes = [4, 16], strides = [1, 1]} : vector<4x17xbf16> to vector<4x16xbf16>
    %cst_42 = arith.constant dense<0.000000e+00> : vector<8x16xf32>
    %54 = tpu.matmul %7, %53, %cst_42 {dimension_numbers = #tpu.dot_dimension_numbers<[1], [0], [0], [1], [0, 0, 1, 1], [], []>} : vector<8x4xbf16>, vector<4x16xbf16>, vector<8x16xf32> -> vector<8x16xf32>
    %55 = arith.addf %52, %54 : vector<8x16xf32>
    %c1_i32 = arith.constant 1 : i32
    %56 = arith.addi %35, %c1_i32 : i32
    %57 = arith.index_cast %56 : i32 to index
    %c0_43 = arith.constant 0 : index
    %c0_44 = arith.constant 0 : index
    %58 = vector.load %arg3[%57, %c0_43, %c0_44] : memref<17x4x17xbf16, #tpu.memory_space<vmem>>, vector<1x4x17xbf16>
    %59 = vector.shape_cast %58 : vector<1x4x17xbf16> to vector<4x17xbf16>
    %60 = vector.extract_strided_slice %59 {offsets = [0, 0], sizes = [4, 16], strides = [1, 1]} : vector<4x17xbf16> to vector<4x16xbf16>
    %cst_45 = arith.constant dense<0.000000e+00> : vector<8x16xf32>
    %61 = tpu.matmul %17, %60, %cst_45 {dimension_numbers = #tpu.dot_dimension_numbers<[1], [0], [0], [1], [0, 0, 1, 1], [], []>} : vector<8x4xbf16>, vector<4x16xbf16>, vector<8x16xf32> -> vector<8x16xf32>
    %62 = arith.addf %55, %61 : vector<8x16xf32>
    %63 = vector.extract_strided_slice %59 {offsets = [0, 1], sizes = [4, 16], strides = [1, 1]} : vector<4x17xbf16> to vector<4x16xbf16>
    %cst_46 = arith.constant dense<0.000000e+00> : vector<8x16xf32>
    %64 = tpu.matmul %21, %63, %cst_46 {dimension_numbers = #tpu.dot_dimension_numbers<[1], [0], [0], [1], [0, 0, 1, 1], [], []>} : vector<8x4xbf16>, vector<4x16xbf16>, vector<8x16xf32> -> vector<8x16xf32>
    %65 = arith.addf %62, %64 : vector<8x16xf32>
    %66 = arith.index_cast %56 : i32 to index
    %c0_47 = arith.constant 0 : index
    %c0_48 = arith.constant 0 : index
    %67 = vector.load %arg4[%66, %c0_47, %c0_48] : memref<17x4x17xbf16, #tpu.memory_space<vmem>>, vector<1x4x17xbf16>
    %68 = vector.shape_cast %67 : vector<1x4x17xbf16> to vector<4x17xbf16>
    %69 = vector.extract_strided_slice %68 {offsets = [0, 0], sizes = [4, 16], strides = [1, 1]} : vector<4x17xbf16> to vector<4x16xbf16>
    %cst_49 = arith.constant dense<0.000000e+00> : vector<8x16xf32>
    %70 = tpu.matmul %19, %69, %cst_49 {dimension_numbers = #tpu.dot_dimension_numbers<[1], [0], [0], [1], [0, 0, 1, 1], [], []>} : vector<8x4xbf16>, vector<4x16xbf16>, vector<8x16xf32> -> vector<8x16xf32>
    %71 = arith.addf %65, %70 : vector<8x16xf32>
    %72 = vector.extract_strided_slice %68 {offsets = [0, 1], sizes = [4, 16], strides = [1, 1]} : vector<4x17xbf16> to vector<4x16xbf16>
    %cst_50 = arith.constant dense<0.000000e+00> : vector<8x16xf32>
    %73 = tpu.matmul %23, %72, %cst_50 {dimension_numbers = #tpu.dot_dimension_numbers<[1], [0], [0], [1], [0, 0, 1, 1], [], []>} : vector<8x4xbf16>, vector<4x16xbf16>, vector<8x16xf32> -> vector<8x16xf32>
    %74 = arith.addf %71, %73 : vector<8x16xf32>
    %c0_i32_51 = arith.constant 0 : i32
    %75 = arith.addi %35, %c0_i32_51 : i32
    %76 = arith.index_cast %75 : i32 to index
    %c0_52 = arith.constant 0 : index
    %c0_53 = arith.constant 0 : index
    %77 = vector.load %arg5[%76, %c0_52, %c0_53] : memref<17x4x17xbf16, #tpu.memory_space<vmem>>, vector<1x4x17xbf16>
    %78 = vector.shape_cast %77 : vector<1x4x17xbf16> to vector<4x17xbf16>
    %79 = vector.extract_strided_slice %78 {offsets = [0, 0], sizes = [4, 16], strides = [1, 1]} : vector<4x17xbf16> to vector<4x16xbf16>
    %cst_54 = arith.constant dense<0.000000e+00> : vector<8x16xf32>
    %80 = tpu.matmul %9, %79, %cst_54 {dimension_numbers = #tpu.dot_dimension_numbers<[1], [0], [0], [1], [0, 0, 1, 1], [], []>} : vector<8x4xbf16>, vector<4x16xbf16>, vector<8x16xf32> -> vector<8x16xf32>
    %81 = arith.addf %74, %80 : vector<8x16xf32>
    %82 = vector.extract_strided_slice %78 {offsets = [0, 1], sizes = [4, 16], strides = [1, 1]} : vector<4x17xbf16> to vector<4x16xbf16>
    %cst_55 = arith.constant dense<0.000000e+00> : vector<8x16xf32>
    %83 = tpu.matmul %13, %82, %cst_55 {dimension_numbers = #tpu.dot_dimension_numbers<[1], [0], [0], [1], [0, 0, 1, 1], [], []>} : vector<8x4xbf16>, vector<4x16xbf16>, vector<8x16xf32> -> vector<8x16xf32>
    %84 = arith.addf %81, %83 : vector<8x16xf32>
    %85 = arith.index_cast %75 : i32 to index
    %c0_56 = arith.constant 0 : index
    %c0_57 = arith.constant 0 : index
    %86 = vector.load %arg6[%85, %c0_56, %c0_57] : memref<17x4x17xbf16, #tpu.memory_space<vmem>>, vector<1x4x17xbf16>
    %87 = vector.shape_cast %86 : vector<1x4x17xbf16> to vector<4x17xbf16>
    %88 = vector.extract_strided_slice %87 {offsets = [0, 0], sizes = [4, 16], strides = [1, 1]} : vector<4x17xbf16> to vector<4x16xbf16>
    %cst_58 = arith.constant dense<0.000000e+00> : vector<8x16xf32>
    %89 = tpu.matmul %11, %88, %cst_58 {dimension_numbers = #tpu.dot_dimension_numbers<[1], [0], [0], [1], [0, 0, 1, 1], [], []>} : vector<8x4xbf16>, vector<4x16xbf16>, vector<8x16xf32> -> vector<8x16xf32>
    %90 = arith.addf %84, %89 : vector<8x16xf32>
    %91 = vector.extract_strided_slice %87 {offsets = [0, 1], sizes = [4, 16], strides = [1, 1]} : vector<4x17xbf16> to vector<4x16xbf16>
    %cst_59 = arith.constant dense<0.000000e+00> : vector<8x16xf32>
    %92 = tpu.matmul %15, %91, %cst_59 {dimension_numbers = #tpu.dot_dimension_numbers<[1], [0], [0], [1], [0, 0, 1, 1], [], []>} : vector<8x4xbf16>, vector<4x16xbf16>, vector<8x16xf32> -> vector<8x16xf32>
    %93 = arith.addf %90, %92 : vector<8x16xf32>
    %c1_i32_60 = arith.constant 1 : i32
    %94 = arith.addi %35, %c1_i32_60 : i32
    %95 = arith.index_cast %94 : i32 to index
    %c0_61 = arith.constant 0 : index
    %c0_62 = arith.constant 0 : index
    %96 = vector.load %arg5[%95, %c0_61, %c0_62] : memref<17x4x17xbf16, #tpu.memory_space<vmem>>, vector<1x4x17xbf16>
    %97 = vector.shape_cast %96 : vector<1x4x17xbf16> to vector<4x17xbf16>
    %98 = vector.extract_strided_slice %97 {offsets = [0, 0], sizes = [4, 16], strides = [1, 1]} : vector<4x17xbf16> to vector<4x16xbf16>
    %cst_63 = arith.constant dense<0.000000e+00> : vector<8x16xf32>
    %99 = tpu.matmul %25, %98, %cst_63 {dimension_numbers = #tpu.dot_dimension_numbers<[1], [0], [0], [1], [0, 0, 1, 1], [], []>} : vector<8x4xbf16>, vector<4x16xbf16>, vector<8x16xf32> -> vector<8x16xf32>
    %100 = arith.addf %93, %99 : vector<8x16xf32>
    %101 = vector.extract_strided_slice %97 {offsets = [0, 1], sizes = [4, 16], strides = [1, 1]} : vector<4x17xbf16> to vector<4x16xbf16>
    %cst_64 = arith.constant dense<0.000000e+00> : vector<8x16xf32>
    %102 = tpu.matmul %29, %101, %cst_64 {dimension_numbers = #tpu.dot_dimension_numbers<[1], [0], [0], [1], [0, 0, 1, 1], [], []>} : vector<8x4xbf16>, vector<4x16xbf16>, vector<8x16xf32> -> vector<8x16xf32>
    %103 = arith.addf %100, %102 : vector<8x16xf32>
    %104 = arith.index_cast %94 : i32 to index
    %c0_65 = arith.constant 0 : index
    %c0_66 = arith.constant 0 : index
    %105 = vector.load %arg6[%104, %c0_65, %c0_66] : memref<17x4x17xbf16, #tpu.memory_space<vmem>>, vector<1x4x17xbf16>
    %106 = vector.shape_cast %105 : vector<1x4x17xbf16> to vector<4x17xbf16>
    %107 = vector.extract_strided_slice %106 {offsets = [0, 0], sizes = [4, 16], strides = [1, 1]} : vector<4x17xbf16> to vector<4x16xbf16>
    %cst_67 = arith.constant dense<0.000000e+00> : vector<8x16xf32>
    %108 = tpu.matmul %27, %107, %cst_67 {dimension_numbers = #tpu.dot_dimension_numbers<[1], [0], [0], [1], [0, 0, 1, 1], [], []>} : vector<8x4xbf16>, vector<4x16xbf16>, vector<8x16xf32> -> vector<8x16xf32>
    %109 = arith.addf %103, %108 : vector<8x16xf32>
    %110 = vector.extract_strided_slice %106 {offsets = [0, 1], sizes = [4, 16], strides = [1, 1]} : vector<4x17xbf16> to vector<4x16xbf16>
    %cst_68 = arith.constant dense<0.000000e+00> : vector<8x16xf32>
    %111 = tpu.matmul %31, %110, %cst_68 {dimension_numbers = #tpu.dot_dimension_numbers<[1], [0], [0], [1], [0, 0, 1, 1], [], []>} : vector<8x4xbf16>, vector<4x16xbf16>, vector<8x16xf32> -> vector<8x16xf32>
    %112 = arith.addf %109, %111 : vector<8x16xf32>
    %113 = arith.truncf %112 : vector<8x16xf32> to vector<8x16xbf16>
    %c0_69 = arith.constant 0 : index
    %c0_70 = arith.constant 0 : index
    %c0_71 = arith.constant 0 : index
    %c0_72 = arith.constant 0 : index
    %114 = vector.load %arg7[%c0_69, %c0_70, %c0_71, %c0_72] : memref<1x8x8x16xbf16, #tpu.memory_space<vmem>>, vector<1x8x1x16xbf16>
    %115 = vector.shape_cast %114 : vector<1x8x1x16xbf16> to vector<8x16xbf16>
    %116 = vector.shape_cast %113 : vector<8x16xbf16> to vector<1x8x1x16xbf16>
    tpu.vector_store %arg7[%c0_69, %c0_70, %c0_71, %c0_72], %116 {strides = array<i32>} : memref<1x8x8x16xbf16, #tpu.memory_space<vmem>>, vector<1x8x1x16xbf16>,
    %cst_73 = arith.constant dense<0.000000e+00> : vector<8xf32>
    %117 = vector.multi_reduction <add>, %112, %cst_73 [1] : vector<8x16xf32> to vector<8xf32>
    %118 = vector.shape_cast %117 : vector<8xf32> to vector<8x1xf32>
    %119 = arith.addf %32, %118 : vector<8x1xf32>
    %120 = arith.mulf %112, %112 : vector<8x16xf32>
    %cst_74 = arith.constant dense<0.000000e+00> : vector<8xf32>
    %121 = vector.multi_reduction <add>, %120, %cst_74 [1] : vector<8x16xf32> to vector<8xf32>
    %122 = vector.shape_cast %121 : vector<8xf32> to vector<8x1xf32>
    %123 = arith.addf %33, %122 : vector<8x1xf32>
    %c8_i32_75 = arith.constant 8 : i32
    %124 = arith.muli %arg1, %c8_i32_75 : i32
    %c1_i32_76 = arith.constant 1 : i32
    %125 = arith.addi %124, %c1_i32_76 : i32
    %cst_77 = arith.constant 0.000000e+00 : f32
    %126 = vector.broadcast %cst_77 : f32 to vector<8x16xf32>
    %c0_i32_78 = arith.constant 0 : i32
    %127 = arith.addi %125, %c0_i32_78 : i32
    %128 = arith.index_cast %127 : i32 to index
    %c0_79 = arith.constant 0 : index
    %c0_80 = arith.constant 0 : index
    %129 = vector.load %arg3[%128, %c0_79, %c0_80] : memref<17x4x17xbf16, #tpu.memory_space<vmem>>, vector<1x4x17xbf16>
    %130 = vector.shape_cast %129 : vector<1x4x17xbf16> to vector<4x17xbf16>
    %131 = vector.extract_strided_slice %130 {offsets = [0, 0], sizes = [4, 16], strides = [1, 1]} : vector<4x17xbf16> to vector<4x16xbf16>
    %cst_81 = arith.constant dense<0.000000e+00> : vector<8x16xf32>
    %132 = tpu.matmul %1, %131, %cst_81 {dimension_numbers = #tpu.dot_dimension_numbers<[1], [0], [0], [1], [0, 0, 1, 1], [], []>} : vector<8x4xbf16>, vector<4x16xbf16>, vector<8x16xf32> -> vector<8x16xf32>
    %133 = arith.addf %126, %132 : vector<8x16xf32>
    %134 = vector.extract_strided_slice %130 {offsets = [0, 1], sizes = [4, 16], strides = [1, 1]} : vector<4x17xbf16> to vector<4x16xbf16>
    %cst_82 = arith.constant dense<0.000000e+00> : vector<8x16xf32>
    %135 = tpu.matmul %5, %134, %cst_82 {dimension_numbers = #tpu.dot_dimension_numbers<[1], [0], [0], [1], [0, 0, 1, 1], [], []>} : vector<8x4xbf16>, vector<4x16xbf16>, vector<8x16xf32> -> vector<8x16xf32>
    %136 = arith.addf %133, %135 : vector<8x16xf32>
    %137 = arith.index_cast %127 : i32 to index
    %c0_83 = arith.constant 0 : index
    %c0_84 = arith.constant 0 : index
    %138 = vector.load %arg4[%137, %c0_83, %c0_84] : memref<17x4x17xbf16, #tpu.memory_space<vmem>>, vector<1x4x17xbf16>
    %139 = vector.shape_cast %138 : vector<1x4x17xbf16> to vector<4x17xbf16>
    %140 = vector.extract_strided_slice %139 {offsets = [0, 0], sizes = [4, 16], strides = [1, 1]} : vector<4x17xbf16> to vector<4x16xbf16>
    %cst_85 = arith.constant dense<0.000000e+00> : vector<8x16xf32>
    %141 = tpu.matmul %3, %140, %cst_85 {dimension_numbers = #tpu.dot_dimension_numbers<[1], [0], [0], [1], [0, 0, 1, 1], [], []>} : vector<8x4xbf16>, vector<4x16xbf16>, vector<8x16xf32> -> vector<8x16xf32>
    %142 = arith.addf %136, %141 : vector<8x16xf32>
    %143 = vector.extract_strided_slice %139 {offsets = [0, 1], sizes = [4, 16], strides = [1, 1]} : vector<4x17xbf16> to vector<4x16xbf16>
    %cst_86 = arith.constant dense<0.000000e+00> : vector<8x16xf32>
    %144 = tpu.matmul %7, %143, %cst_86 {dimension_numbers = #tpu.dot_dimension_numbers<[1], [0], [0], [1], [0, 0, 1, 1], [], []>} : vector<8x4xbf16>, vector<4x16xbf16>, vector<8x16xf32> -> vector<8x16xf32>
    %145 = arith.addf %142, %144 : vector<8x16xf32>
    %c1_i32_87 = arith.constant 1 : i32
    %146 = arith.addi %125, %c1_i32_87 : i32
    %147 = arith.index_cast %146 : i32 to index
    %c0_88 = arith.constant 0 : index
    %c0_89 = arith.constant 0 : index
    %148 = vector.load %arg3[%147, %c0_88, %c0_89] : memref<17x4x17xbf16, #tpu.memory_space<vmem>>, vector<1x4x17xbf16>
    %149 = vector.shape_cast %148 : vector<1x4x17xbf16> to vector<4x17xbf16>
    %150 = vector.extract_strided_slice %149 {offsets = [0, 0], sizes = [4, 16], strides = [1, 1]} : vector<4x17xbf16> to vector<4x16xbf16>
    %cst_90 = arith.constant dense<0.000000e+00> : vector<8x16xf32>
    %151 = tpu.matmul %17, %150, %cst_90 {dimension_numbers = #tpu.dot_dimension_numbers<[1], [0], [0], [1], [0, 0, 1, 1], [], []>} : vector<8x4xbf16>, vector<4x16xbf16>, vector<8x16xf32> -> vector<8x16xf32>
    %152 = arith.addf %145, %151 : vector<8x16xf32>
    %153 = vector.extract_strided_slice %149 {offsets = [0, 1], sizes = [4, 16], strides = [1, 1]} : vector<4x17xbf16> to vector<4x16xbf16>
    %cst_91 = arith.constant dense<0.000000e+00> : vector<8x16xf32>
    %154 = tpu.matmul %21, %153, %cst_91 {dimension_numbers = #tpu.dot_dimension_numbers<[1], [0], [0], [1], [0, 0, 1, 1], [], []>} : vector<8x4xbf16>, vector<4x16xbf16>, vector<8x16xf32> -> vector<8x16xf32>
    %155 = arith.addf %152, %154 : vector<8x16xf32>
    %156 = arith.index_cast %146 : i32 to index
    %c0_92 = arith.constant 0 : index
    %c0_93 = arith.constant 0 : index
    %157 = vector.load %arg4[%156, %c0_92, %c0_93] : memref<17x4x17xbf16, #tpu.memory_space<vmem>>, vector<1x4x17xbf16>
    %158 = vector.shape_cast %157 : vector<1x4x17xbf16> to vector<4x17xbf16>
    %159 = vector.extract_strided_slice %158 {offsets = [0, 0], sizes = [4, 16], strides = [1, 1]} : vector<4x17xbf16> to vector<4x16xbf16>
    %cst_94 = arith.constant dense<0.000000e+00> : vector<8x16xf32>
    %160 = tpu.matmul %19, %159, %cst_94 {dimension_numbers = #tpu.dot_dimension_numbers<[1], [0], [0], [1], [0, 0, 1, 1], [], []>} : vector<8x4xbf16>, vector<4x16xbf16>, vector<8x16xf32> -> vector<8x16xf32>
    %161 = arith.addf %155, %160 : vector<8x16xf32>
    %162 = vector.extract_strided_slice %158 {offsets = [0, 1], sizes = [4, 16], strides = [1, 1]} : vector<4x17xbf16> to vector<4x16xbf16>
    %cst_95 = arith.constant dense<0.000000e+00> : vector<8x16xf32>
    %163 = tpu.matmul %23, %162, %cst_95 {dimension_numbers = #tpu.dot_dimension_numbers<[1], [0], [0], [1], [0, 0, 1, 1], [], []>} : vector<8x4xbf16>, vector<4x16xbf16>, vector<8x16xf32> -> vector<8x16xf32>
    %164 = arith.addf %161, %163 : vector<8x16xf32>
    %c0_i32_96 = arith.constant 0 : i32
    %165 = arith.addi %125, %c0_i32_96 : i32
    %166 = arith.index_cast %165 : i32 to index
    %c0_97 = arith.constant 0 : index
    %c0_98 = arith.constant 0 : index
    %167 = vector.load %arg5[%166, %c0_97, %c0_98] : memref<17x4x17xbf16, #tpu.memory_space<vmem>>, vector<1x4x17xbf16>
    %168 = vector.shape_cast %167 : vector<1x4x17xbf16> to vector<4x17xbf16>
    %169 = vector.extract_strided_slice %168 {offsets = [0, 0], sizes = [4, 16], strides = [1, 1]} : vector<4x17xbf16> to vector<4x16xbf16>
    %cst_99 = arith.constant dense<0.000000e+00> : vector<8x16xf32>
    %170 = tpu.matmul %9, %169, %cst_99 {dimension_numbers = #tpu.dot_dimension_numbers<[1], [0], [0], [1], [0, 0, 1, 1], [], []>} : vector<8x4xbf16>, vector<4x16xbf16>, vector<8x16xf32> -> vector<8x16xf32>
    %171 = arith.addf %164, %170 : vector<8x16xf32>
    %172 = vector.extract_strided_slice %168 {offsets = [0, 1], sizes = [4, 16], strides = [1, 1]} : vector<4x17xbf16> to vector<4x16xbf16>
    %cst_100 = arith.constant dense<0.000000e+00> : vector<8x16xf32>
    %173 = tpu.matmul %13, %172, %cst_100 {dimension_numbers = #tpu.dot_dimension_numbers<[1], [0], [0], [1], [0, 0, 1, 1], [], []>} : vector<8x4xbf16>, vector<4x16xbf16>, vector<8x16xf32> -> vector<8x16xf32>
    %174 = arith.addf %171, %173 : vector<8x16xf32>
    %175 = arith.index_cast %165 : i32 to index
    %c0_101 = arith.constant 0 : index
    %c0_102 = arith.constant 0 : index
    %176 = vector.load %arg6[%175, %c0_101, %c0_102] : memref<17x4x17xbf16, #tpu.memory_space<vmem>>, vector<1x4x17xbf16>
    %177 = vector.shape_cast %176 : vector<1x4x17xbf16> to vector<4x17xbf16>
    %178 = vector.extract_strided_slice %177 {offsets = [0, 0], sizes = [4, 16], strides = [1, 1]} : vector<4x17xbf16> to vector<4x16xbf16>
    %cst_103 = arith.constant dense<0.000000e+00> : vector<8x16xf32>
    %179 = tpu.matmul %11, %178, %cst_103 {dimension_numbers = #tpu.dot_dimension_numbers<[1], [0], [0], [1], [0, 0, 1, 1], [], []>} : vector<8x4xbf16>, vector<4x16xbf16>, vector<8x16xf32> -> vector<8x16xf32>
    %180 = arith.addf %174, %179 : vector<8x16xf32>
    %181 = vector.extract_strided_slice %177 {offsets = [0, 1], sizes = [4, 16], strides = [1, 1]} : vector<4x17xbf16> to vector<4x16xbf16>
    %cst_104 = arith.constant dense<0.000000e+00> : vector<8x16xf32>
    %182 = tpu.matmul %15, %181, %cst_104 {dimension_numbers = #tpu.dot_dimension_numbers<[1], [0], [0], [1], [0, 0, 1, 1], [], []>} : vector<8x4xbf16>, vector<4x16xbf16>, vector<8x16xf32> -> vector<8x16xf32>
    %183 = arith.addf %180, %182 : vector<8x16xf32>
    %c1_i32_105 = arith.constant 1 : i32
    %184 = arith.addi %125, %c1_i32_105 : i32
    %185 = arith.index_cast %184 : i32 to index
    %c0_106 = arith.constant 0 : index
    %c0_107 = arith.constant 0 : index
    %186 = vector.load %arg5[%185, %c0_106, %c0_107] : memref<17x4x17xbf16, #tpu.memory_space<vmem>>, vector<1x4x17xbf16>
    %187 = vector.shape_cast %186 : vector<1x4x17xbf16> to vector<4x17xbf16>
    %188 = vector.extract_strided_slice %187 {offsets = [0, 0], sizes = [4, 16], strides = [1, 1]} : vector<4x17xbf16> to vector<4x16xbf16>
    %cst_108 = arith.constant dense<0.000000e+00> : vector<8x16xf32>
    %189 = tpu.matmul %25, %188, %cst_108 {dimension_numbers = #tpu.dot_dimension_numbers<[1], [0], [0], [1], [0, 0, 1, 1], [], []>} : vector<8x4xbf16>, vector<4x16xbf16>, vector<8x16xf32> -> vector<8x16xf32>
    %190 = arith.addf %183, %189 : vector<8x16xf32>
    %191 = vector.extract_strided_slice %187 {offsets = [0, 1], sizes = [4, 16], strides = [1, 1]} : vector<4x17xbf16> to vector<4x16xbf16>
    %cst_109 = arith.constant dense<0.000000e+00> : vector<8x16xf32>
    %192 = tpu.matmul %29, %191, %cst_109 {dimension_numbers = #tpu.dot_dimension_numbers<[1], [0], [0], [1], [0, 0, 1, 1], [], []>} : vector<8x4xbf16>, vector<4x16xbf16>, vector<8x16xf32> -> vector<8x16xf32>
    %193 = arith.addf %190, %192 : vector<8x16xf32>
    %194 = arith.index_cast %184 : i32 to index
    %c0_110 = arith.constant 0 : index
    %c0_111 = arith.constant 0 : index
    %195 = vector.load %arg6[%194, %c0_110, %c0_111] : memref<17x4x17xbf16, #tpu.memory_space<vmem>>, vector<1x4x17xbf16>
    %196 = vector.shape_cast %195 : vector<1x4x17xbf16> to vector<4x17xbf16>
    %197 = vector.extract_strided_slice %196 {offsets = [0, 0], sizes = [4, 16], strides = [1, 1]} : vector<4x17xbf16> to vector<4x16xbf16>
    %cst_112 = arith.constant dense<0.000000e+00> : vector<8x16xf32>
    %198 = tpu.matmul %27, %197, %cst_112 {dimension_numbers = #tpu.dot_dimension_numbers<[1], [0], [0], [1], [0, 0, 1, 1], [], []>} : vector<8x4xbf16>, vector<4x16xbf16>, vector<8x16xf32> -> vector<8x16xf32>
    %199 = arith.addf %193, %198 : vector<8x16xf32>
    %200 = vector.extract_strided_slice %196 {offsets = [0, 1], sizes = [4, 16], strides = [1, 1]} : vector<4x17xbf16> to vector<4x16xbf16>
    %cst_113 = arith.constant dense<0.000000e+00> : vector<8x16xf32>
    %201 = tpu.matmul %31, %200, %cst_113 {dimension_numbers = #tpu.dot_dimension_numbers<[1], [0], [0], [1], [0, 0, 1, 1], [], []>} : vector<8x4xbf16>, vector<4x16xbf16>, vector<8x16xf32> -> vector<8x16xf32>
    %202 = arith.addf %199, %201 : vector<8x16xf32>
    %203 = arith.truncf %202 : vector<8x16xf32> to vector<8x16xbf16>
    %c0_114 = arith.constant 0 : index
    %c0_115 = arith.constant 0 : index
    %c1_116 = arith.constant 1 : index
    %c0_117 = arith.constant 0 : index
    %204 = vector.load %arg7[%c0_114, %c0_115, %c1_116, %c0_117] : memref<1x8x8x16xbf16, #tpu.memory_space<vmem>>, vector<1x8x1x16xbf16>
    %205 = vector.shape_cast %204 : vector<1x8x1x16xbf16> to vector<8x16xbf16>
    %206 = vector.shape_cast %203 : vector<8x16xbf16> to vector<1x8x1x16xbf16>
    tpu.vector_store %arg7[%c0_114, %c0_115, %c1_116, %c0_117], %206 {strides = array<i32>} : memref<1x8x8x16xbf16, #tpu.memory_space<vmem>>, vector<1x8x1x16xbf16>,
    %cst_118 = arith.constant dense<0.000000e+00> : vector<8xf32>
    %207 = vector.multi_reduction <add>, %202, %cst_118 [1] : vector<8x16xf32> to vector<8xf32>
    %208 = vector.shape_cast %207 : vector<8xf32> to vector<8x1xf32>
    %209 = arith.addf %119, %208 : vector<8x1xf32>
    %210 = arith.mulf %202, %202 : vector<8x16xf32>
    %cst_119 = arith.constant dense<0.000000e+00> : vector<8xf32>
    %211 = vector.multi_reduction <add>, %210, %cst_119 [1] : vector<8x16xf32> to vector<8xf32>
    %212 = vector.shape_cast %211 : vector<8xf32> to vector<8x1xf32>
    %213 = arith.addf %123, %212 : vector<8x1xf32>
    %c8_i32_120 = arith.constant 8 : i32
    %214 = arith.muli %arg1, %c8_i32_120 : i32
    %c2_i32 = arith.constant 2 : i32
    %215 = arith.addi %214, %c2_i32 : i32
    %cst_121 = arith.constant 0.000000e+00 : f32
    %216 = vector.broadcast %cst_121 : f32 to vector<8x16xf32>
    %c0_i32_122 = arith.constant 0 : i32
    %217 = arith.addi %215, %c0_i32_122 : i32
    %218 = arith.index_cast %217 : i32 to index
    %c0_123 = arith.constant 0 : index
    %c0_124 = arith.constant 0 : index
    %219 = vector.load %arg3[%218, %c0_123, %c0_124] : memref<17x4x17xbf16, #tpu.memory_space<vmem>>, vector<1x4x17xbf16>
    %220 = vector.shape_cast %219 : vector<1x4x17xbf16> to vector<4x17xbf16>
    %221 = vector.extract_strided_slice %220 {offsets = [0, 0], sizes = [4, 16], strides = [1, 1]} : vector<4x17xbf16> to vector<4x16xbf16>
    %cst_125 = arith.constant dense<0.000000e+00> : vector<8x16xf32>
    %222 = tpu.matmul %1, %221, %cst_125 {dimension_numbers = #tpu.dot_dimension_numbers<[1], [0], [0], [1], [0, 0, 1, 1], [], []>} : vector<8x4xbf16>, vector<4x16xbf16>, vector<8x16xf32> -> vector<8x16xf32>
    %223 = arith.addf %216, %222 : vector<8x16xf32>
    %224 = vector.extract_strided_slice %220 {offsets = [0, 1], sizes = [4, 16], strides = [1, 1]} : vector<4x17xbf16> to vector<4x16xbf16>
    %cst_126 = arith.constant dense<0.000000e+00> : vector<8x16xf32>
    %225 = tpu.matmul %5, %224, %cst_126 {dimension_numbers = #tpu.dot_dimension_numbers<[1], [0], [0], [1], [0, 0, 1, 1], [], []>} : vector<8x4xbf16>, vector<4x16xbf16>, vector<8x16xf32> -> vector<8x16xf32>
    %226 = arith.addf %223, %225 : vector<8x16xf32>
    %227 = arith.index_cast %217 : i32 to index
    %c0_127 = arith.constant 0 : index
    %c0_128 = arith.constant 0 : index
    %228 = vector.load %arg4[%227, %c0_127, %c0_128] : memref<17x4x17xbf16, #tpu.memory_space<vmem>>, vector<1x4x17xbf16>
    %229 = vector.shape_cast %228 : vector<1x4x17xbf16> to vector<4x17xbf16>
    %230 = vector.extract_strided_slice %229 {offsets = [0, 0], sizes = [4, 16], strides = [1, 1]} : vector<4x17xbf16> to vector<4x16xbf16>
    %cst_129 = arith.constant dense<0.000000e+00> : vector<8x16xf32>
    %231 = tpu.matmul %3, %230, %cst_129 {dimension_numbers = #tpu.dot_dimension_numbers<[1], [0], [0], [1], [0, 0, 1, 1], [], []>} : vector<8x4xbf16>, vector<4x16xbf16>, vector<8x16xf32> -> vector<8x16xf32>
    %232 = arith.addf %226, %231 : vector<8x16xf32>
    %233 = vector.extract_strided_slice %229 {offsets = [0, 1], sizes = [4, 16], strides = [1, 1]} : vector<4x17xbf16> to vector<4x16xbf16>
    %cst_130 = arith.constant dense<0.000000e+00> : vector<8x16xf32>
    %234 = tpu.matmul %7, %233, %cst_130 {dimension_numbers = #tpu.dot_dimension_numbers<[1], [0], [0], [1], [0, 0, 1, 1], [], []>} : vector<8x4xbf16>, vector<4x16xbf16>, vector<8x16xf32> -> vector<8x16xf32>
    %235 = arith.addf %232, %234 : vector<8x16xf32>
    %c1_i32_131 = arith.constant 1 : i32
    %236 = arith.addi %215, %c1_i32_131 : i32
    %237 = arith.index_cast %236 : i32 to index
    %c0_132 = arith.constant 0 : index
    %c0_133 = arith.constant 0 : index
    %238 = vector.load %arg3[%237, %c0_132, %c0_133] : memref<17x4x17xbf16, #tpu.memory_space<vmem>>, vector<1x4x17xbf16>
    %239 = vector.shape_cast %238 : vector<1x4x17xbf16> to vector<4x17xbf16>
    %240 = vector.extract_strided_slice %239 {offsets = [0, 0], sizes = [4, 16], strides = [1, 1]} : vector<4x17xbf16> to vector<4x16xbf16>
    %cst_134 = arith.constant dense<0.000000e+00> : vector<8x16xf32>
    %241 = tpu.matmul %17, %240, %cst_134 {dimension_numbers = #tpu.dot_dimension_numbers<[1], [0], [0], [1], [0, 0, 1, 1], [], []>} : vector<8x4xbf16>, vector<4x16xbf16>, vector<8x16xf32> -> vector<8x16xf32>
    %242 = arith.addf %235, %241 : vector<8x16xf32>
    %243 = vector.extract_strided_slice %239 {offsets = [0, 1], sizes = [4, 16], strides = [1, 1]} : vector<4x17xbf16> to vector<4x16xbf16>
    %cst_135 = arith.constant dense<0.000000e+00> : vector<8x16xf32>
    %244 = tpu.matmul %21, %243, %cst_135 {dimension_numbers = #tpu.dot_dimension_numbers<[1], [0], [0], [1], [0, 0, 1, 1], [], []>} : vector<8x4xbf16>, vector<4x16xbf16>, vector<8x16xf32> -> vector<8x16xf32>
    %245 = arith.addf %242, %244 : vector<8x16xf32>
    %246 = arith.index_cast %236 : i32 to index
    %c0_136 = arith.constant 0 : index
    %c0_137 = arith.constant 0 : index
    %247 = vector.load %arg4[%246, %c0_136, %c0_137] : memref<17x4x17xbf16, #tpu.memory_space<vmem>>, vector<1x4x17xbf16>
    %248 = vector.shape_cast %247 : vector<1x4x17xbf16> to vector<4x17xbf16>
    %249 = vector.extract_strided_slice %248 {offsets = [0, 0], sizes = [4, 16], strides = [1, 1]} : vector<4x17xbf16> to vector<4x16xbf16>
    %cst_138 = arith.constant dense<0.000000e+00> : vector<8x16xf32>
    %250 = tpu.matmul %19, %249, %cst_138 {dimension_numbers = #tpu.dot_dimension_numbers<[1], [0], [0], [1], [0, 0, 1, 1], [], []>} : vector<8x4xbf16>, vector<4x16xbf16>, vector<8x16xf32> -> vector<8x16xf32>
    %251 = arith.addf %245, %250 : vector<8x16xf32>
    %252 = vector.extract_strided_slice %248 {offsets = [0, 1], sizes = [4, 16], strides = [1, 1]} : vector<4x17xbf16> to vector<4x16xbf16>
    %cst_139 = arith.constant dense<0.000000e+00> : vector<8x16xf32>
    %253 = tpu.matmul %23, %252, %cst_139 {dimension_numbers = #tpu.dot_dimension_numbers<[1], [0], [0], [1], [0, 0, 1, 1], [], []>} : vector<8x4xbf16>, vector<4x16xbf16>, vector<8x16xf32> -> vector<8x16xf32>
    %254 = arith.addf %251, %253 : vector<8x16xf32>
    %c0_i32_140 = arith.constant 0 : i32
    %255 = arith.addi %215, %c0_i32_140 : i32
    %256 = arith.index_cast %255 : i32 to index
    %c0_141 = arith.constant 0 : index
    %c0_142 = arith.constant 0 : index
    %257 = vector.load %arg5[%256, %c0_141, %c0_142] : memref<17x4x17xbf16, #tpu.memory_space<vmem>>, vector<1x4x17xbf16>
    %258 = vector.shape_cast %257 : vector<1x4x17xbf16> to vector<4x17xbf16>
    %259 = vector.extract_strided_slice %258 {offsets = [0, 0], sizes = [4, 16], strides = [1, 1]} : vector<4x17xbf16> to vector<4x16xbf16>
    %cst_143 = arith.constant dense<0.000000e+00> : vector<8x16xf32>
    %260 = tpu.matmul %9, %259, %cst_143 {dimension_numbers = #tpu.dot_dimension_numbers<[1], [0], [0], [1], [0, 0, 1, 1], [], []>} : vector<8x4xbf16>, vector<4x16xbf16>, vector<8x16xf32> -> vector<8x16xf32>
    %261 = arith.addf %254, %260 : vector<8x16xf32>
    %262 = vector.extract_strided_slice %258 {offsets = [0, 1], sizes = [4, 16], strides = [1, 1]} : vector<4x17xbf16> to vector<4x16xbf16>
    %cst_144 = arith.constant dense<0.000000e+00> : vector<8x16xf32>
    %263 = tpu.matmul %13, %262, %cst_144 {dimension_numbers = #tpu.dot_dimension_numbers<[1], [0], [0], [1], [0, 0, 1, 1], [], []>} : vector<8x4xbf16>, vector<4x16xbf16>, vector<8x16xf32> -> vector<8x16xf32>
    %264 = arith.addf %261, %263 : vector<8x16xf32>
    %265 = arith.index_cast %255 : i32 to index
    %c0_145 = arith.constant 0 : index
    %c0_146 = arith.constant 0 : index
    %266 = vector.load %arg6[%265, %c0_145, %c0_146] : memref<17x4x17xbf16, #tpu.memory_space<vmem>>, vector<1x4x17xbf16>
    %267 = vector.shape_cast %266 : vector<1x4x17xbf16> to vector<4x17xbf16>
    %268 = vector.extract_strided_slice %267 {offsets = [0, 0], sizes = [4, 16], strides = [1, 1]} : vector<4x17xbf16> to vector<4x16xbf16>
    %cst_147 = arith.constant dense<0.000000e+00> : vector<8x16xf32>
    %269 = tpu.matmul %11, %268, %cst_147 {dimension_numbers = #tpu.dot_dimension_numbers<[1], [0], [0], [1], [0, 0, 1, 1], [], []>} : vector<8x4xbf16>, vector<4x16xbf16>, vector<8x16xf32> -> vector<8x16xf32>
    %270 = arith.addf %264, %269 : vector<8x16xf32>
    %271 = vector.extract_strided_slice %267 {offsets = [0, 1], sizes = [4, 16], strides = [1, 1]} : vector<4x17xbf16> to vector<4x16xbf16>
    %cst_148 = arith.constant dense<0.000000e+00> : vector<8x16xf32>
    %272 = tpu.matmul %15, %271, %cst_148 {dimension_numbers = #tpu.dot_dimension_numbers<[1], [0], [0], [1], [0, 0, 1, 1], [], []>} : vector<8x4xbf16>, vector<4x16xbf16>, vector<8x16xf32> -> vector<8x16xf32>
    %273 = arith.addf %270, %272 : vector<8x16xf32>
    %c1_i32_149 = arith.constant 1 : i32
    %274 = arith.addi %215, %c1_i32_149 : i32
    %275 = arith.index_cast %274 : i32 to index
    %c0_150 = arith.constant 0 : index
    %c0_151 = arith.constant 0 : index
    %276 = vector.load %arg5[%275, %c0_150, %c0_151] : memref<17x4x17xbf16, #tpu.memory_space<vmem>>, vector<1x4x17xbf16>
    %277 = vector.shape_cast %276 : vector<1x4x17xbf16> to vector<4x17xbf16>
    %278 = vector.extract_strided_slice %277 {offsets = [0, 0], sizes = [4, 16], strides = [1, 1]} : vector<4x17xbf16> to vector<4x16xbf16>
    %cst_152 = arith.constant dense<0.000000e+00> : vector<8x16xf32>
    %279 = tpu.matmul %25, %278, %cst_152 {dimension_numbers = #tpu.dot_dimension_numbers<[1], [0], [0], [1], [0, 0, 1, 1], [], []>} : vector<8x4xbf16>, vector<4x16xbf16>, vector<8x16xf32> -> vector<8x16xf32>
    %280 = arith.addf %273, %279 : vector<8x16xf32>
    %281 = vector.extract_strided_slice %277 {offsets = [0, 1], sizes = [4, 16], strides = [1, 1]} : vector<4x17xbf16> to vector<4x16xbf16>
    %cst_153 = arith.constant dense<0.000000e+00> : vector<8x16xf32>
    %282 = tpu.matmul %29, %281, %cst_153 {dimension_numbers = #tpu.dot_dimension_numbers<[1], [0], [0], [1], [0, 0, 1, 1], [], []>} : vector<8x4xbf16>, vector<4x16xbf16>, vector<8x16xf32> -> vector<8x16xf32>
    %283 = arith.addf %280, %282 : vector<8x16xf32>
    %284 = arith.index_cast %274 : i32 to index
    %c0_154 = arith.constant 0 : index
    %c0_155 = arith.constant 0 : index
    %285 = vector.load %arg6[%284, %c0_154, %c0_155] : memref<17x4x17xbf16, #tpu.memory_space<vmem>>, vector<1x4x17xbf16>
    %286 = vector.shape_cast %285 : vector<1x4x17xbf16> to vector<4x17xbf16>
    %287 = vector.extract_strided_slice %286 {offsets = [0, 0], sizes = [4, 16], strides = [1, 1]} : vector<4x17xbf16> to vector<4x16xbf16>
    %cst_156 = arith.constant dense<0.000000e+00> : vector<8x16xf32>
    %288 = tpu.matmul %27, %287, %cst_156 {dimension_numbers = #tpu.dot_dimension_numbers<[1], [0], [0], [1], [0, 0, 1, 1], [], []>} : vector<8x4xbf16>, vector<4x16xbf16>, vector<8x16xf32> -> vector<8x16xf32>
    %289 = arith.addf %283, %288 : vector<8x16xf32>
    %290 = vector.extract_strided_slice %286 {offsets = [0, 1], sizes = [4, 16], strides = [1, 1]} : vector<4x17xbf16> to vector<4x16xbf16>
    %cst_157 = arith.constant dense<0.000000e+00> : vector<8x16xf32>
    %291 = tpu.matmul %31, %290, %cst_157 {dimension_numbers = #tpu.dot_dimension_numbers<[1], [0], [0], [1], [0, 0, 1, 1], [], []>} : vector<8x4xbf16>, vector<4x16xbf16>, vector<8x16xf32> -> vector<8x16xf32>
    %292 = arith.addf %289, %291 : vector<8x16xf32>
    %293 = arith.truncf %292 : vector<8x16xf32> to vector<8x16xbf16>
    %c0_158 = arith.constant 0 : index
    %c0_159 = arith.constant 0 : index
    %c2_160 = arith.constant 2 : index
    %c0_161 = arith.constant 0 : index
    %294 = vector.load %arg7[%c0_158, %c0_159, %c2_160, %c0_161] : memref<1x8x8x16xbf16, #tpu.memory_space<vmem>>, vector<1x8x1x16xbf16>
    %295 = vector.shape_cast %294 : vector<1x8x1x16xbf16> to vector<8x16xbf16>
    %296 = vector.shape_cast %293 : vector<8x16xbf16> to vector<1x8x1x16xbf16>
    tpu.vector_store %arg7[%c0_158, %c0_159, %c2_160, %c0_161], %296 {strides = array<i32>} : memref<1x8x8x16xbf16, #tpu.memory_space<vmem>>, vector<1x8x1x16xbf16>,
    %cst_162 = arith.constant dense<0.000000e+00> : vector<8xf32>
    %297 = vector.multi_reduction <add>, %292, %cst_162 [1] : vector<8x16xf32> to vector<8xf32>
    %298 = vector.shape_cast %297 : vector<8xf32> to vector<8x1xf32>
    %299 = arith.addf %209, %298 : vector<8x1xf32>
    %300 = arith.mulf %292, %292 : vector<8x16xf32>
    %cst_163 = arith.constant dense<0.000000e+00> : vector<8xf32>
    %301 = vector.multi_reduction <add>, %300, %cst_163 [1] : vector<8x16xf32> to vector<8xf32>
    %302 = vector.shape_cast %301 : vector<8xf32> to vector<8x1xf32>
    %303 = arith.addf %213, %302 : vector<8x1xf32>
    %c8_i32_164 = arith.constant 8 : i32
    %304 = arith.muli %arg1, %c8_i32_164 : i32
    %c3_i32 = arith.constant 3 : i32
    %305 = arith.addi %304, %c3_i32 : i32
    %cst_165 = arith.constant 0.000000e+00 : f32
    %306 = vector.broadcast %cst_165 : f32 to vector<8x16xf32>
    %c0_i32_166 = arith.constant 0 : i32
    %307 = arith.addi %305, %c0_i32_166 : i32
    %308 = arith.index_cast %307 : i32 to index
    %c0_167 = arith.constant 0 : index
    %c0_168 = arith.constant 0 : index
    %309 = vector.load %arg3[%308, %c0_167, %c0_168] : memref<17x4x17xbf16, #tpu.memory_space<vmem>>, vector<1x4x17xbf16>
    %310 = vector.shape_cast %309 : vector<1x4x17xbf16> to vector<4x17xbf16>
    %311 = vector.extract_strided_slice %310 {offsets = [0, 0], sizes = [4, 16], strides = [1, 1]} : vector<4x17xbf16> to vector<4x16xbf16>
    %cst_169 = arith.constant dense<0.000000e+00> : vector<8x16xf32>
    %312 = tpu.matmul %1, %311, %cst_169 {dimension_numbers = #tpu.dot_dimension_numbers<[1], [0], [0], [1], [0, 0, 1, 1], [], []>} : vector<8x4xbf16>, vector<4x16xbf16>, vector<8x16xf32> -> vector<8x16xf32>
    %313 = arith.addf %306, %312 : vector<8x16xf32>
    %314 = vector.extract_strided_slice %310 {offsets = [0, 1], sizes = [4, 16], strides = [1, 1]} : vector<4x17xbf16> to vector<4x16xbf16>
    %cst_170 = arith.constant dense<0.000000e+00> : vector<8x16xf32>
    %315 = tpu.matmul %5, %314, %cst_170 {dimension_numbers = #tpu.dot_dimension_numbers<[1], [0], [0], [1], [0, 0, 1, 1], [], []>} : vector<8x4xbf16>, vector<4x16xbf16>, vector<8x16xf32> -> vector<8x16xf32>
    %316 = arith.addf %313, %315 : vector<8x16xf32>
    %317 = arith.index_cast %307 : i32 to index
    %c0_171 = arith.constant 0 : index
    %c0_172 = arith.constant 0 : index
    %318 = vector.load %arg4[%317, %c0_171, %c0_172] : memref<17x4x17xbf16, #tpu.memory_space<vmem>>, vector<1x4x17xbf16>
    %319 = vector.shape_cast %318 : vector<1x4x17xbf16> to vector<4x17xbf16>
    %320 = vector.extract_strided_slice %319 {offsets = [0, 0], sizes = [4, 16], strides = [1, 1]} : vector<4x17xbf16> to vector<4x16xbf16>
    %cst_173 = arith.constant dense<0.000000e+00> : vector<8x16xf32>
    %321 = tpu.matmul %3, %320, %cst_173 {dimension_numbers = #tpu.dot_dimension_numbers<[1], [0], [0], [1], [0, 0, 1, 1], [], []>} : vector<8x4xbf16>, vector<4x16xbf16>, vector<8x16xf32> -> vector<8x16xf32>
    %322 = arith.addf %316, %321 : vector<8x16xf32>
    %323 = vector.extract_strided_slice %319 {offsets = [0, 1], sizes = [4, 16], strides = [1, 1]} : vector<4x17xbf16> to vector<4x16xbf16>
    %cst_174 = arith.constant dense<0.000000e+00> : vector<8x16xf32>
    %324 = tpu.matmul %7, %323, %cst_174 {dimension_numbers = #tpu.dot_dimension_numbers<[1], [0], [0], [1], [0, 0, 1, 1], [], []>} : vector<8x4xbf16>, vector<4x16xbf16>, vector<8x16xf32> -> vector<8x16xf32>
    %325 = arith.addf %322, %324 : vector<8x16xf32>
    %c1_i32_175 = arith.constant 1 : i32
    %326 = arith.addi %305, %c1_i32_175 : i32
    %327 = arith.index_cast %326 : i32 to index
    %c0_176 = arith.constant 0 : index
    %c0_177 = arith.constant 0 : index
    %328 = vector.load %arg3[%327, %c0_176, %c0_177] : memref<17x4x17xbf16, #tpu.memory_space<vmem>>, vector<1x4x17xbf16>
    %329 = vector.shape_cast %328 : vector<1x4x17xbf16> to vector<4x17xbf16>
    %330 = vector.extract_strided_slice %329 {offsets = [0, 0], sizes = [4, 16], strides = [1, 1]} : vector<4x17xbf16> to vector<4x16xbf16>
    %cst_178 = arith.constant dense<0.000000e+00> : vector<8x16xf32>
    %331 = tpu.matmul %17, %330, %cst_178 {dimension_numbers = #tpu.dot_dimension_numbers<[1], [0], [0], [1], [0, 0, 1, 1], [], []>} : vector<8x4xbf16>, vector<4x16xbf16>, vector<8x16xf32> -> vector<8x16xf32>
    %332 = arith.addf %325, %331 : vector<8x16xf32>
    %333 = vector.extract_strided_slice %329 {offsets = [0, 1], sizes = [4, 16], strides = [1, 1]} : vector<4x17xbf16> to vector<4x16xbf16>
    %cst_179 = arith.constant dense<0.000000e+00> : vector<8x16xf32>
    %334 = tpu.matmul %21, %333, %cst_179 {dimension_numbers = #tpu.dot_dimension_numbers<[1], [0], [0], [1], [0, 0, 1, 1], [], []>} : vector<8x4xbf16>, vector<4x16xbf16>, vector<8x16xf32> -> vector<8x16xf32>
    %335 = arith.addf %332, %334 : vector<8x16xf32>
    %336 = arith.index_cast %326 : i32 to index
    %c0_180 = arith.constant 0 : index
    %c0_181 = arith.constant 0 : index
    %337 = vector.load %arg4[%336, %c0_180, %c0_181] : memref<17x4x17xbf16, #tpu.memory_space<vmem>>, vector<1x4x17xbf16>
    %338 = vector.shape_cast %337 : vector<1x4x17xbf16> to vector<4x17xbf16>
    %339 = vector.extract_strided_slice %338 {offsets = [0, 0], sizes = [4, 16], strides = [1, 1]} : vector<4x17xbf16> to vector<4x16xbf16>
    %cst_182 = arith.constant dense<0.000000e+00> : vector<8x16xf32>
    %340 = tpu.matmul %19, %339, %cst_182 {dimension_numbers = #tpu.dot_dimension_numbers<[1], [0], [0], [1], [0, 0, 1, 1], [], []>} : vector<8x4xbf16>, vector<4x16xbf16>, vector<8x16xf32> -> vector<8x16xf32>
    %341 = arith.addf %335, %340 : vector<8x16xf32>
    %342 = vector.extract_strided_slice %338 {offsets = [0, 1], sizes = [4, 16], strides = [1, 1]} : vector<4x17xbf16> to vector<4x16xbf16>
    %cst_183 = arith.constant dense<0.000000e+00> : vector<8x16xf32>
    %343 = tpu.matmul %23, %342, %cst_183 {dimension_numbers = #tpu.dot_dimension_numbers<[1], [0], [0], [1], [0, 0, 1, 1], [], []>} : vector<8x4xbf16>, vector<4x16xbf16>, vector<8x16xf32> -> vector<8x16xf32>
    %344 = arith.addf %341, %343 : vector<8x16xf32>
    %c0_i32_184 = arith.constant 0 : i32
    %345 = arith.addi %305, %c0_i32_184 : i32
    %346 = arith.index_cast %345 : i32 to index
    %c0_185 = arith.constant 0 : index
    %c0_186 = arith.constant 0 : index
    %347 = vector.load %arg5[%346, %c0_185, %c0_186] : memref<17x4x17xbf16, #tpu.memory_space<vmem>>, vector<1x4x17xbf16>
    %348 = vector.shape_cast %347 : vector<1x4x17xbf16> to vector<4x17xbf16>
    %349 = vector.extract_strided_slice %348 {offsets = [0, 0], sizes = [4, 16], strides = [1, 1]} : vector<4x17xbf16> to vector<4x16xbf16>
    %cst_187 = arith.constant dense<0.000000e+00> : vector<8x16xf32>
    %350 = tpu.matmul %9, %349, %cst_187 {dimension_numbers = #tpu.dot_dimension_numbers<[1], [0], [0], [1], [0, 0, 1, 1], [], []>} : vector<8x4xbf16>, vector<4x16xbf16>, vector<8x16xf32> -> vector<8x16xf32>
    %351 = arith.addf %344, %350 : vector<8x16xf32>
    %352 = vector.extract_strided_slice %348 {offsets = [0, 1], sizes = [4, 16], strides = [1, 1]} : vector<4x17xbf16> to vector<4x16xbf16>
    %cst_188 = arith.constant dense<0.000000e+00> : vector<8x16xf32>
    %353 = tpu.matmul %13, %352, %cst_188 {dimension_numbers = #tpu.dot_dimension_numbers<[1], [0], [0], [1], [0, 0, 1, 1], [], []>} : vector<8x4xbf16>, vector<4x16xbf16>, vector<8x16xf32> -> vector<8x16xf32>
    %354 = arith.addf %351, %353 : vector<8x16xf32>
    %355 = arith.index_cast %345 : i32 to index
    %c0_189 = arith.constant 0 : index
    %c0_190 = arith.constant 0 : index
    %356 = vector.load %arg6[%355, %c0_189, %c0_190] : memref<17x4x17xbf16, #tpu.memory_space<vmem>>, vector<1x4x17xbf16>
    %357 = vector.shape_cast %356 : vector<1x4x17xbf16> to vector<4x17xbf16>
    %358 = vector.extract_strided_slice %357 {offsets = [0, 0], sizes = [4, 16], strides = [1, 1]} : vector<4x17xbf16> to vector<4x16xbf16>
    %cst_191 = arith.constant dense<0.000000e+00> : vector<8x16xf32>
    %359 = tpu.matmul %11, %358, %cst_191 {dimension_numbers = #tpu.dot_dimension_numbers<[1], [0], [0], [1], [0, 0, 1, 1], [], []>} : vector<8x4xbf16>, vector<4x16xbf16>, vector<8x16xf32> -> vector<8x16xf32>
    %360 = arith.addf %354, %359 : vector<8x16xf32>
    %361 = vector.extract_strided_slice %357 {offsets = [0, 1], sizes = [4, 16], strides = [1, 1]} : vector<4x17xbf16> to vector<4x16xbf16>
    %cst_192 = arith.constant dense<0.000000e+00> : vector<8x16xf32>
    %362 = tpu.matmul %15, %361, %cst_192 {dimension_numbers = #tpu.dot_dimension_numbers<[1], [0], [0], [1], [0, 0, 1, 1], [], []>} : vector<8x4xbf16>, vector<4x16xbf16>, vector<8x16xf32> -> vector<8x16xf32>
    %363 = arith.addf %360, %362 : vector<8x16xf32>
    %c1_i32_193 = arith.constant 1 : i32
    %364 = arith.addi %305, %c1_i32_193 : i32
    %365 = arith.index_cast %364 : i32 to index
    %c0_194 = arith.constant 0 : index
    %c0_195 = arith.constant 0 : index
    %366 = vector.load %arg5[%365, %c0_194, %c0_195] : memref<17x4x17xbf16, #tpu.memory_space<vmem>>, vector<1x4x17xbf16>
    %367 = vector.shape_cast %366 : vector<1x4x17xbf16> to vector<4x17xbf16>
    %368 = vector.extract_strided_slice %367 {offsets = [0, 0], sizes = [4, 16], strides = [1, 1]} : vector<4x17xbf16> to vector<4x16xbf16>
    %cst_196 = arith.constant dense<0.000000e+00> : vector<8x16xf32>
    %369 = tpu.matmul %25, %368, %cst_196 {dimension_numbers = #tpu.dot_dimension_numbers<[1], [0], [0], [1], [0, 0, 1, 1], [], []>} : vector<8x4xbf16>, vector<4x16xbf16>, vector<8x16xf32> -> vector<8x16xf32>
    %370 = arith.addf %363, %369 : vector<8x16xf32>
    %371 = vector.extract_strided_slice %367 {offsets = [0, 1], sizes = [4, 16], strides = [1, 1]} : vector<4x17xbf16> to vector<4x16xbf16>
    %cst_197 = arith.constant dense<0.000000e+00> : vector<8x16xf32>
    %372 = tpu.matmul %29, %371, %cst_197 {dimension_numbers = #tpu.dot_dimension_numbers<[1], [0], [0], [1], [0, 0, 1, 1], [], []>} : vector<8x4xbf16>, vector<4x16xbf16>, vector<8x16xf32> -> vector<8x16xf32>
    %373 = arith.addf %370, %372 : vector<8x16xf32>
    %374 = arith.index_cast %364 : i32 to index
    %c0_198 = arith.constant 0 : index
    %c0_199 = arith.constant 0 : index
    %375 = vector.load %arg6[%374, %c0_198, %c0_199] : memref<17x4x17xbf16, #tpu.memory_space<vmem>>, vector<1x4x17xbf16>
    %376 = vector.shape_cast %375 : vector<1x4x17xbf16> to vector<4x17xbf16>
    %377 = vector.extract_strided_slice %376 {offsets = [0, 0], sizes = [4, 16], strides = [1, 1]} : vector<4x17xbf16> to vector<4x16xbf16>
    %cst_200 = arith.constant dense<0.000000e+00> : vector<8x16xf32>
    %378 = tpu.matmul %27, %377, %cst_200 {dimension_numbers = #tpu.dot_dimension_numbers<[1], [0], [0], [1], [0, 0, 1, 1], [], []>} : vector<8x4xbf16>, vector<4x16xbf16>, vector<8x16xf32> -> vector<8x16xf32>
    %379 = arith.addf %373, %378 : vector<8x16xf32>
    %380 = vector.extract_strided_slice %376 {offsets = [0, 1], sizes = [4, 16], strides = [1, 1]} : vector<4x17xbf16> to vector<4x16xbf16>
    %cst_201 = arith.constant dense<0.000000e+00> : vector<8x16xf32>
    %381 = tpu.matmul %31, %380, %cst_201 {dimension_numbers = #tpu.dot_dimension_numbers<[1], [0], [0], [1], [0, 0, 1, 1], [], []>} : vector<8x4xbf16>, vector<4x16xbf16>, vector<8x16xf32> -> vector<8x16xf32>
    %382 = arith.addf %379, %381 : vector<8x16xf32>
    %383 = arith.truncf %382 : vector<8x16xf32> to vector<8x16xbf16>
    %c0_202 = arith.constant 0 : index
    %c0_203 = arith.constant 0 : index
    %c3_204 = arith.constant 3 : index
    %c0_205 = arith.constant 0 : index
    %384 = vector.load %arg7[%c0_202, %c0_203, %c3_204, %c0_205] : memref<1x8x8x16xbf16, #tpu.memory_space<vmem>>, vector<1x8x1x16xbf16>
    %385 = vector.shape_cast %384 : vector<1x8x1x16xbf16> to vector<8x16xbf16>
    %386 = vector.shape_cast %383 : vector<8x16xbf16> to vector<1x8x1x16xbf16>
    tpu.vector_store %arg7[%c0_202, %c0_203, %c3_204, %c0_205], %386 {strides = array<i32>} : memref<1x8x8x16xbf16, #tpu.memory_space<vmem>>, vector<1x8x1x16xbf16>,
    %cst_206 = arith.constant dense<0.000000e+00> : vector<8xf32>
    %387 = vector.multi_reduction <add>, %382, %cst_206 [1] : vector<8x16xf32> to vector<8xf32>
    %388 = vector.shape_cast %387 : vector<8xf32> to vector<8x1xf32>
    %389 = arith.addf %299, %388 : vector<8x1xf32>
    %390 = arith.mulf %382, %382 : vector<8x16xf32>
    %cst_207 = arith.constant dense<0.000000e+00> : vector<8xf32>
    %391 = vector.multi_reduction <add>, %390, %cst_207 [1] : vector<8x16xf32> to vector<8xf32>
    %392 = vector.shape_cast %391 : vector<8xf32> to vector<8x1xf32>
    %393 = arith.addf %303, %392 : vector<8x1xf32>
    %c8_i32_208 = arith.constant 8 : i32
    %394 = arith.muli %arg1, %c8_i32_208 : i32
    %c4_i32 = arith.constant 4 : i32
    %395 = arith.addi %394, %c4_i32 : i32
    %cst_209 = arith.constant 0.000000e+00 : f32
    %396 = vector.broadcast %cst_209 : f32 to vector<8x16xf32>
    %c0_i32_210 = arith.constant 0 : i32
    %397 = arith.addi %395, %c0_i32_210 : i32
    %398 = arith.index_cast %397 : i32 to index
    %c0_211 = arith.constant 0 : index
    %c0_212 = arith.constant 0 : index
    %399 = vector.load %arg3[%398, %c0_211, %c0_212] : memref<17x4x17xbf16, #tpu.memory_space<vmem>>, vector<1x4x17xbf16>
    %400 = vector.shape_cast %399 : vector<1x4x17xbf16> to vector<4x17xbf16>
    %401 = vector.extract_strided_slice %400 {offsets = [0, 0], sizes = [4, 16], strides = [1, 1]} : vector<4x17xbf16> to vector<4x16xbf16>
    %cst_213 = arith.constant dense<0.000000e+00> : vector<8x16xf32>
    %402 = tpu.matmul %1, %401, %cst_213 {dimension_numbers = #tpu.dot_dimension_numbers<[1], [0], [0], [1], [0, 0, 1, 1], [], []>} : vector<8x4xbf16>, vector<4x16xbf16>, vector<8x16xf32> -> vector<8x16xf32>
    %403 = arith.addf %396, %402 : vector<8x16xf32>
    %404 = vector.extract_strided_slice %400 {offsets = [0, 1], sizes = [4, 16], strides = [1, 1]} : vector<4x17xbf16> to vector<4x16xbf16>
    %cst_214 = arith.constant dense<0.000000e+00> : vector<8x16xf32>
    %405 = tpu.matmul %5, %404, %cst_214 {dimension_numbers = #tpu.dot_dimension_numbers<[1], [0], [0], [1], [0, 0, 1, 1], [], []>} : vector<8x4xbf16>, vector<4x16xbf16>, vector<8x16xf32> -> vector<8x16xf32>
    %406 = arith.addf %403, %405 : vector<8x16xf32>
    %407 = arith.index_cast %397 : i32 to index
    %c0_215 = arith.constant 0 : index
    %c0_216 = arith.constant 0 : index
    %408 = vector.load %arg4[%407, %c0_215, %c0_216] : memref<17x4x17xbf16, #tpu.memory_space<vmem>>, vector<1x4x17xbf16>
    %409 = vector.shape_cast %408 : vector<1x4x17xbf16> to vector<4x17xbf16>
    %410 = vector.extract_strided_slice %409 {offsets = [0, 0], sizes = [4, 16], strides = [1, 1]} : vector<4x17xbf16> to vector<4x16xbf16>
    %cst_217 = arith.constant dense<0.000000e+00> : vector<8x16xf32>
    %411 = tpu.matmul %3, %410, %cst_217 {dimension_numbers = #tpu.dot_dimension_numbers<[1], [0], [0], [1], [0, 0, 1, 1], [], []>} : vector<8x4xbf16>, vector<4x16xbf16>, vector<8x16xf32> -> vector<8x16xf32>
    %412 = arith.addf %406, %411 : vector<8x16xf32>
    %413 = vector.extract_strided_slice %409 {offsets = [0, 1], sizes = [4, 16], strides = [1, 1]} : vector<4x17xbf16> to vector<4x16xbf16>
    %cst_218 = arith.constant dense<0.000000e+00> : vector<8x16xf32>
    %414 = tpu.matmul %7, %413, %cst_218 {dimension_numbers = #tpu.dot_dimension_numbers<[1], [0], [0], [1], [0, 0, 1, 1], [], []>} : vector<8x4xbf16>, vector<4x16xbf16>, vector<8x16xf32> -> vector<8x16xf32>
    %415 = arith.addf %412, %414 : vector<8x16xf32>
    %c1_i32_219 = arith.constant 1 : i32
    %416 = arith.addi %395, %c1_i32_219 : i32
    %417 = arith.index_cast %416 : i32 to index
    %c0_220 = arith.constant 0 : index
    %c0_221 = arith.constant 0 : index
    %418 = vector.load %arg3[%417, %c0_220, %c0_221] : memref<17x4x17xbf16, #tpu.memory_space<vmem>>, vector<1x4x17xbf16>
    %419 = vector.shape_cast %418 : vector<1x4x17xbf16> to vector<4x17xbf16>
    %420 = vector.extract_strided_slice %419 {offsets = [0, 0], sizes = [4, 16], strides = [1, 1]} : vector<4x17xbf16> to vector<4x16xbf16>
    %cst_222 = arith.constant dense<0.000000e+00> : vector<8x16xf32>
    %421 = tpu.matmul %17, %420, %cst_222 {dimension_numbers = #tpu.dot_dimension_numbers<[1], [0], [0], [1], [0, 0, 1, 1], [], []>} : vector<8x4xbf16>, vector<4x16xbf16>, vector<8x16xf32> -> vector<8x16xf32>
    %422 = arith.addf %415, %421 : vector<8x16xf32>
    %423 = vector.extract_strided_slice %419 {offsets = [0, 1], sizes = [4, 16], strides = [1, 1]} : vector<4x17xbf16> to vector<4x16xbf16>
    %cst_223 = arith.constant dense<0.000000e+00> : vector<8x16xf32>
    %424 = tpu.matmul %21, %423, %cst_223 {dimension_numbers = #tpu.dot_dimension_numbers<[1], [0], [0], [1], [0, 0, 1, 1], [], []>} : vector<8x4xbf16>, vector<4x16xbf16>, vector<8x16xf32> -> vector<8x16xf32>
    %425 = arith.addf %422, %424 : vector<8x16xf32>
    %426 = arith.index_cast %416 : i32 to index
    %c0_224 = arith.constant 0 : index
    %c0_225 = arith.constant 0 : index
    %427 = vector.load %arg4[%426, %c0_224, %c0_225] : memref<17x4x17xbf16, #tpu.memory_space<vmem>>, vector<1x4x17xbf16>
    %428 = vector.shape_cast %427 : vector<1x4x17xbf16> to vector<4x17xbf16>
    %429 = vector.extract_strided_slice %428 {offsets = [0, 0], sizes = [4, 16], strides = [1, 1]} : vector<4x17xbf16> to vector<4x16xbf16>
    %cst_226 = arith.constant dense<0.000000e+00> : vector<8x16xf32>
    %430 = tpu.matmul %19, %429, %cst_226 {dimension_numbers = #tpu.dot_dimension_numbers<[1], [0], [0], [1], [0, 0, 1, 1], [], []>} : vector<8x4xbf16>, vector<4x16xbf16>, vector<8x16xf32> -> vector<8x16xf32>
    %431 = arith.addf %425, %430 : vector<8x16xf32>
    %432 = vector.extract_strided_slice %428 {offsets = [0, 1], sizes = [4, 16], strides = [1, 1]} : vector<4x17xbf16> to vector<4x16xbf16>
    %cst_227 = arith.constant dense<0.000000e+00> : vector<8x16xf32>
    %433 = tpu.matmul %23, %432, %cst_227 {dimension_numbers = #tpu.dot_dimension_numbers<[1], [0], [0], [1], [0, 0, 1, 1], [], []>} : vector<8x4xbf16>, vector<4x16xbf16>, vector<8x16xf32> -> vector<8x16xf32>
    %434 = arith.addf %431, %433 : vector<8x16xf32>
    %c0_i32_228 = arith.constant 0 : i32
    %435 = arith.addi %395, %c0_i32_228 : i32
    %436 = arith.index_cast %435 : i32 to index
    %c0_229 = arith.constant 0 : index
    %c0_230 = arith.constant 0 : index
    %437 = vector.load %arg5[%436, %c0_229, %c0_230] : memref<17x4x17xbf16, #tpu.memory_space<vmem>>, vector<1x4x17xbf16>
    %438 = vector.shape_cast %437 : vector<1x4x17xbf16> to vector<4x17xbf16>
    %439 = vector.extract_strided_slice %438 {offsets = [0, 0], sizes = [4, 16], strides = [1, 1]} : vector<4x17xbf16> to vector<4x16xbf16>
    %cst_231 = arith.constant dense<0.000000e+00> : vector<8x16xf32>
    %440 = tpu.matmul %9, %439, %cst_231 {dimension_numbers = #tpu.dot_dimension_numbers<[1], [0], [0], [1], [0, 0, 1, 1], [], []>} : vector<8x4xbf16>, vector<4x16xbf16>, vector<8x16xf32> -> vector<8x16xf32>
    %441 = arith.addf %434, %440 : vector<8x16xf32>
    %442 = vector.extract_strided_slice %438 {offsets = [0, 1], sizes = [4, 16], strides = [1, 1]} : vector<4x17xbf16> to vector<4x16xbf16>
    %cst_232 = arith.constant dense<0.000000e+00> : vector<8x16xf32>
    %443 = tpu.matmul %13, %442, %cst_232 {dimension_numbers = #tpu.dot_dimension_numbers<[1], [0], [0], [1], [0, 0, 1, 1], [], []>} : vector<8x4xbf16>, vector<4x16xbf16>, vector<8x16xf32> -> vector<8x16xf32>
    %444 = arith.addf %441, %443 : vector<8x16xf32>
    %445 = arith.index_cast %435 : i32 to index
    %c0_233 = arith.constant 0 : index
    %c0_234 = arith.constant 0 : index
    %446 = vector.load %arg6[%445, %c0_233, %c0_234] : memref<17x4x17xbf16, #tpu.memory_space<vmem>>, vector<1x4x17xbf16>
    %447 = vector.shape_cast %446 : vector<1x4x17xbf16> to vector<4x17xbf16>
    %448 = vector.extract_strided_slice %447 {offsets = [0, 0], sizes = [4, 16], strides = [1, 1]} : vector<4x17xbf16> to vector<4x16xbf16>
    %cst_235 = arith.constant dense<0.000000e+00> : vector<8x16xf32>
    %449 = tpu.matmul %11, %448, %cst_235 {dimension_numbers = #tpu.dot_dimension_numbers<[1], [0], [0], [1], [0, 0, 1, 1], [], []>} : vector<8x4xbf16>, vector<4x16xbf16>, vector<8x16xf32> -> vector<8x16xf32>
    %450 = arith.addf %444, %449 : vector<8x16xf32>
    %451 = vector.extract_strided_slice %447 {offsets = [0, 1], sizes = [4, 16], strides = [1, 1]} : vector<4x17xbf16> to vector<4x16xbf16>
    %cst_236 = arith.constant dense<0.000000e+00> : vector<8x16xf32>
    %452 = tpu.matmul %15, %451, %cst_236 {dimension_numbers = #tpu.dot_dimension_numbers<[1], [0], [0], [1], [0, 0, 1, 1], [], []>} : vector<8x4xbf16>, vector<4x16xbf16>, vector<8x16xf32> -> vector<8x16xf32>
    %453 = arith.addf %450, %452 : vector<8x16xf32>
    %c1_i32_237 = arith.constant 1 : i32
    %454 = arith.addi %395, %c1_i32_237 : i32
    %455 = arith.index_cast %454 : i32 to index
    %c0_238 = arith.constant 0 : index
    %c0_239 = arith.constant 0 : index
    %456 = vector.load %arg5[%455, %c0_238, %c0_239] : memref<17x4x17xbf16, #tpu.memory_space<vmem>>, vector<1x4x17xbf16>
    %457 = vector.shape_cast %456 : vector<1x4x17xbf16> to vector<4x17xbf16>
    %458 = vector.extract_strided_slice %457 {offsets = [0, 0], sizes = [4, 16], strides = [1, 1]} : vector<4x17xbf16> to vector<4x16xbf16>
    %cst_240 = arith.constant dense<0.000000e+00> : vector<8x16xf32>
    %459 = tpu.matmul %25, %458, %cst_240 {dimension_numbers = #tpu.dot_dimension_numbers<[1], [0], [0], [1], [0, 0, 1, 1], [], []>} : vector<8x4xbf16>, vector<4x16xbf16>, vector<8x16xf32> -> vector<8x16xf32>
    %460 = arith.addf %453, %459 : vector<8x16xf32>
    %461 = vector.extract_strided_slice %457 {offsets = [0, 1], sizes = [4, 16], strides = [1, 1]} : vector<4x17xbf16> to vector<4x16xbf16>
    %cst_241 = arith.constant dense<0.000000e+00> : vector<8x16xf32>
    %462 = tpu.matmul %29, %461, %cst_241 {dimension_numbers = #tpu.dot_dimension_numbers<[1], [0], [0], [1], [0, 0, 1, 1], [], []>} : vector<8x4xbf16>, vector<4x16xbf16>, vector<8x16xf32> -> vector<8x16xf32>
    %463 = arith.addf %460, %462 : vector<8x16xf32>
    %464 = arith.index_cast %454 : i32 to index
    %c0_242 = arith.constant 0 : index
    %c0_243 = arith.constant 0 : index
    %465 = vector.load %arg6[%464, %c0_242, %c0_243] : memref<17x4x17xbf16, #tpu.memory_space<vmem>>, vector<1x4x17xbf16>
    %466 = vector.shape_cast %465 : vector<1x4x17xbf16> to vector<4x17xbf16>
    %467 = vector.extract_strided_slice %466 {offsets = [0, 0], sizes = [4, 16], strides = [1, 1]} : vector<4x17xbf16> to vector<4x16xbf16>
    %cst_244 = arith.constant dense<0.000000e+00> : vector<8x16xf32>
    %468 = tpu.matmul %27, %467, %cst_244 {dimension_numbers = #tpu.dot_dimension_numbers<[1], [0], [0], [1], [0, 0, 1, 1], [], []>} : vector<8x4xbf16>, vector<4x16xbf16>, vector<8x16xf32> -> vector<8x16xf32>
    %469 = arith.addf %463, %468 : vector<8x16xf32>
    %470 = vector.extract_strided_slice %466 {offsets = [0, 1], sizes = [4, 16], strides = [1, 1]} : vector<4x17xbf16> to vector<4x16xbf16>
    %cst_245 = arith.constant dense<0.000000e+00> : vector<8x16xf32>
    %471 = tpu.matmul %31, %470, %cst_245 {dimension_numbers = #tpu.dot_dimension_numbers<[1], [0], [0], [1], [0, 0, 1, 1], [], []>} : vector<8x4xbf16>, vector<4x16xbf16>, vector<8x16xf32> -> vector<8x16xf32>
    %472 = arith.addf %469, %471 : vector<8x16xf32>
    %473 = arith.truncf %472 : vector<8x16xf32> to vector<8x16xbf16>
    %c0_246 = arith.constant 0 : index
    %c0_247 = arith.constant 0 : index
    %c4_248 = arith.constant 4 : index
    %c0_249 = arith.constant 0 : index
    %474 = vector.load %arg7[%c0_246, %c0_247, %c4_248, %c0_249] : memref<1x8x8x16xbf16, #tpu.memory_space<vmem>>, vector<1x8x1x16xbf16>
    %475 = vector.shape_cast %474 : vector<1x8x1x16xbf16> to vector<8x16xbf16>
    %476 = vector.shape_cast %473 : vector<8x16xbf16> to vector<1x8x1x16xbf16>
    tpu.vector_store %arg7[%c0_246, %c0_247, %c4_248, %c0_249], %476 {strides = array<i32>} : memref<1x8x8x16xbf16, #tpu.memory_space<vmem>>, vector<1x8x1x16xbf16>,
    %cst_250 = arith.constant dense<0.000000e+00> : vector<8xf32>
    %477 = vector.multi_reduction <add>, %472, %cst_250 [1] : vector<8x16xf32> to vector<8xf32>
    %478 = vector.shape_cast %477 : vector<8xf32> to vector<8x1xf32>
    %479 = arith.addf %389, %478 : vector<8x1xf32>
    %480 = arith.mulf %472, %472 : vector<8x16xf32>
    %cst_251 = arith.constant dense<0.000000e+00> : vector<8xf32>
    %481 = vector.multi_reduction <add>, %480, %cst_251 [1] : vector<8x16xf32> to vector<8xf32>
    %482 = vector.shape_cast %481 : vector<8xf32> to vector<8x1xf32>
    %483 = arith.addf %393, %482 : vector<8x1xf32>
    %c8_i32_252 = arith.constant 8 : i32
    %484 = arith.muli %arg1, %c8_i32_252 : i32
    %c5_i32 = arith.constant 5 : i32
    %485 = arith.addi %484, %c5_i32 : i32
    %cst_253 = arith.constant 0.000000e+00 : f32
    %486 = vector.broadcast %cst_253 : f32 to vector<8x16xf32>
    %c0_i32_254 = arith.constant 0 : i32
    %487 = arith.addi %485, %c0_i32_254 : i32
    %488 = arith.index_cast %487 : i32 to index
    %c0_255 = arith.constant 0 : index
    %c0_256 = arith.constant 0 : index
    %489 = vector.load %arg3[%488, %c0_255, %c0_256] : memref<17x4x17xbf16, #tpu.memory_space<vmem>>, vector<1x4x17xbf16>
    %490 = vector.shape_cast %489 : vector<1x4x17xbf16> to vector<4x17xbf16>
    %491 = vector.extract_strided_slice %490 {offsets = [0, 0], sizes = [4, 16], strides = [1, 1]} : vector<4x17xbf16> to vector<4x16xbf16>
    %cst_257 = arith.constant dense<0.000000e+00> : vector<8x16xf32>
    %492 = tpu.matmul %1, %491, %cst_257 {dimension_numbers = #tpu.dot_dimension_numbers<[1], [0], [0], [1], [0, 0, 1, 1], [], []>} : vector<8x4xbf16>, vector<4x16xbf16>, vector<8x16xf32> -> vector<8x16xf32>
    %493 = arith.addf %486, %492 : vector<8x16xf32>
    %494 = vector.extract_strided_slice %490 {offsets = [0, 1], sizes = [4, 16], strides = [1, 1]} : vector<4x17xbf16> to vector<4x16xbf16>
    %cst_258 = arith.constant dense<0.000000e+00> : vector<8x16xf32>
    %495 = tpu.matmul %5, %494, %cst_258 {dimension_numbers = #tpu.dot_dimension_numbers<[1], [0], [0], [1], [0, 0, 1, 1], [], []>} : vector<8x4xbf16>, vector<4x16xbf16>, vector<8x16xf32> -> vector<8x16xf32>
    %496 = arith.addf %493, %495 : vector<8x16xf32>
    %497 = arith.index_cast %487 : i32 to index
    %c0_259 = arith.constant 0 : index
    %c0_260 = arith.constant 0 : index
    %498 = vector.load %arg4[%497, %c0_259, %c0_260] : memref<17x4x17xbf16, #tpu.memory_space<vmem>>, vector<1x4x17xbf16>
    %499 = vector.shape_cast %498 : vector<1x4x17xbf16> to vector<4x17xbf16>
    %500 = vector.extract_strided_slice %499 {offsets = [0, 0], sizes = [4, 16], strides = [1, 1]} : vector<4x17xbf16> to vector<4x16xbf16>
    %cst_261 = arith.constant dense<0.000000e+00> : vector<8x16xf32>
    %501 = tpu.matmul %3, %500, %cst_261 {dimension_numbers = #tpu.dot_dimension_numbers<[1], [0], [0], [1], [0, 0, 1, 1], [], []>} : vector<8x4xbf16>, vector<4x16xbf16>, vector<8x16xf32> -> vector<8x16xf32>
    %502 = arith.addf %496, %501 : vector<8x16xf32>
    %503 = vector.extract_strided_slice %499 {offsets = [0, 1], sizes = [4, 16], strides = [1, 1]} : vector<4x17xbf16> to vector<4x16xbf16>
    %cst_262 = arith.constant dense<0.000000e+00> : vector<8x16xf32>
    %504 = tpu.matmul %7, %503, %cst_262 {dimension_numbers = #tpu.dot_dimension_numbers<[1], [0], [0], [1], [0, 0, 1, 1], [], []>} : vector<8x4xbf16>, vector<4x16xbf16>, vector<8x16xf32> -> vector<8x16xf32>
    %505 = arith.addf %502, %504 : vector<8x16xf32>
    %c1_i32_263 = arith.constant 1 : i32
    %506 = arith.addi %485, %c1_i32_263 : i32
    %507 = arith.index_cast %506 : i32 to index
    %c0_264 = arith.constant 0 : index
    %c0_265 = arith.constant 0 : index
    %508 = vector.load %arg3[%507, %c0_264, %c0_265] : memref<17x4x17xbf16, #tpu.memory_space<vmem>>, vector<1x4x17xbf16>
    %509 = vector.shape_cast %508 : vector<1x4x17xbf16> to vector<4x17xbf16>
    %510 = vector.extract_strided_slice %509 {offsets = [0, 0], sizes = [4, 16], strides = [1, 1]} : vector<4x17xbf16> to vector<4x16xbf16>
    %cst_266 = arith.constant dense<0.000000e+00> : vector<8x16xf32>
    %511 = tpu.matmul %17, %510, %cst_266 {dimension_numbers = #tpu.dot_dimension_numbers<[1], [0], [0], [1], [0, 0, 1, 1], [], []>} : vector<8x4xbf16>, vector<4x16xbf16>, vector<8x16xf32> -> vector<8x16xf32>
    %512 = arith.addf %505, %511 : vector<8x16xf32>
    %513 = vector.extract_strided_slice %509 {offsets = [0, 1], sizes = [4, 16], strides = [1, 1]} : vector<4x17xbf16> to vector<4x16xbf16>
    %cst_267 = arith.constant dense<0.000000e+00> : vector<8x16xf32>
    %514 = tpu.matmul %21, %513, %cst_267 {dimension_numbers = #tpu.dot_dimension_numbers<[1], [0], [0], [1], [0, 0, 1, 1], [], []>} : vector<8x4xbf16>, vector<4x16xbf16>, vector<8x16xf32> -> vector<8x16xf32>
    %515 = arith.addf %512, %514 : vector<8x16xf32>
    %516 = arith.index_cast %506 : i32 to index
    %c0_268 = arith.constant 0 : index
    %c0_269 = arith.constant 0 : index
    %517 = vector.load %arg4[%516, %c0_268, %c0_269] : memref<17x4x17xbf16, #tpu.memory_space<vmem>>, vector<1x4x17xbf16>
    %518 = vector.shape_cast %517 : vector<1x4x17xbf16> to vector<4x17xbf16>
    %519 = vector.extract_strided_slice %518 {offsets = [0, 0], sizes = [4, 16], strides = [1, 1]} : vector<4x17xbf16> to vector<4x16xbf16>
    %cst_270 = arith.constant dense<0.000000e+00> : vector<8x16xf32>
    %520 = tpu.matmul %19, %519, %cst_270 {dimension_numbers = #tpu.dot_dimension_numbers<[1], [0], [0], [1], [0, 0, 1, 1], [], []>} : vector<8x4xbf16>, vector<4x16xbf16>, vector<8x16xf32> -> vector<8x16xf32>
    %521 = arith.addf %515, %520 : vector<8x16xf32>
    %522 = vector.extract_strided_slice %518 {offsets = [0, 1], sizes = [4, 16], strides = [1, 1]} : vector<4x17xbf16> to vector<4x16xbf16>
    %cst_271 = arith.constant dense<0.000000e+00> : vector<8x16xf32>
    %523 = tpu.matmul %23, %522, %cst_271 {dimension_numbers = #tpu.dot_dimension_numbers<[1], [0], [0], [1], [0, 0, 1, 1], [], []>} : vector<8x4xbf16>, vector<4x16xbf16>, vector<8x16xf32> -> vector<8x16xf32>
    %524 = arith.addf %521, %523 : vector<8x16xf32>
    %c0_i32_272 = arith.constant 0 : i32
    %525 = arith.addi %485, %c0_i32_272 : i32
    %526 = arith.index_cast %525 : i32 to index
    %c0_273 = arith.constant 0 : index
    %c0_274 = arith.constant 0 : index
    %527 = vector.load %arg5[%526, %c0_273, %c0_274] : memref<17x4x17xbf16, #tpu.memory_space<vmem>>, vector<1x4x17xbf16>
    %528 = vector.shape_cast %527 : vector<1x4x17xbf16> to vector<4x17xbf16>
    %529 = vector.extract_strided_slice %528 {offsets = [0, 0], sizes = [4, 16], strides = [1, 1]} : vector<4x17xbf16> to vector<4x16xbf16>
    %cst_275 = arith.constant dense<0.000000e+00> : vector<8x16xf32>
    %530 = tpu.matmul %9, %529, %cst_275 {dimension_numbers = #tpu.dot_dimension_numbers<[1], [0], [0], [1], [0, 0, 1, 1], [], []>} : vector<8x4xbf16>, vector<4x16xbf16>, vector<8x16xf32> -> vector<8x16xf32>
    %531 = arith.addf %524, %530 : vector<8x16xf32>
    %532 = vector.extract_strided_slice %528 {offsets = [0, 1], sizes = [4, 16], strides = [1, 1]} : vector<4x17xbf16> to vector<4x16xbf16>
    %cst_276 = arith.constant dense<0.000000e+00> : vector<8x16xf32>
    %533 = tpu.matmul %13, %532, %cst_276 {dimension_numbers = #tpu.dot_dimension_numbers<[1], [0], [0], [1], [0, 0, 1, 1], [], []>} : vector<8x4xbf16>, vector<4x16xbf16>, vector<8x16xf32> -> vector<8x16xf32>
    %534 = arith.addf %531, %533 : vector<8x16xf32>
    %535 = arith.index_cast %525 : i32 to index
    %c0_277 = arith.constant 0 : index
    %c0_278 = arith.constant 0 : index
    %536 = vector.load %arg6[%535, %c0_277, %c0_278] : memref<17x4x17xbf16, #tpu.memory_space<vmem>>, vector<1x4x17xbf16>
    %537 = vector.shape_cast %536 : vector<1x4x17xbf16> to vector<4x17xbf16>
    %538 = vector.extract_strided_slice %537 {offsets = [0, 0], sizes = [4, 16], strides = [1, 1]} : vector<4x17xbf16> to vector<4x16xbf16>
    %cst_279 = arith.constant dense<0.000000e+00> : vector<8x16xf32>
    %539 = tpu.matmul %11, %538, %cst_279 {dimension_numbers = #tpu.dot_dimension_numbers<[1], [0], [0], [1], [0, 0, 1, 1], [], []>} : vector<8x4xbf16>, vector<4x16xbf16>, vector<8x16xf32> -> vector<8x16xf32>
    %540 = arith.addf %534, %539 : vector<8x16xf32>
    %541 = vector.extract_strided_slice %537 {offsets = [0, 1], sizes = [4, 16], strides = [1, 1]} : vector<4x17xbf16> to vector<4x16xbf16>
    %cst_280 = arith.constant dense<0.000000e+00> : vector<8x16xf32>
    %542 = tpu.matmul %15, %541, %cst_280 {dimension_numbers = #tpu.dot_dimension_numbers<[1], [0], [0], [1], [0, 0, 1, 1], [], []>} : vector<8x4xbf16>, vector<4x16xbf16>, vector<8x16xf32> -> vector<8x16xf32>
    %543 = arith.addf %540, %542 : vector<8x16xf32>
    %c1_i32_281 = arith.constant 1 : i32
    %544 = arith.addi %485, %c1_i32_281 : i32
    %545 = arith.index_cast %544 : i32 to index
    %c0_282 = arith.constant 0 : index
    %c0_283 = arith.constant 0 : index
    %546 = vector.load %arg5[%545, %c0_282, %c0_283] : memref<17x4x17xbf16, #tpu.memory_space<vmem>>, vector<1x4x17xbf16>
    %547 = vector.shape_cast %546 : vector<1x4x17xbf16> to vector<4x17xbf16>
    %548 = vector.extract_strided_slice %547 {offsets = [0, 0], sizes = [4, 16], strides = [1, 1]} : vector<4x17xbf16> to vector<4x16xbf16>
    %cst_284 = arith.constant dense<0.000000e+00> : vector<8x16xf32>
    %549 = tpu.matmul %25, %548, %cst_284 {dimension_numbers = #tpu.dot_dimension_numbers<[1], [0], [0], [1], [0, 0, 1, 1], [], []>} : vector<8x4xbf16>, vector<4x16xbf16>, vector<8x16xf32> -> vector<8x16xf32>
    %550 = arith.addf %543, %549 : vector<8x16xf32>
    %551 = vector.extract_strided_slice %547 {offsets = [0, 1], sizes = [4, 16], strides = [1, 1]} : vector<4x17xbf16> to vector<4x16xbf16>
    %cst_285 = arith.constant dense<0.000000e+00> : vector<8x16xf32>
    %552 = tpu.matmul %29, %551, %cst_285 {dimension_numbers = #tpu.dot_dimension_numbers<[1], [0], [0], [1], [0, 0, 1, 1], [], []>} : vector<8x4xbf16>, vector<4x16xbf16>, vector<8x16xf32> -> vector<8x16xf32>
    %553 = arith.addf %550, %552 : vector<8x16xf32>
    %554 = arith.index_cast %544 : i32 to index
    %c0_286 = arith.constant 0 : index
    %c0_287 = arith.constant 0 : index
    %555 = vector.load %arg6[%554, %c0_286, %c0_287] : memref<17x4x17xbf16, #tpu.memory_space<vmem>>, vector<1x4x17xbf16>
    %556 = vector.shape_cast %555 : vector<1x4x17xbf16> to vector<4x17xbf16>
    %557 = vector.extract_strided_slice %556 {offsets = [0, 0], sizes = [4, 16], strides = [1, 1]} : vector<4x17xbf16> to vector<4x16xbf16>
    %cst_288 = arith.constant dense<0.000000e+00> : vector<8x16xf32>
    %558 = tpu.matmul %27, %557, %cst_288 {dimension_numbers = #tpu.dot_dimension_numbers<[1], [0], [0], [1], [0, 0, 1, 1], [], []>} : vector<8x4xbf16>, vector<4x16xbf16>, vector<8x16xf32> -> vector<8x16xf32>
    %559 = arith.addf %553, %558 : vector<8x16xf32>
    %560 = vector.extract_strided_slice %556 {offsets = [0, 1], sizes = [4, 16], strides = [1, 1]} : vector<4x17xbf16> to vector<4x16xbf16>
    %cst_289 = arith.constant dense<0.000000e+00> : vector<8x16xf32>
    %561 = tpu.matmul %31, %560, %cst_289 {dimension_numbers = #tpu.dot_dimension_numbers<[1], [0], [0], [1], [0, 0, 1, 1], [], []>} : vector<8x4xbf16>, vector<4x16xbf16>, vector<8x16xf32> -> vector<8x16xf32>
    %562 = arith.addf %559, %561 : vector<8x16xf32>
    %563 = arith.truncf %562 : vector<8x16xf32> to vector<8x16xbf16>
    %c0_290 = arith.constant 0 : index
    %c0_291 = arith.constant 0 : index
    %c5_292 = arith.constant 5 : index
    %c0_293 = arith.constant 0 : index
    %564 = vector.load %arg7[%c0_290, %c0_291, %c5_292, %c0_293] : memref<1x8x8x16xbf16, #tpu.memory_space<vmem>>, vector<1x8x1x16xbf16>
    %565 = vector.shape_cast %564 : vector<1x8x1x16xbf16> to vector<8x16xbf16>
    %566 = vector.shape_cast %563 : vector<8x16xbf16> to vector<1x8x1x16xbf16>
    tpu.vector_store %arg7[%c0_290, %c0_291, %c5_292, %c0_293], %566 {strides = array<i32>} : memref<1x8x8x16xbf16, #tpu.memory_space<vmem>>, vector<1x8x1x16xbf16>,
    %cst_294 = arith.constant dense<0.000000e+00> : vector<8xf32>
    %567 = vector.multi_reduction <add>, %562, %cst_294 [1] : vector<8x16xf32> to vector<8xf32>
    %568 = vector.shape_cast %567 : vector<8xf32> to vector<8x1xf32>
    %569 = arith.addf %479, %568 : vector<8x1xf32>
    %570 = arith.mulf %562, %562 : vector<8x16xf32>
    %cst_295 = arith.constant dense<0.000000e+00> : vector<8xf32>
    %571 = vector.multi_reduction <add>, %570, %cst_295 [1] : vector<8x16xf32> to vector<8xf32>
    %572 = vector.shape_cast %571 : vector<8xf32> to vector<8x1xf32>
    %573 = arith.addf %483, %572 : vector<8x1xf32>
    %c8_i32_296 = arith.constant 8 : i32
    %574 = arith.muli %arg1, %c8_i32_296 : i32
    %c6_i32 = arith.constant 6 : i32
    %575 = arith.addi %574, %c6_i32 : i32
    %cst_297 = arith.constant 0.000000e+00 : f32
    %576 = vector.broadcast %cst_297 : f32 to vector<8x16xf32>
    %c0_i32_298 = arith.constant 0 : i32
    %577 = arith.addi %575, %c0_i32_298 : i32
    %578 = arith.index_cast %577 : i32 to index
    %c0_299 = arith.constant 0 : index
    %c0_300 = arith.constant 0 : index
    %579 = vector.load %arg3[%578, %c0_299, %c0_300] : memref<17x4x17xbf16, #tpu.memory_space<vmem>>, vector<1x4x17xbf16>
    %580 = vector.shape_cast %579 : vector<1x4x17xbf16> to vector<4x17xbf16>
    %581 = vector.extract_strided_slice %580 {offsets = [0, 0], sizes = [4, 16], strides = [1, 1]} : vector<4x17xbf16> to vector<4x16xbf16>
    %cst_301 = arith.constant dense<0.000000e+00> : vector<8x16xf32>
    %582 = tpu.matmul %1, %581, %cst_301 {dimension_numbers = #tpu.dot_dimension_numbers<[1], [0], [0], [1], [0, 0, 1, 1], [], []>} : vector<8x4xbf16>, vector<4x16xbf16>, vector<8x16xf32> -> vector<8x16xf32>
    %583 = arith.addf %576, %582 : vector<8x16xf32>
    %584 = vector.extract_strided_slice %580 {offsets = [0, 1], sizes = [4, 16], strides = [1, 1]} : vector<4x17xbf16> to vector<4x16xbf16>
    %cst_302 = arith.constant dense<0.000000e+00> : vector<8x16xf32>
    %585 = tpu.matmul %5, %584, %cst_302 {dimension_numbers = #tpu.dot_dimension_numbers<[1], [0], [0], [1], [0, 0, 1, 1], [], []>} : vector<8x4xbf16>, vector<4x16xbf16>, vector<8x16xf32> -> vector<8x16xf32>
    %586 = arith.addf %583, %585 : vector<8x16xf32>
    %587 = arith.index_cast %577 : i32 to index
    %c0_303 = arith.constant 0 : index
    %c0_304 = arith.constant 0 : index
    %588 = vector.load %arg4[%587, %c0_303, %c0_304] : memref<17x4x17xbf16, #tpu.memory_space<vmem>>, vector<1x4x17xbf16>
    %589 = vector.shape_cast %588 : vector<1x4x17xbf16> to vector<4x17xbf16>
    %590 = vector.extract_strided_slice %589 {offsets = [0, 0], sizes = [4, 16], strides = [1, 1]} : vector<4x17xbf16> to vector<4x16xbf16>
    %cst_305 = arith.constant dense<0.000000e+00> : vector<8x16xf32>
    %591 = tpu.matmul %3, %590, %cst_305 {dimension_numbers = #tpu.dot_dimension_numbers<[1], [0], [0], [1], [0, 0, 1, 1], [], []>} : vector<8x4xbf16>, vector<4x16xbf16>, vector<8x16xf32> -> vector<8x16xf32>
    %592 = arith.addf %586, %591 : vector<8x16xf32>
    %593 = vector.extract_strided_slice %589 {offsets = [0, 1], sizes = [4, 16], strides = [1, 1]} : vector<4x17xbf16> to vector<4x16xbf16>
    %cst_306 = arith.constant dense<0.000000e+00> : vector<8x16xf32>
    %594 = tpu.matmul %7, %593, %cst_306 {dimension_numbers = #tpu.dot_dimension_numbers<[1], [0], [0], [1], [0, 0, 1, 1], [], []>} : vector<8x4xbf16>, vector<4x16xbf16>, vector<8x16xf32> -> vector<8x16xf32>
    %595 = arith.addf %592, %594 : vector<8x16xf32>
    %c1_i32_307 = arith.constant 1 : i32
    %596 = arith.addi %575, %c1_i32_307 : i32
    %597 = arith.index_cast %596 : i32 to index
    %c0_308 = arith.constant 0 : index
    %c0_309 = arith.constant 0 : index
    %598 = vector.load %arg3[%597, %c0_308, %c0_309] : memref<17x4x17xbf16, #tpu.memory_space<vmem>>, vector<1x4x17xbf16>
    %599 = vector.shape_cast %598 : vector<1x4x17xbf16> to vector<4x17xbf16>
    %600 = vector.extract_strided_slice %599 {offsets = [0, 0], sizes = [4, 16], strides = [1, 1]} : vector<4x17xbf16> to vector<4x16xbf16>
    %cst_310 = arith.constant dense<0.000000e+00> : vector<8x16xf32>
    %601 = tpu.matmul %17, %600, %cst_310 {dimension_numbers = #tpu.dot_dimension_numbers<[1], [0], [0], [1], [0, 0, 1, 1], [], []>} : vector<8x4xbf16>, vector<4x16xbf16>, vector<8x16xf32> -> vector<8x16xf32>
    %602 = arith.addf %595, %601 : vector<8x16xf32>
    %603 = vector.extract_strided_slice %599 {offsets = [0, 1], sizes = [4, 16], strides = [1, 1]} : vector<4x17xbf16> to vector<4x16xbf16>
    %cst_311 = arith.constant dense<0.000000e+00> : vector<8x16xf32>
    %604 = tpu.matmul %21, %603, %cst_311 {dimension_numbers = #tpu.dot_dimension_numbers<[1], [0], [0], [1], [0, 0, 1, 1], [], []>} : vector<8x4xbf16>, vector<4x16xbf16>, vector<8x16xf32> -> vector<8x16xf32>
    %605 = arith.addf %602, %604 : vector<8x16xf32>
    %606 = arith.index_cast %596 : i32 to index
    %c0_312 = arith.constant 0 : index
    %c0_313 = arith.constant 0 : index
    %607 = vector.load %arg4[%606, %c0_312, %c0_313] : memref<17x4x17xbf16, #tpu.memory_space<vmem>>, vector<1x4x17xbf16>
    %608 = vector.shape_cast %607 : vector<1x4x17xbf16> to vector<4x17xbf16>
    %609 = vector.extract_strided_slice %608 {offsets = [0, 0], sizes = [4, 16], strides = [1, 1]} : vector<4x17xbf16> to vector<4x16xbf16>
    %cst_314 = arith.constant dense<0.000000e+00> : vector<8x16xf32>
    %610 = tpu.matmul %19, %609, %cst_314 {dimension_numbers = #tpu.dot_dimension_numbers<[1], [0], [0], [1], [0, 0, 1, 1], [], []>} : vector<8x4xbf16>, vector<4x16xbf16>, vector<8x16xf32> -> vector<8x16xf32>
    %611 = arith.addf %605, %610 : vector<8x16xf32>
    %612 = vector.extract_strided_slice %608 {offsets = [0, 1], sizes = [4, 16], strides = [1, 1]} : vector<4x17xbf16> to vector<4x16xbf16>
    %cst_315 = arith.constant dense<0.000000e+00> : vector<8x16xf32>
    %613 = tpu.matmul %23, %612, %cst_315 {dimension_numbers = #tpu.dot_dimension_numbers<[1], [0], [0], [1], [0, 0, 1, 1], [], []>} : vector<8x4xbf16>, vector<4x16xbf16>, vector<8x16xf32> -> vector<8x16xf32>
    %614 = arith.addf %611, %613 : vector<8x16xf32>
    %c0_i32_316 = arith.constant 0 : i32
    %615 = arith.addi %575, %c0_i32_316 : i32
    %616 = arith.index_cast %615 : i32 to index
    %c0_317 = arith.constant 0 : index
    %c0_318 = arith.constant 0 : index
    %617 = vector.load %arg5[%616, %c0_317, %c0_318] : memref<17x4x17xbf16, #tpu.memory_space<vmem>>, vector<1x4x17xbf16>
    %618 = vector.shape_cast %617 : vector<1x4x17xbf16> to vector<4x17xbf16>
    %619 = vector.extract_strided_slice %618 {offsets = [0, 0], sizes = [4, 16], strides = [1, 1]} : vector<4x17xbf16> to vector<4x16xbf16>
    %cst_319 = arith.constant dense<0.000000e+00> : vector<8x16xf32>
    %620 = tpu.matmul %9, %619, %cst_319 {dimension_numbers = #tpu.dot_dimension_numbers<[1], [0], [0], [1], [0, 0, 1, 1], [], []>} : vector<8x4xbf16>, vector<4x16xbf16>, vector<8x16xf32> -> vector<8x16xf32>
    %621 = arith.addf %614, %620 : vector<8x16xf32>
    %622 = vector.extract_strided_slice %618 {offsets = [0, 1], sizes = [4, 16], strides = [1, 1]} : vector<4x17xbf16> to vector<4x16xbf16>
    %cst_320 = arith.constant dense<0.000000e+00> : vector<8x16xf32>
    %623 = tpu.matmul %13, %622, %cst_320 {dimension_numbers = #tpu.dot_dimension_numbers<[1], [0], [0], [1], [0, 0, 1, 1], [], []>} : vector<8x4xbf16>, vector<4x16xbf16>, vector<8x16xf32> -> vector<8x16xf32>
    %624 = arith.addf %621, %623 : vector<8x16xf32>
    %625 = arith.index_cast %615 : i32 to index
    %c0_321 = arith.constant 0 : index
    %c0_322 = arith.constant 0 : index
    %626 = vector.load %arg6[%625, %c0_321, %c0_322] : memref<17x4x17xbf16, #tpu.memory_space<vmem>>, vector<1x4x17xbf16>
    %627 = vector.shape_cast %626 : vector<1x4x17xbf16> to vector<4x17xbf16>
    %628 = vector.extract_strided_slice %627 {offsets = [0, 0], sizes = [4, 16], strides = [1, 1]} : vector<4x17xbf16> to vector<4x16xbf16>
    %cst_323 = arith.constant dense<0.000000e+00> : vector<8x16xf32>
    %629 = tpu.matmul %11, %628, %cst_323 {dimension_numbers = #tpu.dot_dimension_numbers<[1], [0], [0], [1], [0, 0, 1, 1], [], []>} : vector<8x4xbf16>, vector<4x16xbf16>, vector<8x16xf32> -> vector<8x16xf32>
    %630 = arith.addf %624, %629 : vector<8x16xf32>
    %631 = vector.extract_strided_slice %627 {offsets = [0, 1], sizes = [4, 16], strides = [1, 1]} : vector<4x17xbf16> to vector<4x16xbf16>
    %cst_324 = arith.constant dense<0.000000e+00> : vector<8x16xf32>
    %632 = tpu.matmul %15, %631, %cst_324 {dimension_numbers = #tpu.dot_dimension_numbers<[1], [0], [0], [1], [0, 0, 1, 1], [], []>} : vector<8x4xbf16>, vector<4x16xbf16>, vector<8x16xf32> -> vector<8x16xf32>
    %633 = arith.addf %630, %632 : vector<8x16xf32>
    %c1_i32_325 = arith.constant 1 : i32
    %634 = arith.addi %575, %c1_i32_325 : i32
    %635 = arith.index_cast %634 : i32 to index
    %c0_326 = arith.constant 0 : index
    %c0_327 = arith.constant 0 : index
    %636 = vector.load %arg5[%635, %c0_326, %c0_327] : memref<17x4x17xbf16, #tpu.memory_space<vmem>>, vector<1x4x17xbf16>
    %637 = vector.shape_cast %636 : vector<1x4x17xbf16> to vector<4x17xbf16>
    %638 = vector.extract_strided_slice %637 {offsets = [0, 0], sizes = [4, 16], strides = [1, 1]} : vector<4x17xbf16> to vector<4x16xbf16>
    %cst_328 = arith.constant dense<0.000000e+00> : vector<8x16xf32>
    %639 = tpu.matmul %25, %638, %cst_328 {dimension_numbers = #tpu.dot_dimension_numbers<[1], [0], [0], [1], [0, 0, 1, 1], [], []>} : vector<8x4xbf16>, vector<4x16xbf16>, vector<8x16xf32> -> vector<8x16xf32>
    %640 = arith.addf %633, %639 : vector<8x16xf32>
    %641 = vector.extract_strided_slice %637 {offsets = [0, 1], sizes = [4, 16], strides = [1, 1]} : vector<4x17xbf16> to vector<4x16xbf16>
    %cst_329 = arith.constant dense<0.000000e+00> : vector<8x16xf32>
    %642 = tpu.matmul %29, %641, %cst_329 {dimension_numbers = #tpu.dot_dimension_numbers<[1], [0], [0], [1], [0, 0, 1, 1], [], []>} : vector<8x4xbf16>, vector<4x16xbf16>, vector<8x16xf32> -> vector<8x16xf32>
    %643 = arith.addf %640, %642 : vector<8x16xf32>
    %644 = arith.index_cast %634 : i32 to index
    %c0_330 = arith.constant 0 : index
    %c0_331 = arith.constant 0 : index
    %645 = vector.load %arg6[%644, %c0_330, %c0_331] : memref<17x4x17xbf16, #tpu.memory_space<vmem>>, vector<1x4x17xbf16>
    %646 = vector.shape_cast %645 : vector<1x4x17xbf16> to vector<4x17xbf16>
    %647 = vector.extract_strided_slice %646 {offsets = [0, 0], sizes = [4, 16], strides = [1, 1]} : vector<4x17xbf16> to vector<4x16xbf16>
    %cst_332 = arith.constant dense<0.000000e+00> : vector<8x16xf32>
    %648 = tpu.matmul %27, %647, %cst_332 {dimension_numbers = #tpu.dot_dimension_numbers<[1], [0], [0], [1], [0, 0, 1, 1], [], []>} : vector<8x4xbf16>, vector<4x16xbf16>, vector<8x16xf32> -> vector<8x16xf32>
    %649 = arith.addf %643, %648 : vector<8x16xf32>
    %650 = vector.extract_strided_slice %646 {offsets = [0, 1], sizes = [4, 16], strides = [1, 1]} : vector<4x17xbf16> to vector<4x16xbf16>
    %cst_333 = arith.constant dense<0.000000e+00> : vector<8x16xf32>
    %651 = tpu.matmul %31, %650, %cst_333 {dimension_numbers = #tpu.dot_dimension_numbers<[1], [0], [0], [1], [0, 0, 1, 1], [], []>} : vector<8x4xbf16>, vector<4x16xbf16>, vector<8x16xf32> -> vector<8x16xf32>
    %652 = arith.addf %649, %651 : vector<8x16xf32>
    %653 = arith.truncf %652 : vector<8x16xf32> to vector<8x16xbf16>
    %c0_334 = arith.constant 0 : index
    %c0_335 = arith.constant 0 : index
    %c6_336 = arith.constant 6 : index
    %c0_337 = arith.constant 0 : index
    %654 = vector.load %arg7[%c0_334, %c0_335, %c6_336, %c0_337] : memref<1x8x8x16xbf16, #tpu.memory_space<vmem>>, vector<1x8x1x16xbf16>
    %655 = vector.shape_cast %654 : vector<1x8x1x16xbf16> to vector<8x16xbf16>
    %656 = vector.shape_cast %653 : vector<8x16xbf16> to vector<1x8x1x16xbf16>
    tpu.vector_store %arg7[%c0_334, %c0_335, %c6_336, %c0_337], %656 {strides = array<i32>} : memref<1x8x8x16xbf16, #tpu.memory_space<vmem>>, vector<1x8x1x16xbf16>,
    %cst_338 = arith.constant dense<0.000000e+00> : vector<8xf32>
    %657 = vector.multi_reduction <add>, %652, %cst_338 [1] : vector<8x16xf32> to vector<8xf32>
    %658 = vector.shape_cast %657 : vector<8xf32> to vector<8x1xf32>
    %659 = arith.addf %569, %658 : vector<8x1xf32>
    %660 = arith.mulf %652, %652 : vector<8x16xf32>
    %cst_339 = arith.constant dense<0.000000e+00> : vector<8xf32>
    %661 = vector.multi_reduction <add>, %660, %cst_339 [1] : vector<8x16xf32> to vector<8xf32>
    %662 = vector.shape_cast %661 : vector<8xf32> to vector<8x1xf32>
    %663 = arith.addf %573, %662 : vector<8x1xf32>
    %c8_i32_340 = arith.constant 8 : i32
    %664 = arith.muli %arg1, %c8_i32_340 : i32
    %c7_i32 = arith.constant 7 : i32
    %665 = arith.addi %664, %c7_i32 : i32
    %cst_341 = arith.constant 0.000000e+00 : f32
    %666 = vector.broadcast %cst_341 : f32 to vector<8x16xf32>
    %c0_i32_342 = arith.constant 0 : i32
    %667 = arith.addi %665, %c0_i32_342 : i32
    %668 = arith.index_cast %667 : i32 to index
    %c0_343 = arith.constant 0 : index
    %c0_344 = arith.constant 0 : index
    %669 = vector.load %arg3[%668, %c0_343, %c0_344] : memref<17x4x17xbf16, #tpu.memory_space<vmem>>, vector<1x4x17xbf16>
    %670 = vector.shape_cast %669 : vector<1x4x17xbf16> to vector<4x17xbf16>
    %671 = vector.extract_strided_slice %670 {offsets = [0, 0], sizes = [4, 16], strides = [1, 1]} : vector<4x17xbf16> to vector<4x16xbf16>
    %cst_345 = arith.constant dense<0.000000e+00> : vector<8x16xf32>
    %672 = tpu.matmul %1, %671, %cst_345 {dimension_numbers = #tpu.dot_dimension_numbers<[1], [0], [0], [1], [0, 0, 1, 1], [], []>} : vector<8x4xbf16>, vector<4x16xbf16>, vector<8x16xf32> -> vector<8x16xf32>
    %673 = arith.addf %666, %672 : vector<8x16xf32>
    %674 = vector.extract_strided_slice %670 {offsets = [0, 1], sizes = [4, 16], strides = [1, 1]} : vector<4x17xbf16> to vector<4x16xbf16>
    %cst_346 = arith.constant dense<0.000000e+00> : vector<8x16xf32>
    %675 = tpu.matmul %5, %674, %cst_346 {dimension_numbers = #tpu.dot_dimension_numbers<[1], [0], [0], [1], [0, 0, 1, 1], [], []>} : vector<8x4xbf16>, vector<4x16xbf16>, vector<8x16xf32> -> vector<8x16xf32>
    %676 = arith.addf %673, %675 : vector<8x16xf32>
    %677 = arith.index_cast %667 : i32 to index
    %c0_347 = arith.constant 0 : index
    %c0_348 = arith.constant 0 : index
    %678 = vector.load %arg4[%677, %c0_347, %c0_348] : memref<17x4x17xbf16, #tpu.memory_space<vmem>>, vector<1x4x17xbf16>
    %679 = vector.shape_cast %678 : vector<1x4x17xbf16> to vector<4x17xbf16>
    %680 = vector.extract_strided_slice %679 {offsets = [0, 0], sizes = [4, 16], strides = [1, 1]} : vector<4x17xbf16> to vector<4x16xbf16>
    %cst_349 = arith.constant dense<0.000000e+00> : vector<8x16xf32>
    %681 = tpu.matmul %3, %680, %cst_349 {dimension_numbers = #tpu.dot_dimension_numbers<[1], [0], [0], [1], [0, 0, 1, 1], [], []>} : vector<8x4xbf16>, vector<4x16xbf16>, vector<8x16xf32> -> vector<8x16xf32>
    %682 = arith.addf %676, %681 : vector<8x16xf32>
    %683 = vector.extract_strided_slice %679 {offsets = [0, 1], sizes = [4, 16], strides = [1, 1]} : vector<4x17xbf16> to vector<4x16xbf16>
    %cst_350 = arith.constant dense<0.000000e+00> : vector<8x16xf32>
    %684 = tpu.matmul %7, %683, %cst_350 {dimension_numbers = #tpu.dot_dimension_numbers<[1], [0], [0], [1], [0, 0, 1, 1], [], []>} : vector<8x4xbf16>, vector<4x16xbf16>, vector<8x16xf32> -> vector<8x16xf32>
    %685 = arith.addf %682, %684 : vector<8x16xf32>
    %c1_i32_351 = arith.constant 1 : i32
    %686 = arith.addi %665, %c1_i32_351 : i32
    %687 = arith.index_cast %686 : i32 to index
    %c0_352 = arith.constant 0 : index
    %c0_353 = arith.constant 0 : index
    %688 = vector.load %arg3[%687, %c0_352, %c0_353] : memref<17x4x17xbf16, #tpu.memory_space<vmem>>, vector<1x4x17xbf16>
    %689 = vector.shape_cast %688 : vector<1x4x17xbf16> to vector<4x17xbf16>
    %690 = vector.extract_strided_slice %689 {offsets = [0, 0], sizes = [4, 16], strides = [1, 1]} : vector<4x17xbf16> to vector<4x16xbf16>
    %cst_354 = arith.constant dense<0.000000e+00> : vector<8x16xf32>
    %691 = tpu.matmul %17, %690, %cst_354 {dimension_numbers = #tpu.dot_dimension_numbers<[1], [0], [0], [1], [0, 0, 1, 1], [], []>} : vector<8x4xbf16>, vector<4x16xbf16>, vector<8x16xf32> -> vector<8x16xf32>
    %692 = arith.addf %685, %691 : vector<8x16xf32>
    %693 = vector.extract_strided_slice %689 {offsets = [0, 1], sizes = [4, 16], strides = [1, 1]} : vector<4x17xbf16> to vector<4x16xbf16>
    %cst_355 = arith.constant dense<0.000000e+00> : vector<8x16xf32>
    %694 = tpu.matmul %21, %693, %cst_355 {dimension_numbers = #tpu.dot_dimension_numbers<[1], [0], [0], [1], [0, 0, 1, 1], [], []>} : vector<8x4xbf16>, vector<4x16xbf16>, vector<8x16xf32> -> vector<8x16xf32>
    %695 = arith.addf %692, %694 : vector<8x16xf32>
    %696 = arith.index_cast %686 : i32 to index
    %c0_356 = arith.constant 0 : index
    %c0_357 = arith.constant 0 : index
    %697 = vector.load %arg4[%696, %c0_356, %c0_357] : memref<17x4x17xbf16, #tpu.memory_space<vmem>>, vector<1x4x17xbf16>
    %698 = vector.shape_cast %697 : vector<1x4x17xbf16> to vector<4x17xbf16>
    %699 = vector.extract_strided_slice %698 {offsets = [0, 0], sizes = [4, 16], strides = [1, 1]} : vector<4x17xbf16> to vector<4x16xbf16>
    %cst_358 = arith.constant dense<0.000000e+00> : vector<8x16xf32>
    %700 = tpu.matmul %19, %699, %cst_358 {dimension_numbers = #tpu.dot_dimension_numbers<[1], [0], [0], [1], [0, 0, 1, 1], [], []>} : vector<8x4xbf16>, vector<4x16xbf16>, vector<8x16xf32> -> vector<8x16xf32>
    %701 = arith.addf %695, %700 : vector<8x16xf32>
    %702 = vector.extract_strided_slice %698 {offsets = [0, 1], sizes = [4, 16], strides = [1, 1]} : vector<4x17xbf16> to vector<4x16xbf16>
    %cst_359 = arith.constant dense<0.000000e+00> : vector<8x16xf32>
    %703 = tpu.matmul %23, %702, %cst_359 {dimension_numbers = #tpu.dot_dimension_numbers<[1], [0], [0], [1], [0, 0, 1, 1], [], []>} : vector<8x4xbf16>, vector<4x16xbf16>, vector<8x16xf32> -> vector<8x16xf32>
    %704 = arith.addf %701, %703 : vector<8x16xf32>
    %c0_i32_360 = arith.constant 0 : i32
    %705 = arith.addi %665, %c0_i32_360 : i32
    %706 = arith.index_cast %705 : i32 to index
    %c0_361 = arith.constant 0 : index
    %c0_362 = arith.constant 0 : index
    %707 = vector.load %arg5[%706, %c0_361, %c0_362] : memref<17x4x17xbf16, #tpu.memory_space<vmem>>, vector<1x4x17xbf16>
    %708 = vector.shape_cast %707 : vector<1x4x17xbf16> to vector<4x17xbf16>
    %709 = vector.extract_strided_slice %708 {offsets = [0, 0], sizes = [4, 16], strides = [1, 1]} : vector<4x17xbf16> to vector<4x16xbf16>
    %cst_363 = arith.constant dense<0.000000e+00> : vector<8x16xf32>
    %710 = tpu.matmul %9, %709, %cst_363 {dimension_numbers = #tpu.dot_dimension_numbers<[1], [0], [0], [1], [0, 0, 1, 1], [], []>} : vector<8x4xbf16>, vector<4x16xbf16>, vector<8x16xf32> -> vector<8x16xf32>
    %711 = arith.addf %704, %710 : vector<8x16xf32>
    %712 = vector.extract_strided_slice %708 {offsets = [0, 1], sizes = [4, 16], strides = [1, 1]} : vector<4x17xbf16> to vector<4x16xbf16>
    %cst_364 = arith.constant dense<0.000000e+00> : vector<8x16xf32>
    %713 = tpu.matmul %13, %712, %cst_364 {dimension_numbers = #tpu.dot_dimension_numbers<[1], [0], [0], [1], [0, 0, 1, 1], [], []>} : vector<8x4xbf16>, vector<4x16xbf16>, vector<8x16xf32> -> vector<8x16xf32>
    %714 = arith.addf %711, %713 : vector<8x16xf32>
    %715 = arith.index_cast %705 : i32 to index
    %c0_365 = arith.constant 0 : index
    %c0_366 = arith.constant 0 : index
    %716 = vector.load %arg6[%715, %c0_365, %c0_366] : memref<17x4x17xbf16, #tpu.memory_space<vmem>>, vector<1x4x17xbf16>
    %717 = vector.shape_cast %716 : vector<1x4x17xbf16> to vector<4x17xbf16>
    %718 = vector.extract_strided_slice %717 {offsets = [0, 0], sizes = [4, 16], strides = [1, 1]} : vector<4x17xbf16> to vector<4x16xbf16>
    %cst_367 = arith.constant dense<0.000000e+00> : vector<8x16xf32>
    %719 = tpu.matmul %11, %718, %cst_367 {dimension_numbers = #tpu.dot_dimension_numbers<[1], [0], [0], [1], [0, 0, 1, 1], [], []>} : vector<8x4xbf16>, vector<4x16xbf16>, vector<8x16xf32> -> vector<8x16xf32>
    %720 = arith.addf %714, %719 : vector<8x16xf32>
    %721 = vector.extract_strided_slice %717 {offsets = [0, 1], sizes = [4, 16], strides = [1, 1]} : vector<4x17xbf16> to vector<4x16xbf16>
    %cst_368 = arith.constant dense<0.000000e+00> : vector<8x16xf32>
    %722 = tpu.matmul %15, %721, %cst_368 {dimension_numbers = #tpu.dot_dimension_numbers<[1], [0], [0], [1], [0, 0, 1, 1], [], []>} : vector<8x4xbf16>, vector<4x16xbf16>, vector<8x16xf32> -> vector<8x16xf32>
    %723 = arith.addf %720, %722 : vector<8x16xf32>
    %c1_i32_369 = arith.constant 1 : i32
    %724 = arith.addi %665, %c1_i32_369 : i32
    %725 = arith.index_cast %724 : i32 to index
    %c0_370 = arith.constant 0 : index
    %c0_371 = arith.constant 0 : index
    %726 = vector.load %arg5[%725, %c0_370, %c0_371] : memref<17x4x17xbf16, #tpu.memory_space<vmem>>, vector<1x4x17xbf16>
    %727 = vector.shape_cast %726 : vector<1x4x17xbf16> to vector<4x17xbf16>
    %728 = vector.extract_strided_slice %727 {offsets = [0, 0], sizes = [4, 16], strides = [1, 1]} : vector<4x17xbf16> to vector<4x16xbf16>
    %cst_372 = arith.constant dense<0.000000e+00> : vector<8x16xf32>
    %729 = tpu.matmul %25, %728, %cst_372 {dimension_numbers = #tpu.dot_dimension_numbers<[1], [0], [0], [1], [0, 0, 1, 1], [], []>} : vector<8x4xbf16>, vector<4x16xbf16>, vector<8x16xf32> -> vector<8x16xf32>
    %730 = arith.addf %723, %729 : vector<8x16xf32>
    %731 = vector.extract_strided_slice %727 {offsets = [0, 1], sizes = [4, 16], strides = [1, 1]} : vector<4x17xbf16> to vector<4x16xbf16>
    %cst_373 = arith.constant dense<0.000000e+00> : vector<8x16xf32>
    %732 = tpu.matmul %29, %731, %cst_373 {dimension_numbers = #tpu.dot_dimension_numbers<[1], [0], [0], [1], [0, 0, 1, 1], [], []>} : vector<8x4xbf16>, vector<4x16xbf16>, vector<8x16xf32> -> vector<8x16xf32>
    %733 = arith.addf %730, %732 : vector<8x16xf32>
    %734 = arith.index_cast %724 : i32 to index
    %c0_374 = arith.constant 0 : index
    %c0_375 = arith.constant 0 : index
    %735 = vector.load %arg6[%734, %c0_374, %c0_375] : memref<17x4x17xbf16, #tpu.memory_space<vmem>>, vector<1x4x17xbf16>
    %736 = vector.shape_cast %735 : vector<1x4x17xbf16> to vector<4x17xbf16>
    %737 = vector.extract_strided_slice %736 {offsets = [0, 0], sizes = [4, 16], strides = [1, 1]} : vector<4x17xbf16> to vector<4x16xbf16>
    %cst_376 = arith.constant dense<0.000000e+00> : vector<8x16xf32>
    %738 = tpu.matmul %27, %737, %cst_376 {dimension_numbers = #tpu.dot_dimension_numbers<[1], [0], [0], [1], [0, 0, 1, 1], [], []>} : vector<8x4xbf16>, vector<4x16xbf16>, vector<8x16xf32> -> vector<8x16xf32>
    %739 = arith.addf %733, %738 : vector<8x16xf32>
    %740 = vector.extract_strided_slice %736 {offsets = [0, 1], sizes = [4, 16], strides = [1, 1]} : vector<4x17xbf16> to vector<4x16xbf16>
    %cst_377 = arith.constant dense<0.000000e+00> : vector<8x16xf32>
    %741 = tpu.matmul %31, %740, %cst_377 {dimension_numbers = #tpu.dot_dimension_numbers<[1], [0], [0], [1], [0, 0, 1, 1], [], []>} : vector<8x4xbf16>, vector<4x16xbf16>, vector<8x16xf32> -> vector<8x16xf32>
    %742 = arith.addf %739, %741 : vector<8x16xf32>
    %743 = arith.truncf %742 : vector<8x16xf32> to vector<8x16xbf16>
    %c0_378 = arith.constant 0 : index
    %c0_379 = arith.constant 0 : index
    %c7_380 = arith.constant 7 : index
    %c0_381 = arith.constant 0 : index
    %744 = vector.load %arg7[%c0_378, %c0_379, %c7_380, %c0_381] : memref<1x8x8x16xbf16, #tpu.memory_space<vmem>>, vector<1x8x1x16xbf16>
    %745 = vector.shape_cast %744 : vector<1x8x1x16xbf16> to vector<8x16xbf16>
    %746 = vector.shape_cast %743 : vector<8x16xbf16> to vector<1x8x1x16xbf16>
    tpu.vector_store %arg7[%c0_378, %c0_379, %c7_380, %c0_381], %746 {strides = array<i32>} : memref<1x8x8x16xbf16, #tpu.memory_space<vmem>>, vector<1x8x1x16xbf16>,
    %cst_382 = arith.constant dense<0.000000e+00> : vector<8xf32>
    %747 = vector.multi_reduction <add>, %742, %cst_382 [1] : vector<8x16xf32> to vector<8xf32>
    %748 = vector.shape_cast %747 : vector<8xf32> to vector<8x1xf32>
    %749 = arith.addf %659, %748 : vector<8x1xf32>
    %750 = arith.mulf %742, %742 : vector<8x16xf32>
    %cst_383 = arith.constant dense<0.000000e+00> : vector<8xf32>
    %751 = vector.multi_reduction <add>, %750, %cst_383 [1] : vector<8x16xf32> to vector<8xf32>
    %752 = vector.shape_cast %751 : vector<8xf32> to vector<8x1xf32>
    %753 = arith.addf %663, %752 : vector<8x1xf32>
    %c0_384 = arith.constant 0 : index
    %c0_385 = arith.constant 0 : index
    %c0_386 = arith.constant 0 : index
    %c0_387 = arith.constant 0 : index
    %754 = vector.load %arg8[%c0_384, %c0_385, %c0_386, %c0_387] : memref<1x1x8x2xf32, #tpu.memory_space<vmem>>, vector<1x1x8x1xf32>
    %755 = vector.shape_cast %754 : vector<1x1x8x1xf32> to vector<8x1xf32>
    %756 = vector.shape_cast %749 : vector<8x1xf32> to vector<1x1x8x1xf32>
    tpu.vector_store %arg8[%c0_384, %c0_385, %c0_386, %c0_387], %756 {strides = array<i32>} : memref<1x1x8x2xf32, #tpu.memory_space<vmem>>, vector<1x1x8x1xf32>,
    %c0_388 = arith.constant 0 : index
    %c0_389 = arith.constant 0 : index
    %c0_390 = arith.constant 0 : index
    %c1_391 = arith.constant 1 : index
    %757 = vector.load %arg8[%c0_388, %c0_389, %c0_390, %c1_391] : memref<1x1x8x2xf32, #tpu.memory_space<vmem>>, vector<1x1x8x1xf32>
    %758 = vector.shape_cast %757 : vector<1x1x8x1xf32> to vector<8x1xf32>
    %759 = vector.shape_cast %753 : vector<8x1xf32> to vector<1x1x8x1xf32>
    tpu.vector_store %arg8[%c0_388, %c0_389, %c0_390, %c1_391], %759 {strides = array<i32>} : memref<1x1x8x2xf32, #tpu.memory_space<vmem>>, vector<1x1x8x1xf32>,
    return
  }
  func.func @transform_0(%arg0: i32, %arg1: i32) -> (i32, i32, i32) {
    %c0_i32 = arith.constant 0 : i32
    %c0_i32_0 = arith.constant 0 : i32
    %c0_i32_1 = arith.constant 0 : i32
    %c0_i32_2 = arith.constant 0 : i32
    return %c0_i32, %c0_i32_0, %c0_i32_1 : i32, i32, i32
  }
  func.func @transform_1(%arg0: i32, %arg1: i32) -> (i32, i32, i32) {
    %c0_i32 = arith.constant 0 : i32
    %c0_i32_0 = arith.constant 0 : i32
    %c0_i32_1 = arith.constant 0 : i32
    return %arg0, %c0_i32, %c0_i32_0 : i32, i32, i32
  }
  func.func @transform_2(%arg0: i32, %arg1: i32) -> (i32, i32, i32) {
    %c0_i32 = arith.constant 0 : i32
    %c0_i32_0 = arith.constant 0 : i32
    %c0_i32_1 = arith.constant 0 : i32
    return %arg0, %c0_i32, %c0_i32_0 : i32, i32, i32
  }
  func.func @transform_3(%arg0: i32, %arg1: i32) -> (i32, i32, i32) {
    %c0_i32 = arith.constant 0 : i32
    %c0_i32_0 = arith.constant 0 : i32
    %c0_i32_1 = arith.constant 0 : i32
    return %arg0, %c0_i32, %c0_i32_0 : i32, i32, i32
  }
  func.func @transform_4(%arg0: i32, %arg1: i32) -> (i32, i32, i32) {
    %c0_i32 = arith.constant 0 : i32
    %c0_i32_0 = arith.constant 0 : i32
    %c0_i32_1 = arith.constant 0 : i32
    return %arg0, %c0_i32, %c0_i32_0 : i32, i32, i32
  }
  func.func @transform_5(%arg0: i32, %arg1: i32) -> (i32, i32, i32, i32) {
    %c0_i32 = arith.constant 0 : i32
    %c0_i32_0 = arith.constant 0 : i32
    %c0_i32_1 = arith.constant 0 : i32
    return %arg0, %c0_i32, %arg1, %c0_i32_0 : i32, i32, i32, i32
  }
  func.func @transform_6(%arg0: i32, %arg1: i32) -> (i32, i32, i32, i32) {
    %c0_i32 = arith.constant 0 : i32
    %c0_i32_0 = arith.constant 0 : i32
    %c0_i32_1 = arith.constant 0 : i32
    return %arg0, %arg1, %c0_i32, %c0_i32_0 : i32, i32, i32, i32
  }
}

</mosaic_0001>

<bundles_post_ra>
// kernel: downsample_forward.3
= control target key start
LH: loop header
LB: loop body
LE: loop exit
PB: predicated region body
PF: predicated region fallthrough
CT: control target
= control target key end

     0   :  { %s730_s12 = smov 0   ;;  %s732_s13 = smov 0   ;;  %s869_s0 = inlined_call_operand.vmem [shape: f32[8,16], index: 0, kind: input, shape index: {}]   ;;  %s870_s1 = inlined_call_operand.vmem [shape: f32[8,16], index: 1, kind: input, shape index: {}]   ;;  %s871_s2 = inlined_call_operand.vmem [shape: bf16[2,8,16,16], index: 2, kind: input, shape index: {}]   ;;  %s872_s3 = inlined_call_operand.vmem [shape: f32[2,8,16,16], index: 3, kind: output, shape index: {}]  }
   0x1   :  { %s734_s14 = smov 0  }
   0x2 LB: > { %s25_s15 = sadd.s32 1, %s703_s13  ;;  %p612_p0 = scmp.ge.s32.totalorder %s707_s14, 1  ;;  %s707_s14 = sphi %s734_s14, %s13_s14   ;;  %s703_s13 = sphi %s732_s13, %s874_s13   ;;  %s699_s12 = sphi %s730_s12, %s873_s12  }
   0x3   : > { %p27_p1 = scmp.ge.s32.totalorder %s25_s15, 2  ;;  %p158_p2 = scmp.lt.s32.totalorder %s707_s14, 3 }
   0x5   : > { %s876_s15 = smov (%p27_p1, %s25_s15), 0  ;;  %p159_p3 = pnand %p612_p0, %p158_p2 }
   0x6   : > { %p191_p4 = scmp.lt.s32.totalorder (!%p159_p3), %s699_s12, 1  ;;  %v216_v0 = vlaneseq (!%p159_p3)  ;;  %v709_v1 = vmov (!%p159_p3), 1966171168   ;;  %v210_v4 = vld [vmem:[%s869_s0] sm:$0xff] (!%p159_p3)  ;;  %vm504_vm0 = vcmask (!%p159_p3), 130048  }
   0x7   : > { %162 = sbr.rel (%p159_p3) target bundleno = 53 (0x35), region = 32  ;;  %v214_v2 = vunpack.c.l.s4 (!%p159_p3), %v709_v1  ;;  %v261_v6 = vld [vmem:[%s870_s1] sm:$0xff] (!%p159_p3)  ;;  %v212_v12 = vcombine.high (!%p159_p3), %v210_v4, %v210_v4 }
   0x8   : > { %v217_v3 = vshrl.u32 (!%p159_p3), %v216_v0, 7  ;;  %v263_v13 = vcombine.high (!%p159_p3), %v261_v6, %v261_v6 }
   0x9   : > { %v215_v5 = vunpack.c.0.s8 (!%p159_p3), %v214_v2 }
   0xa   : > { %v765_v9 = vsub.s32 (!%p159_p3), 0, %v217_v3 }
   0xb   : > { %v762_v7 = vsub.s32 (!%p159_p3), %v215_v5, %v217_v3 }
   0xd   : > { %v219_v14 = vrot.slane (!%p159_p3), %v210_v4, %v762_v7  ;;  %v270_v15 = vrot.slane (!%p159_p3), %v261_v6, %v762_v7  ;;  %v775_v29 = vrot.slane (!%p159_p3), %v212_v12, %v762_v7  ;;  %v778_v30 = vrot.slane (!%p159_p3), %v263_v13, %v762_v7 }
   0xe   : > { %s878_s12 = smov (!%p191_p4, %s699_s12), 1 }
   0xf   : > { %s619_s20 = sshll.u32 %s878_s12, 6  ;;  %v235_v23 = vrot.slane %v219_v14, %v762_v7  ;;  %v286_v24 = vrot.slane %v270_v15, %v762_v7  ;;  %v227_v25 = vcombine.high %v219_v14, %v219_v14  ;;  %v278_v26 = vcombine.high %v270_v15, %v270_v15  ;;  %s620_s24 = sshll.u32 %s878_s12, 7 }
  0x10   : > { %s760_s23 = scalar_lea.vmem %s871_s2, %s619_s20  ;;  %v786_v37 = vrot.slane %v775_v29, %v762_v7  ;;  %v790_v38 = vrot.slane %v778_v30, %v762_v7  ;;  %s802_s27 = scalar_lea.vmem %s872_s3, %s620_s24 }
  0x11   : > { %v622_v8 = vld [vmem:[%s760_s23] sm:$0xff]   ;;  %v653_v10 = vld [vmem:[%s760_s23 + $0x8] sm:$0xff]   ;;  %v654_v11 = vld [vmem:[%s760_s23 + $0x10] sm:$0xff]   ;;  %v347_v31 = vrot.slane %v235_v23, %v765_v9  ;;  %v403_v32 = vrot.slane %v286_v24, %v765_v9  ;;  %v249_v33 = vrot.slane %v227_v25, %v762_v7  ;;  %v300_v34 = vrot.slane %v278_v26, %v762_v7 }
  0x12   : > { %v623_v16 = vunpack.c.l.bf16 %v622_v8  ;;  %v624_v17 = vunpack.c.h.bf16 %v622_v8  ;;  %v655_v18 = vld [vmem:[%s760_s23 + $0x18] sm:$0xff]   ;;  %v627_v19 = vunpack.c.l.bf16 %v653_v10  ;;  %v628_v20 = vunpack.c.h.bf16 %v653_v10  ;;  %v656_v1 = vld [vmem:[%s760_s23 + $0x20] sm:$0xff]  }
  0x13   : > { %v631_v21 = vunpack.c.l.bf16 %v654_v11  ;;  %v632_v22 = vunpack.c.h.bf16 %v654_v11  ;;  %v635_v27 = vunpack.c.l.bf16 %v655_v18  ;;  %v636_v28 = vunpack.c.h.bf16 %v655_v18 }
  0x14   : > { %v257_v35 = vcombine.high %v235_v23, %v235_v23  ;;  %v308_v36 = vcombine.high %v286_v24, %v286_v24  ;;  %v384_v39 = vmul.f32 %v623_v16, %v347_v31  ;;  %v385_v40 = vmul.f32 %v624_v17, %v347_v31  ;;  %v657_v16 = vld [vmem:[%s760_s23 + $0x28] sm:$0xff]   ;;  %v658_v23 = vld [vmem:[%s760_s23 + $0x30] sm:$0xff]  }
  0x15   : > { %v351_v41 = vrot.slane %v249_v33, %v765_v9  ;;  %v407_v42 = vrot.slane %v300_v34, %v765_v9  ;;  %v259_v45 = vcombine.high %v249_v33, %v249_v33  ;;  %v310_v46 = vcombine.high %v300_v34, %v300_v34 }
  0x16   : > { %v355_v43 = vrot.slane %v257_v35, %v765_v9  ;;  %v411_v44 = vrot.slane %v308_v36, %v765_v9  ;;  %v440_v47 = vadd.f32 %v403_v32, %v384_v39  ;;  %v441_v48 = vadd.f32 %v403_v32, %v385_v40 }
  0x17   : > { %v386_v49 = vmul.f32 %v627_v19, %v351_v41  ;;  %v387_v50 = vmul.f32 %v628_v20, %v351_v41  ;;  %v359_v53 = vrot.slane %v259_v45, %v765_v9  ;;  %v415_v54 = vrot.slane %v310_v46, %v765_v9 }
  0x18   : > { %v388_v51 = vmul.f32 %v631_v21, %v355_v43  ;;  %v389_v52 = vmul.f32 %v632_v22, %v355_v43  ;;  %vm456_vm1 = vcmp.ge.f32.partialorder %v440_v47, 0.0  ;;  %v472_v55 = vmul.f32 0.2, %v440_v47 }
  0x19   : > { %vm457_vm2 = vcmp.ge.f32.partialorder %v441_v48, 0.0  ;;  %v473_v56 = vmul.f32 0.2, %v441_v48  ;;  %v442_v57 = vadd.f32 %v407_v42, %v386_v49  ;;  %v443_v58 = vadd.f32 %v407_v42, %v387_v50 }
  0x1a   : > { %v444_v59 = vadd.f32 %v411_v44, %v388_v51  ;;  %v445_v60 = vadd.f32 %v411_v44, %v389_v52  ;;  %v488_v61 = vsel %vm456_vm1, %v440_v47, %v472_v55  ;;  %v390_v63 = vmul.f32 %v635_v27, %v359_v53  ;;  %v659_v44 = vld [vmem:[%s760_s23 + $0x38] sm:$0xff]  }
  0x1b   : > { %v489_v62 = vsel %vm457_vm2, %v441_v48, %v473_v56  ;;  %v391_v0 = vmul.f32 %v636_v28, %v359_v53  ;;  %505 = vst.msk [vmem:[%s802_s27] sm:$0xff] %vm504_vm0, %v488_v61  ;;  %vm458_vm3 = vcmp.ge.f32.partialorder %v442_v57, 0.0  ;;  %v474_v2 = vmul.f32 0.2, %v442_v57 }
  0x1c   : > { %506 = vst.msk [vmem:[%s802_s27 + $0x8] sm:$0xff] %vm504_vm0, %v489_v62  ;;  %vm459_vm4 = vcmp.ge.f32.partialorder %v443_v58, 0.0  ;;  %v475_v3 = vmul.f32 0.2, %v443_v58  ;;  %vm460_vm5 = vcmp.ge.f32.partialorder %v444_v59, 0.0  ;;  %vm461_vm6 = vcmp.ge.f32.partialorder %v445_v60, 0.0 }
  0x1d   : > { %v476_v4 = vmul.f32 0.2, %v444_v59  ;;  %v477_v5 = vmul.f32 0.2, %v445_v60  ;;  %v490_v6 = vsel %vm458_vm3, %v442_v57, %v474_v2  ;;  %v446_v10 = vadd.f32 %v415_v54, %v390_v63 }
  0x1e   : > { %v491_v8 = vsel %vm459_vm4, %v443_v58, %v475_v3  ;;  %v447_v11 = vadd.f32 %v415_v54, %v391_v0  ;;  %507 = vst.msk [vmem:[%s802_s27 + $0x10] sm:$0xff] %vm504_vm0, %v490_v6  ;;  %v639_v14 = vunpack.c.l.bf16 %v656_v1  ;;  %v363_v15 = vrot.slane %v786_v37, %v765_v9 }
  0x1f   : > { %508 = vst.msk [vmem:[%s802_s27 + $0x18] sm:$0xff] %vm504_vm0, %v491_v8  ;;  %v492_v12 = vsel %vm460_vm5, %v444_v59, %v476_v4  ;;  %v493_v13 = vsel %vm461_vm6, %v445_v60, %v477_v5  ;;  %vm462_vm7 = vcmp.ge.f32.partialorder %v446_v10, 0.0  ;;  %v478_v17 = vmul.f32 0.2, %v446_v10 }
  0x20   : > { %509 = vst.msk [vmem:[%s802_s27 + $0x20] sm:$0xff] %vm504_vm0, %v492_v12  ;;  %510 = vst.msk [vmem:[%s802_s27 + $0x28] sm:$0xff] %vm504_vm0, %v493_v13  ;;  %vm463_vm8 = vcmp.ge.f32.partialorder %v447_v11, 0.0  ;;  %v479_v18 = vmul.f32 0.2, %v447_v11  ;;  %v392_v19 = vmul.f32 %v639_v14, %v363_v15  ;;  %v419_v20 = vrot.slane %v790_v38, %v765_v9 }
  0x21   : > { %v640_v21 = vunpack.c.h.bf16 %v656_v1  ;;  %v228_v22 = vcombine.high %v775_v29, %v775_v29  ;;  %v494_v24 = vsel %vm462_vm7, %v446_v10, %v478_v17  ;;  %v279_v26 = vcombine.high %v778_v30, %v778_v30 }
  0x22   : > { %v495_v25 = vsel %vm463_vm8, %v447_v11, %v479_v18  ;;  %v643_v27 = vunpack.c.l.bf16 %v657_v16  ;;  %511 = vst.msk [vmem:[%s802_s27 + $0x30] sm:$0xff] %vm504_vm0, %v494_v24  ;;  %v448_v28 = vadd.f32 %v419_v20, %v392_v19  ;;  %v644_v33 = vunpack.c.h.bf16 %v657_v16 }
  0x23   : > { %512 = vst.msk [vmem:[%s802_s27 + $0x38] sm:$0xff] %vm504_vm0, %v495_v25  ;;  %v393_v31 = vmul.f32 %v640_v21, %v363_v15  ;;  %v256_v32 = vrot.slane %v228_v22, %v762_v7  ;;  %v307_v34 = vrot.slane %v279_v26, %v762_v7  ;;  %v258_v29 = vcombine.high %v786_v37, %v786_v37 }
  0x24   : > { %v309_v30 = vcombine.high %v790_v38, %v790_v38  ;;  %v647_v35 = vunpack.c.l.bf16 %v658_v23  ;;  %vm464_vm9 = vcmp.ge.f32.partialorder %v448_v28, 0.0  ;;  %v480_v36 = vmul.f32 0.2, %v448_v28 }
  0x25   : > { %v449_v39 = vadd.f32 %v419_v20, %v393_v31  ;;  %v367_v40 = vrot.slane %v256_v32, %v765_v9  ;;  %v423_v41 = vrot.slane %v307_v34, %v765_v9  ;;  %v371_v42 = vrot.slane %v258_v29, %v765_v9 }
  0x26   : > { %v427_v43 = vrot.slane %v309_v30, %v765_v9  ;;  %v648_v7 = vunpack.c.h.bf16 %v658_v23  ;;  %v496_v37 = vsel %vm464_vm9, %v448_v28, %v480_v36  ;;  %v260_v49 = vcombine.high %v256_v32, %v256_v32 }
  0x27   : > { %vm465_vm10 = vcmp.ge.f32.partialorder %v449_v39, 0.0  ;;  %v481_v45 = vmul.f32 0.2, %v449_v39  ;;  %v394_v46 = vmul.f32 %v643_v27, %v367_v40  ;;  %513 = vst.msk [vmem:[%s802_s27 + $0x40] sm:$0xff] %vm504_vm0, %v496_v37  ;;  %v395_v38 = vmul.f32 %v644_v33, %v367_v40 }
  0x28   : > { %v396_v47 = vmul.f32 %v647_v35, %v371_v42  ;;  %v397_v48 = vmul.f32 %v648_v7, %v371_v42  ;;  %v311_v52 = vcombine.high %v307_v34, %v307_v34  ;;  %v651_v53 = vunpack.c.l.bf16 %v659_v44 }
  0x29   : > { %v497_v50 = vsel %vm465_vm10, %v449_v39, %v481_v45  ;;  %v450_v51 = vadd.f32 %v423_v41, %v394_v46  ;;  %v451_v54 = vadd.f32 %v423_v41, %v395_v38  ;;  %v375_v57 = vrot.slane %v260_v49, %v765_v9 }
  0x2a   : > { %514 = vst.msk [vmem:[%s802_s27 + $0x48] sm:$0xff] %vm504_vm0, %v497_v50  ;;  %v452_v55 = vadd.f32 %v427_v43, %v396_v47  ;;  %v453_v56 = vadd.f32 %v427_v43, %v397_v48  ;;  %v431_v59 = vrot.slane %v311_v52, %v765_v9  ;;  %v652_v60 = vunpack.c.h.bf16 %v659_v44 }
  0x2b   : > { %vm466_vm11 = vcmp.ge.f32.partialorder %v450_v51, 0.0  ;;  %v482_v58 = vmul.f32 0.2, %v450_v51  ;;  %vm467_vm12 = vcmp.ge.f32.partialorder %v451_v54, 0.0  ;;  %v483_v61 = vmul.f32 0.2, %v451_v54 }
  0x2c   : > { %vm468_vm13 = vcmp.ge.f32.partialorder %v452_v55, 0.0  ;;  %v484_v62 = vmul.f32 0.2, %v452_v55  ;;  %vm469_vm14 = vcmp.ge.f32.partialorder %v453_v56, 0.0  ;;  %v485_v0 = vmul.f32 0.2, %v453_v56 }
  0x2d   : > { %v498_v63 = vsel %vm466_vm11, %v450_v51, %v482_v58  ;;  %v398_v1 = vmul.f32 %v651_v53, %v375_v57  ;;  %v499_v2 = vsel %vm467_vm12, %v451_v54, %v483_v61  ;;  %v399_v4 = vmul.f32 %v652_v60, %v375_v57 }
  0x2e   : > { %515 = vst.msk [vmem:[%s802_s27 + $0x50] sm:$0xff] %vm504_vm0, %v498_v63  ;;  %v500_v3 = vsel %vm468_vm13, %v452_v55, %v484_v62  ;;  %516 = vst.msk [vmem:[%s802_s27 + $0x58] sm:$0xff] %vm504_vm0, %v499_v2  ;;  %v501_v9 = vsel %vm469_vm14, %v453_v56, %v485_v0 }
  0x2f   : > { %517 = vst.msk [vmem:[%s802_s27 + $0x60] sm:$0xff] %vm504_vm0, %v500_v3  ;;  %v454_v5 = vadd.f32 %v431_v59, %v398_v1  ;;  %518 = vst.msk [vmem:[%s802_s27 + $0x68] sm:$0xff] %vm504_vm0, %v501_v9  ;;  %v455_v6 = vadd.f32 %v431_v59, %v399_v4 }
  0x31   : > { %vm470_vm15 = vcmp.ge.f32.partialorder %v454_v5, 0.0  ;;  %v486_v8 = vmul.f32 0.2, %v454_v5  ;;  %vm471_vm1 = vcmp.ge.f32.partialorder %v455_v6, 0.0  ;;  %v487_v10 = vmul.f32 0.2, %v455_v6 }
  0x33   : > { %v502_v11 = vsel %vm470_vm15, %v454_v5, %v486_v8  ;;  %v503_v12 = vsel %vm471_vm1, %v455_v6, %v487_v10 }
  0x34   : > { %519 = vst.msk [vmem:[%s802_s27 + $0x70] sm:$0xff] %vm504_vm0, %v502_v11  ;;  %520 = vst.msk [vmem:[%s802_s27 + $0x78] sm:$0xff] %vm504_vm0, %v503_v12 }
  0x35 PF: > { %s13_s14 = sadd.s32 1, %s707_s14   ;;  %s873_s12 = smov %s703_s13 }
  0x36   : > { %p10_p5 = scmp.ge.s32.totalorder %s13_s14, 4   ;;  %s874_s13 = smov %s876_s15 }
  0x38   :  { %12 = sbr.rel (!%p10_p5) target bundleno = 2 (0x2), region = 62 }

// kernel: downsample_forward.2
= control target key start
LH: loop header
LB: loop body
LE: loop exit
PB: predicated region body
PF: predicated region fallthrough
CT: control target
= control target key end

     0   :  { %s10398_s21 = smov 0   ;;  %s10400_s22 = smov 0   ;;  %s12263_s0 = inlined_call_operand.vmem [shape: bf16[16,8,4], index: 0, kind: input, shape index: {}]   ;;  %s12264_s1 = inlined_call_operand.vmem [shape: bf16[34,4,17], index: 1, kind: input, shape index: {}]   ;;  %s12265_s2 = inlined_call_operand.vmem [shape: bf16[34,4,17], index: 2, kind: input, shape index: {}]   ;;  %s12266_s3 = inlined_call_operand.vmem [shape: bf16[34,4,17], index: 3, kind: input, shape index: {}]   ;;  %s12267_s4 = inlined_call_operand.vmem [shape: bf16[34,4,17], index: 4, kind: input, shape index: {}]   ;;  %s12268_s5 = inlined_call_operand.vmem [shape: bf16[2,8,16,16], index: 5, kind: output, shape index: {0}]   ;;  %s12269_s6 = inlined_call_operand.vmem [shape: f32[2,2,8,2], index: 6, kind: output, shape index: {1}]  }
   0x1   :  { %s10402_s23 = smov 0   ;;  %s10404_s24 = smov 0  }
   0x2   :  { %s10406_s25 = smov 0   ;;  %s10408_s26 = smov 0  }
   0x3   :  { %s10410_s27 = smov 0  }
   0x4 LB: > { %s26_s28 = sadd.s32 1, %s10347_s25  ;;  %s29_s29 = sadd.s32 1, %s10351_s26  ;;  %s10355_s27 = sphi %s10410_s27, %s17_s27   ;;  %s10351_s26 = sphi %s10408_s26, %s12292_s26   ;;  %s10347_s25 = sphi %s10406_s25, %s12291_s25   ;;  %s10343_s24 = sphi %s10404_s24, %s12290_s24   ;;  %s10339_s23 = sphi %s10402_s23, %s12289_s23   ;;  %s10335_s22 = sphi %s10400_s22, %s12288_s22   ;;  %s10331_s21 = sphi %s10398_s21, %s12287_s21  }
   0x5   : > { %p27_p0 = scmp.ge.s32.totalorder %s26_s28, 2  ;;  %s8330_s30 = sadd.s32 4294967295, %s10355_s27  }
   0x6   : > { %p173_p1 = scmp.ne.s32.totalorder %s10335_s22, %s10331_s21  ;;  %p174_p2 = scmp.eq.s32.totalorder %s8330_s30, 3 }
   0x7   : > { %s12294_s28 = smov (%p27_p0, %s26_s28), 0  ;;  %s12296_s29 = smov (!%p27_p0, %s29_s29), %s10351_s26 }
   0x8   : > { %s159_s7 = ssub.s32 %s10347_s25, %s12294_s28  ;;  %p31_p3 = scmp.ge.s32.totalorder %s12296_s29, 2 }
   0x9   : > { %p8334_p4 = scmp.ge.s32.totalorder %s10355_s27, 1  ;;  %p10444_p5 = por %p174_p2, %p173_p1 }
   0xa   : > { %p265_p6 = scmp.lt.s32.totalorder %s10355_s27, 5  ;;  %s12298_s29 = smov (%p31_p3, %s12296_s29), 0 }
   0xb   : > { %s158_s9 = ssub.s32 %s10351_s26, %s12298_s29  ;;  %s163_s11 = sadd.s32 1, %s10335_s22 }
   0xc   : > { %p266_p7 = pnand %p8334_p4, %p265_p6  ;;  %s160_s10 = sor.u32 %s159_s7, %s158_s9 }
   0xd   : > { %p161_p8 = scmp.eq.s32.totalorder %s160_s10, 0  ;;  %s317_s13 = smul.u32 (!%p266_p7), 17, %s10343_s24  ;;  %v389_v0 = vlaneseq (!%p266_p7)  ;;  %v10357_v1 = vmov (!%p266_p7), 1983009808   ;;  %v10358_v3 = vmov (!%p266_p7), 0.0   ;;  %vm10359_vm0 = vmmov (!%p266_p7), 0  }
   0xe   : > { %269 = sbr.rel (%p266_p7) target bundleno = 1256 (0x4e8), region = 40  ;;  %v387_v2 = vunpack.c.l.s4 (!%p266_p7), %v10357_v1  ;;  %8943 = vmatprep.subr.bf16.mxu0 (!%p266_p7), %v10358_v3  ;;  %9039 = vmatprep.subr.bf16.mxu1 (!%p266_p7), %v10358_v3  ;;  %s10467_s14 = sshll.u32 (!%p266_p7), %s10339_s23, 4  ;;  %vm399_vm1 = vcmask (!%p266_p7), 1041408   ;;  %v10635_v52 = vld [vmem:[%s12263_s0 + $0x8] sm:$0xf] (!%p266_p7)  ;;  %vm395_vm2 = vcmask (!%p266_p7), 31744  }
   0xf   : > { %s10455_s12 = scalar_select %p161_p8, %s10335_s22, %s163_s11  }
  0x10   : > { %p318_p9 = scmp.lt.s32.totalorder (!%p266_p7), %s317_s13, 33  ;;  %v10460_v4 = vshrl.u32 (!%p266_p7), %v389_v0, 7  ;;  %8945 = vmatprep.mubr.msk.bf16.mxu0 (!%p266_p7), %vm10359_vm0, %v10358_v3  ;;  %9041 = vmatprep.mubr.msk.bf16.mxu1 (!%p266_p7), %vm10359_vm0, %v10358_v3  ;;  %v388_v5 = vunpack.c.0.s8 (!%p266_p7), %v387_v2  ;;  %s10360_s10 = smov (!%p266_p7), 127   ;;  %v10660_v58 = vld [vmem:[%s12263_s0] sm:$0xf] (!%p266_p7)  ;;  %vm1372_vm3 = vcmask (!%p266_p7), 130048  }
  0x11   : > { %v10688_v1 = vld [vmem:[%s12263_s0 + $0x4] sm:$0xf] (!%p266_p7)  ;;  %vm1345_vm4 = vcmask (!%p266_p7), 122880   ;;  %vm1346_vm5 = vsmask.f32 (!%p266_p7), 256  ;;  %vm3227_vm9 = vcmask (!%p266_p7), 123905  }
  0x12   : > { %v10472_v6 = vsub.s32 (!%p266_p7), %v388_v5, %v10460_v4  ;;  %vm2287_vm6 = vsmask.f32 (!%p266_p7), 7938  ;;  %vm11371_vm7 = vmand (!%p266_p7), %vm1345_vm4, %vm1346_vm5  ;;  %vm3228_vm10 = vsmask.f32 (!%p266_p7), 1280  ;;  %vm4168_vm11 = vsmask.f32 (!%p266_p7), 7942 }
  0x13   : > { %vm11439_vm8 = vmand (!%p266_p7), %vm1345_vm4, %vm2287_vm6  ;;  %vm5108_vm14 = vcmask (!%p266_p7), 124930   ;;  %vm5109_vm15 = vsmask.f32 (!%p266_p7), 2304  ;;  %vm6989_vm4 = vcmask (!%p266_p7), 125955   ;;  %vm6990_vm5 = vsmask.f32 (!%p266_p7), 3328 }
  0x14   : > { %vm11756_vm12 = vmand (!%p266_p7), %vm3227_vm9, %vm3228_vm10  ;;  %vm7930_vm6 = vsmask.f32 (!%p266_p7), 7950  ;;  %p341_p10 = scmp.lt.s32.totalorder (!%p266_p7), %s10343_s24, 1  ;;  %p343_p11 = scmp.lt.s32.totalorder (!%p266_p7), %s10339_s23, 1 }
  0x15   : > { %s12300_s13 = smov (!%p318_p9, %s317_s13), 33  ;;  %vm11816_vm13 = vmand %vm3227_vm9, %vm4168_vm11  ;;  %vm7967_vm9 = vcmask 15368  }
  0x16   : > { %s10469_s15 = sshll.u32 %s12300_s13, 1 }
  0x17   : > { %s321_s18 = scalar_lea.vmem %s12264_s1, %s10469_s15  ;;  %s327_s30 = scalar_lea.vmem %s12265_s2, %s10469_s15 }
  0x18   : > { %s10483_s7 = scalar_lea.vmem %s321_s18, %s10467_s14  ;;  %s10486_s9 = scalar_lea.vmem %s327_s30, %s10467_s14 }
  0x19   : > { %v10489_v7 = vld [vmem:[%s10483_s7] sm:$0x3]  ;;  %v10492_v8 = vld [vmem:[%s10483_s7 + $0x2] sm:$0x3]  ;;  %v10514_v16 = vld [vmem:[%s10483_s7 + $0x4] sm:$0x3]  ;;  %s333_s16 = scalar_lea.vmem %s12266_s3, %s10469_s15  ;;  %s339_s20 = scalar_lea.vmem %s12267_s4, %s10469_s15 }
  0x1a   : > { %v10495_v9 = vld [vmem:[%s10486_s9] sm:$0x3]  ;;  %v392_v10 = vrot.slane %v10489_v7, %v10472_v6  ;;  %v10502_v12 = vld [vmem:[%s10486_s9 + $0x2] sm:$0x3]  ;;  %v1390_v13 = vrot.slane %v10492_v8, %v10472_v6  ;;  %v1633_v18 = vrot.slane %v10514_v16, %v10472_v6  ;;  %v10530_v20 = vld [vmem:[%s10486_s9 + $0x4] sm:$0x3]  ;;  %s10533_s17 = scalar_lea.vmem %s333_s16, %s10467_s14  ;;  %s10552_s30 = scalar_lea.vmem %s339_s20, %s10467_s14 }
  0x1b   : > { %v546_v11 = vrot.slane %v10495_v9, %v10472_v6  ;;  %v1531_v14 = vrot.slane %v10502_v12, %v10472_v6  ;;  %v10511_v15 = vld [vmem:[%s10483_s7 + $0x2] sm:$0x3]  ;;  %v1734_v22 = vrot.slane %v10530_v20, %v10472_v6  ;;  %v10546_v23 = vld [vmem:[%s10533_s17] sm:$0x3]  ;;  %v10580_v33 = vld [vmem:[%s10533_s17 + $0x4] sm:$0x3] }
  0x1c   : > { %393 = vrot.lane.b32.xlu0 %v392_v10, %s10360_s10  ;;  %v654_v17 = vrot.slane %v10511_v15, %v10472_v6  ;;  %v10527_v19 = vld [vmem:[%s10486_s9 + $0x2] sm:$0x3]  ;;  %v868_v25 = vrot.slane %v10546_v23, %v10472_v6  ;;  %v10561_v27 = vld [vmem:[%s10552_s30] sm:$0x3]  ;;  %v2033_v34 = vrot.slane %v10580_v33, %v10472_v6  ;;  %v10592_v37 = vld [vmem:[%s10552_s30 + $0x4] sm:$0x3] }
  0x1d   : > { %547 = vrot.lane.b32.xlu1 %v546_v11, %s10360_s10  ;;  %v761_v21 = vrot.slane %v10527_v19, %v10472_v6  ;;  %v10549_v24 = vld [vmem:[%s10533_s17 + $0x2] sm:$0x3]  ;;  %v975_v29 = vrot.slane %v10561_v27, %v10472_v6  ;;  %v2134_v38 = vrot.slane %v10592_v37, %v10472_v6  ;;  %v10599_v39 = vld [vmem:[%s10483_s7 + $0x4] sm:$0x3]  ;;  %v10604_v41 = vld [vmem:[%s10483_s7 + $0x6] sm:$0x3] }
  0x1e   : > { %v1833_v26 = vrot.slane %v10549_v24, %v10472_v6  ;;  %v10564_v28 = vld [vmem:[%s10552_s30 + $0x2] sm:$0x3]  ;;  %v2330_v40 = vrot.slane %v10599_v39, %v10472_v6  ;;  %v3271_v42 = vrot.slane %v10604_v41, %v10472_v6  ;;  %v10611_v43 = vld [vmem:[%s10486_s9 + $0x4] sm:$0x3]  ;;  %v10617_v45 = vld [vmem:[%s10486_s9 + $0x6] sm:$0x3] }
  0x1f   : > { %v1932_v30 = vrot.slane %v10564_v28, %v10472_v6  ;;  %v10573_v31 = vld [vmem:[%s10533_s17 + $0x2] sm:$0x3]  ;;  %v2471_v44 = vrot.slane %v10611_v43, %v10472_v6  ;;  %v3412_v46 = vrot.slane %v10617_v45, %v10472_v6  ;;  %v10623_v47 = vld [vmem:[%s10483_s7 + $0x6] sm:$0x3]  ;;  %v10630_v51 = vld [vmem:[%s10483_s7 + $0x8] sm:$0x3] }
  0x20   : > { %1391 = vrot.lane.b32.xlu0 %v1390_v13, %s10360_s10  ;;  %v1082_v32 = vrot.slane %v10573_v31, %v10472_v6  ;;  %v10587_v35 = vld [vmem:[%s10552_s30 + $0x2] sm:$0x3]  ;;  %v2573_v48 = vrot.slane %v10623_v47, %v10472_v6  ;;  %v3514_v53 = vrot.slane %v10630_v51, %v10472_v6  ;;  %v447_v54 = vsel %vm399_vm1, %v10489_v7, 0  ;;  %v10674_v61 = vld [vmem:[%s10486_s9 + $0x6] sm:$0x3]  ;;  %s8647_s15 = sshll.u32 (%p10444_p5), %s10343_s24, 4 }
  0x21   : > { %1532 = vrot.lane.b32.xlu1 %v1531_v14, %s10360_s10  ;;  %v1189_v36 = vrot.slane %v10587_v35, %v10472_v6  ;;  %v1437_v57 = vsel %vm399_vm1, %v10492_v8, 0  ;;  %v496_v59 = vsel %vm399_vm1, %v10495_v9, 0  ;;  %v1481_v60 = vsel %vm399_vm1, %v10502_v12, 0  ;;  %v10683_v0 = vld [vmem:[%s10486_s9 + $0x8] sm:$0x3]  ;;  %s7985_s11 = sadd.s32 (%p10444_p5), %s10339_s23, %s8647_s15 }
  0x22   : > { %v2674_v63 = vrot.slane %v10674_v61, %v10472_v6  ;;  %v3615_v2 = vrot.slane %v10683_v0, %v10472_v6  ;;  %v10708_v9 = vld [vmem:[%s12263_s0 + $0xc] sm:$0xf]  ;;  %v604_v10 = vsel %vm399_vm1, %v10511_v15, 0  ;;  %v1583_v11 = vsel %vm399_vm1, %v10514_v16, 0  ;;  %v10722_v12 = vld [vmem:[%s10533_s17 + $0x4] sm:$0x3] }
  0x23   : > { %v2773_v13 = vrot.slane %v10722_v12, %v10472_v6  ;;  %v10731_v15 = vld [vmem:[%s10533_s17 + $0x6] sm:$0x3]  ;;  %v10736_v16 = vld [vmem:[%s12263_s0 + $0x20] sm:$0xf]  ;;  %s8648_s13 = sshll.u32 (%p10444_p5), %s7985_s11, 2 }
  0x24   : > { %655 = vrot.lane.b32.xlu0 %v654_v17, %s10360_s10  ;;  %v3714_v17 = vrot.slane %v10731_v15, %v10472_v6  ;;  %s7987_s18 = scalar_lea.vmem (%p10444_p5), %s12268_s5, %s8648_s13 }
  0x25   : > { %1634 = vrot.lane.b32.xlu1 %v1633_v18, %s10360_s10 }
  0x28   : > { %762 = vrot.lane.b32.xlu0 %v761_v21, %s10360_s10 }
  0x29   : > { %1735 = vrot.lane.b32.xlu1 %v1734_v22, %s10360_s10 }
  0x2c   : > { %869 = vrot.lane.b32.xlu0 %v868_v25, %s10360_s10  ;;  %v10756_v25 = vld [vmem:[%s12263_s0 + $0x28] sm:$0xf] }
  0x2d   : > { %1834 = vrot.lane.b32.xlu1 %v1833_v26, %s10360_s10  ;;  %v711_v26 = vsel %vm399_vm1, %v10527_v19, 0 }
  0x30   : > { %976 = vrot.lane.b32.xlu0 %v975_v29, %s10360_s10  ;;  %v1684_v29 = vsel %vm399_vm1, %v10530_v20, 0 }
  0x31   : > { %1933 = vrot.lane.b32.xlu1 %v1932_v30, %s10360_s10  ;;  %v10770_v30 = vld [vmem:[%s10552_s30 + $0x4] sm:$0x3] }
  0x32   : > { %v2872_v19 = vrot.slane %v10770_v30, %v10472_v6 }
  0x34   : > { %1083 = vrot.lane.b32.xlu0 %v1082_v32, %s10360_s10  ;;  %v10777_v32 = vld [vmem:[%s10552_s30 + $0x6] sm:$0x3] }
  0x35   : > { %2034 = vrot.lane.b32.xlu1 %v2033_v34, %s10360_s10  ;;  %v3813_v20 = vrot.slane %v10777_v32, %v10472_v6 }
  0x38   : > { %1190 = vrot.lane.b32.xlu0 %v1189_v36, %s10360_s10  ;;  %v10787_v36 = vld [vmem:[%s12263_s0 + $0x24] sm:$0xf] }
  0x39   : > { %2135 = vrot.lane.b32.xlu1 %v2134_v38, %s10360_s10 }
  0x3c   : > { %2331 = vrot.lane.b32.xlu0 %v2330_v40, %s10360_s10 }
  0x3d   : > { %3272 = vrot.lane.b32.xlu1 %v3271_v42, %s10360_s10 }
  0x40   : > { %2472 = vrot.lane.b32.xlu0 %v2471_v44, %s10360_s10  ;;  %v10804_v44 = vld [vmem:[%s12263_s0 + $0x2c] sm:$0xf] }
  0x41   : > { %3413 = vrot.lane.b32.xlu1 %v3412_v46, %s10360_s10  ;;  %v818_v46 = vsel %vm399_vm1, %v10546_v23, 0 }
  0x44   : > { %2574 = vrot.lane.b32.xlu0 %v2573_v48, %s10360_s10  ;;  %v1783_v48 = vsel %vm399_vm1, %v10549_v24, 0 }
  0x45   : > { %3515 = vrot.lane.b32.xlu1 %v3514_v53, %s10360_s10 }
  0x48   : > { %2675 = vrot.lane.b32.xlu0 %v2674_v63, %s10360_s10  ;;  %v10866_v63 = vld [vmem:[%s10552_s30 + $0x6] sm:$0x3] }
  0x49   : > { %3616 = vrot.lane.b32.xlu1 %v3615_v2, %s10360_s10  ;;  %v10873_v2 = vld [vmem:[%s10552_s30 + $0x8] sm:$0x3] }
  0x4c   : > { %2774 = vrot.lane.b32.xlu0 %v2773_v13, %s10360_s10  ;;  %v10895_v13 = vld [vmem:[%s10483_s7 + $0x8] sm:$0x3] }
  0x4d   : > { %3715 = vrot.lane.b32.xlu1 %v3714_v17, %s10360_s10  ;;  %v10902_v17 = vld [vmem:[%s10483_s7 + $0xa] sm:$0x3] }
  0x50   : > { %2873 = vrot.lane.b32.xlu0 %v2872_v19, %s10360_s10 }
  0x51   : > { %3814 = vrot.lane.b32.xlu1 %v3813_v20, %s10360_s10 }
  0x8e   : > { %v394_v49 = vpop.permute.xlu0 %393 }
  0x8f   : > { %v401_v50 = vsel %vm399_vm1, %v394_v49, 0  ;;  %v548_v62 = vpop.permute.xlu1 %547  ;;  %v10818_v49 = vld [vmem:[%s10533_s17 + $0x6] sm:$0x3] }
  0x90   : > { %8944 = vmatpush3.bf16.msra.mxu0 %v401_v50  ;;  %v553_v5 = vsel %vm399_vm1, %v548_v62, 0  ;;  %v2973_v23 = vrot.slane %v10818_v49, %v10472_v6  ;;  %v10825_v50 = vld [vmem:[%s10533_s17 + $0x8] sm:$0x3]  ;;  %v1882_v62 = vsel %vm399_vm1, %v10564_v28, 0  ;;  %v4015_v28 = vrot.slane %v10873_v2, %v10472_v6 }
  0x91   : > { %8949 = vmatprep.subr.bf16.mxu0 %v10358_v3  ;;  %v3914_v24 = vrot.slane %v10825_v50, %v10472_v6 }
  0x92   : > { %v1392_v55 = vpop.permute.xlu0 %1391  ;;  %2974 = vrot.lane.b32.xlu0 %v2973_v23, %s10360_s10  ;;  %v10979_v23 = vld [vmem:[%s12263_s0 + $0x34] sm:$0xf] }
  0x93   : > { %8946 = vmatmul.mubr.msk.bf16.vlgmr.msra.gmra.mrb[0].mxu0 %vm395_vm2, %v10635_v52  ;;  %v1394_v56 = vsel %vm399_vm1, %v1392_v55, 0  ;;  %v1533_v7 = vpop.permute.xlu1 %1532  ;;  %3915 = vrot.lane.b32.xlu1 %v3914_v24, %s10360_s10 }
  0x94   : > { %8950 = vmatpush3.bf16.msra.mxu0 %v447_v54  ;;  %9040 = vmatpush3.bf16.msra.mxu1 %v1394_v56  ;;  %v1535_v8 = vsel %vm399_vm1, %v1533_v7, 0  ;;  %v10835_v54 = vld [vmem:[%s12263_s0 + $0x10] sm:$0xf]  ;;  %v10883_v7 = vld [vmem:[%s12263_s0 + $0x14] sm:$0xf] }
  0x95   : > { %9045 = vmatprep.subr.bf16.mxu1 %v10358_v3  ;;  %8951 = vmatprep.mubr.msk.bf16.mxu0 %vm10359_vm0, %v10358_v3 }
  0x96   : > { %8955 = vmatprep.subr.bf16.mxu0 %v10358_v3  ;;  %v656_v14 = vpop.permute.xlu0 %655 }
  0x97   : > { %9042 = vmatmul.mubr.msk.bf16.vlgmr.msra.gmra.mrb[0].mxu1 %vm395_vm2, %v10635_v52  ;;  %v661_v18 = vsel %vm399_vm1, %v656_v14, 0  ;;  %v1635_v21 = vpop.permute.xlu1 %1634  ;;  %4016 = vrot.lane.b32.xlu1 %v4015_v28, %s10360_s10  ;;  %v4211_v14 = vrot.slane %v10895_v13, %v10472_v6 }
  0x98   : > { %9046 = vmatpush3.bf16.msra.mxu1 %v1437_v57  ;;  %9047 = vmatprep.mubr.msk.bf16.mxu1 %vm10359_vm0, %v10358_v3  ;;  %v1637_v22 = vsel %vm399_vm1, %v1635_v21, 0  ;;  %v10912_v21 = vld [vmem:[%s12263_s0 + $0x1c] sm:$0xf] }
  0x99   : > { %9051 = vmatprep.subr.bf16.mxu1 %v10358_v3 }
  0x9a   : > { %v763_v34 = vpop.permute.xlu0 %762 }
  0x9b   : > { %v768_v38 = vsel %vm399_vm1, %v763_v34, 0  ;;  %v1736_v40 = vpop.permute.xlu1 %1735  ;;  %v10948_v34 = vld [vmem:[%s12263_s0 + $0x38] sm:$0xf] }
  0x9c   : > { %v1738_v42 = vsel %vm399_vm1, %v1736_v40, 0  ;;  %v10955_v40 = vld [vmem:[%s10486_s9 + $0x8] sm:$0x3] }
  0x9e   : > { %v870_v53 = vpop.permute.xlu0 %869 }
  0x9f   : > { %8952 = vmatmul.mubr.msk.bf16.vlgmr.msra.gmra.mrb[0].mxu0 %vm395_vm2, %v10660_v58  ;;  %v875_v55 = vsel %vm399_vm1, %v870_v53, 0  ;;  %v1835_v56 = vpop.permute.xlu1 %1834 }
  0xa0   : > { %8956 = vmatpush3.bf16.msra.mxu0 %v496_v59  ;;  %8957 = vmatprep.mubr.msk.bf16.mxu0 %vm10359_vm0, %v10358_v3  ;;  %v1837_v57 = vsel %vm399_vm1, %v1835_v56, 0  ;;  %v10852_v59 = vld [vmem:[%s12263_s0 + $0x18] sm:$0xf]  ;;  %v10993_v56 = vld [vmem:[%s10483_s7 + $0xc] sm:$0x3] }
  0xa1   : > { %8961 = vmatprep.subr.bf16.mxu0 %v10358_v3 }
  0xa3   : > { %9048 = vmatmul.mubr.msk.bf16.vlgmr.msra.gmra.mrb[0].mxu1 %vm395_vm2, %v10660_v58 }
  0xa4   : > { %9052 = vmatpush3.bf16.msra.mxu1 %v1481_v60  ;;  %9053 = vmatprep.mubr.msk.bf16.mxu1 %vm10359_vm0, %v10358_v3  ;;  %v925_v60 = vsel %vm399_vm1, %v10561_v27, 0  ;;  %v3074_v27 = vrot.slane %v10866_v63, %v10472_v6 }
  0xa5   : > { %9057 = vmatprep.subr.bf16.mxu1 %v10358_v3 }
  0xa6   : > { %3075 = vrot.lane.b32.xlu0 %v3074_v27, %s10360_s10 }
  0xaa   : > { %4212 = vrot.lane.b32.xlu0 %v4211_v14, %s10360_s10 }
  0xab   : > { %8958 = vmatmul.mubr.msk.bf16.vlgmr.msra.gmra.mrb[0].mxu0 %vm395_vm2, %v10688_v1 }
  0xac   : > { %8962 = vmatpush3.bf16.msra.mxu0 %v553_v5  ;;  %8963 = vmatprep.mubr.msk.bf16.mxu0 %vm10359_vm0, %v10358_v3  ;;  %v977_v5 = vpop.permute.xlu0 %976 }
  0xad   : > { %8967 = vmatprep.subr.bf16.mxu0 %v10358_v3 }
  0xaf   : > { %9054 = vmatmul.mubr.msk.bf16.vlgmr.msra.gmra.mrb[0].mxu1 %vm395_vm2, %v10688_v1 }
  0xb0   : > { %9058 = vmatpush3.bf16.msra.mxu1 %v1535_v8  ;;  %9059 = vmatprep.mubr.msk.bf16.mxu1 %vm10359_vm0, %v10358_v3  ;;  %v982_v8 = vsel %vm399_vm1, %v977_v5, 0  ;;  %v11006_v5 = vld [vmem:[%s10483_s7 + $0xa] sm:$0x3] }
  0xb1   : > { %9063 = vmatprep.subr.bf16.mxu1 %v10358_v3 }
  0xb7   : > { %8964 = vmatmul.mubr.msk.bf16.vlgmr.msra.gmra.mrb[0].mxu0 %vm395_vm2, %v10708_v9 }
  0xb8   : > { %8968 = vmatpush3.bf16.msra.mxu0 %v604_v10  ;;  %8969 = vmatprep.mubr.msk.bf16.mxu0 %vm10359_vm0, %v10358_v3  ;;  %v1934_v10 = vpop.permute.xlu1 %1933 }
  0xb9   : > { %8973 = vmatprep.subr.bf16.mxu0 %v10358_v3 }
  0xbb   : > { %9060 = vmatmul.mubr.msk.bf16.vlgmr.msra.gmra.mrb[0].mxu1 %vm395_vm2, %v10708_v9 }
  0xbc   : > { %9064 = vmatpush3.bf16.msra.mxu1 %v1583_v11  ;;  %9065 = vmatprep.mubr.msk.bf16.mxu1 %vm10359_vm0, %v10358_v3  ;;  %v1936_v11 = vsel %vm399_vm1, %v1934_v10, 0  ;;  %v2035_v19 = vpop.permute.xlu1 %2034  ;;  %v11013_v10 = vld [vmem:[%s10486_s9 + $0xc] sm:$0x3] }
  0xbd   : > { %9069 = vmatprep.subr.bf16.mxu1 %v10358_v3  ;;  %v2037_v20 = vsel %vm399_vm1, %v2035_v19, 0  ;;  %v11041_v19 = vld [vmem:[%s10552_s30 + $0xa] sm:$0x3] }
  0xc0   : > { %v2136_v53 = vpop.permute.xlu1 %2135 }
  0xc3   : > { %8970 = vmatmul.mubr.msk.bf16.vlgmr.msra.gmra.mrb[0].mxu0 %vm395_vm2, %v10736_v16 }
  0xc4   : > { %8974 = vmatpush3.bf16.msra.mxu0 %v661_v18  ;;  %8975 = vmatprep.mubr.msk.bf16.mxu0 %vm10359_vm0, %v10358_v3  ;;  %v5152_v18 = vrot.slane %v10902_v17, %v10472_v6  ;;  %v3273_v28 = vpop.permute.xlu1 %3272 }
  0xc5   : > { %8979 = vmatprep.subr.bf16.mxu0 %v10358_v3  ;;  %v3275_v14 = vsel %vm399_vm1, %v3273_v28, 0  ;;  %v2421_v28 = vsel %vm399_vm1, %v10611_v43, 0  ;;  %v3362_v43 = vsel %vm399_vm1, %v10617_v45, 0 }
  0xc6   : > { %5153 = vrot.lane.b32.xlu1 %v5152_v18, %s10360_s10  ;;  %v11024_v18 = vld [vmem:[%s10486_s9 + $0xa] sm:$0x3] }
  0xc7   : > { %9066 = vmatmul.mubr.msk.bf16.vlgmr.msra.gmra.mrb[0].mxu1 %vm395_vm2, %v10736_v16 }
  0xc8   : > { %9070 = vmatpush3.bf16.msra.mxu1 %v1637_v22  ;;  %9071 = vmatprep.mubr.msk.bf16.mxu1 %vm10359_vm0, %v10358_v3  ;;  %v1032_v22 = vsel %vm399_vm1, %v10573_v31, 0  ;;  %v1084_v31 = vpop.permute.xlu0 %1083 }
  0xc9   : > { %9075 = vmatprep.subr.bf16.mxu1 %v10358_v3 }
  0xcf   : > { %8976 = vmatmul.mubr.msk.bf16.vlgmr.msra.gmra.mrb[0].mxu0 %vm395_vm2, %v10756_v25 }
  0xd0   : > { %8980 = vmatpush3.bf16.msra.mxu0 %v711_v26  ;;  %8981 = vmatprep.mubr.msk.bf16.mxu0 %vm10359_vm0, %v10358_v3  ;;  %v1983_v26 = vsel %vm399_vm1, %v10580_v33, 0  ;;  %v1089_v33 = vsel %vm399_vm1, %v1084_v31, 0 }
  0xd1   : > { %8985 = vmatprep.subr.bf16.mxu0 %v10358_v3 }
  0xd3   : > { %9072 = vmatmul.mubr.msk.bf16.vlgmr.msra.gmra.mrb[0].mxu1 %vm395_vm2, %v10756_v25 }
  0xd4   : > { %9076 = vmatpush3.bf16.msra.mxu1 %v1684_v29  ;;  %9077 = vmatprep.mubr.msk.bf16.mxu1 %vm10359_vm0, %v10358_v3  ;;  %v10931_v29 = vld [vmem:[%s12263_s0 + $0x30] sm:$0xf] }
  0xd5   : > { %9081 = vmatprep.subr.bf16.mxu1 %v10358_v3 }
  0xdb   : > { %8982 = vmatmul.mubr.msk.bf16.vlgmr.msra.gmra.mrb[0].mxu0 %vm395_vm2, %v10787_v36 }
  0xdc   : > { %8986 = vmatpush3.bf16.msra.mxu0 %v768_v38  ;;  %8987 = vmatprep.mubr.msk.bf16.mxu0 %vm10359_vm0, %v10358_v3  ;;  %v1139_v38 = vsel %vm399_vm1, %v10587_v35, 0  ;;  %v10968_v35 = vld [vmem:[%s10486_s9 + $0xa] sm:$0x3] }
  0xdd   : > { %8991 = vmatprep.subr.bf16.mxu0 %v10358_v3 }
  0xdf   : > { %9078 = vmatmul.mubr.msk.bf16.vlgmr.msra.gmra.mrb[0].mxu1 %vm395_vm2, %v10787_v36 }
  0xe0   : > { %9082 = vmatpush3.bf16.msra.mxu1 %v1738_v42  ;;  %9083 = vmatprep.mubr.msk.bf16.mxu1 %vm10359_vm0, %v10358_v3  ;;  %v4352_v42 = vrot.slane %v10955_v40, %v10472_v6 }
  0xe1   : > { %9087 = vmatprep.subr.bf16.mxu1 %v10358_v3 }
  0xe2   : > { %4353 = vrot.lane.b32.xlu0 %v4352_v42, %s10360_s10  ;;  %v5694_v42 = vrot.slane %v11041_v19, %v10472_v6 }
  0xe7   : > { %8988 = vmatmul.mubr.msk.bf16.vlgmr.msra.gmra.mrb[0].mxu0 %vm395_vm2, %v10804_v44 }
  0xe8   : > { %8992 = vmatpush3.bf16.msra.mxu0 %v818_v46  ;;  %8993 = vmatprep.mubr.msk.bf16.mxu0 %vm10359_vm0, %v10358_v3  ;;  %v2084_v46 = vsel %vm399_vm1, %v10592_v37, 0  ;;  %v1191_v37 = vpop.permute.xlu0 %1190 }
  0xe9   : > { %8997 = vmatprep.subr.bf16.mxu0 %v10358_v3  ;;  %v1196_v24 = vsel %vm399_vm1, %v1191_v37, 0  ;;  %v11069_v37 = vld [vmem:[%s10533_s17 + $0xc] sm:$0x3] }
  0xeb   : > { %9084 = vmatmul.mubr.msk.bf16.vlgmr.msra.gmra.mrb[0].mxu1 %vm395_vm2, %v10804_v44 }
  0xec   : > { %9088 = vmatpush3.bf16.msra.mxu1 %v1783_v48  ;;  %9089 = vmatprep.mubr.msk.bf16.mxu1 %vm10359_vm0, %v10358_v3  ;;  %v5293_v48 = vrot.slane %v10968_v35, %v10472_v6 }
  0xed   : > { %9093 = vmatprep.subr.bf16.mxu1 %v10358_v3 }
  0xee   : > { %5294 = vrot.lane.b32.xlu1 %v5293_v48, %s10360_s10 }
  0xf3   : > { %8994 = vmatmul.mubr.msk.bf16.vlgmr.msra.gmra.mrb[0].mxu0 %vm395_vm2, %v10835_v54 }
  0xf4   : > { %8998 = vmatpush3.bf16.msra.mxu0 %v875_v55  ;;  %8999 = vmatprep.mubr.msk.bf16.mxu0 %vm10359_vm0, %v10358_v3  ;;  %v2138_v55 = vsel %vm399_vm1, %v2136_v53, 0 }
  0xf5   : > { %9003 = vmatprep.subr.bf16.mxu0 %v10358_v3 }
  0xf7   : > { %9090 = vmatmul.mubr.msk.bf16.vlgmr.msra.gmra.mrb[0].mxu1 %vm395_vm2, %v10835_v54 }
  0xf8   : > { %9094 = vmatpush3.bf16.msra.mxu1 %v1837_v57  ;;  %9095 = vmatprep.mubr.msk.bf16.mxu1 %vm10359_vm0, %v10358_v3  ;;  %v5395_v57 = vrot.slane %v10993_v56, %v10472_v6 }
  0xf9   : > { %9099 = vmatprep.subr.bf16.mxu1 %v10358_v3 }
  0xfa   : > { %5396 = vrot.lane.b32.xlu1 %v5395_v57, %s10360_s10 }
  0xff   : > { %9000 = vmatmul.mubr.msk.bf16.vlgmr.msra.gmra.mrb[0].mxu0 %vm395_vm2, %v10852_v59 }
 0x100   : > { %9004 = vmatpush3.bf16.msra.mxu0 %v925_v60  ;;  %9005 = vmatprep.mubr.msk.bf16.mxu0 %vm10359_vm0, %v10358_v3  ;;  %v2332_v60 = vpop.permute.xlu0 %2331 }
 0x101   : > { %9009 = vmatprep.subr.bf16.mxu0 %v10358_v3  ;;  %v2334_v27 = vsel %vm399_vm1, %v2332_v60, 0  ;;  %v11089_v60 = vld [vmem:[%s10552_s30 + $0xa] sm:$0x3] }
 0x103   : > { %9096 = vmatmul.mubr.msk.bf16.vlgmr.msra.gmra.mrb[0].mxu1 %vm395_vm2, %v10852_v59 }
 0x104   : > { %9100 = vmatpush3.bf16.msra.mxu1 %v1882_v62  ;;  %9101 = vmatprep.mubr.msk.bf16.mxu1 %vm10359_vm0, %v10358_v3  ;;  %v11002_v62 = vld [vmem:[%s12263_s0 + $0x3c] sm:$0xf]  ;;  %v2473_v45 = vpop.permute.xlu0 %2472 }
 0x105   : > { %9105 = vmatprep.subr.bf16.mxu1 %v10358_v3 }
 0x10b   : > { %9006 = vmatmul.mubr.msk.bf16.vlgmr.msra.gmra.mrb[0].mxu0 %vm395_vm2, %v10883_v7 }
 0x10c   : > { %9010 = vmatpush3.bf16.msra.mxu0 %v982_v8  ;;  %9011 = vmatprep.mubr.msk.bf16.mxu0 %vm10359_vm0, %v10358_v3  ;;  %v4454_v8 = vrot.slane %v11006_v5, %v10472_v6 }
 0x10d   : > { %9015 = vmatprep.subr.bf16.mxu0 %v10358_v3 }
 0x10e   : > { %4455 = vrot.lane.b32.xlu0 %v4454_v8, %s10360_s10  ;;  %v4955_v8 = vrot.slane %v11089_v60, %v10472_v6 }
 0x10f   : > { %9102 = vmatmul.mubr.msk.bf16.vlgmr.msra.gmra.mrb[0].mxu1 %vm395_vm2, %v10883_v7 }
 0x110   : > { %9106 = vmatpush3.bf16.msra.mxu1 %v1936_v11  ;;  %9107 = vmatprep.mubr.msk.bf16.mxu1 %vm10359_vm0, %v10358_v3  ;;  %v5496_v11 = vrot.slane %v11013_v10, %v10472_v6 }
 0x111   : > { %9111 = vmatprep.subr.bf16.mxu1 %v10358_v3 }
 0x112   : > { %5497 = vrot.lane.b32.xlu1 %v5496_v11, %s10360_s10  ;;  %v10287_v11 = vld.sshfl [vmem:[%s10486_s9 + $0xe] sm:$0x3 pattern:$0x76325410] }
 0x117   : > { %9012 = vmatmul.mubr.msk.bf16.vlgmr.msra.gmra.mrb[0].mxu0 %vm395_vm2, %v10912_v21 }
 0x118   : > { %9016 = vmatpush3.bf16.msra.mxu0 %v1032_v22  ;;  %9017 = vmatprep.mubr.msk.bf16.mxu0 %vm10359_vm0, %v10358_v3  ;;  %v4555_v22 = vrot.slane %v11024_v18, %v10472_v6 }
 0x119   : > { %9021 = vmatprep.subr.bf16.mxu0 %v10358_v3 }
 0x11a   : > { %4556 = vrot.lane.b32.xlu0 %v4555_v22, %s10360_s10  ;;  %v10289_v22 = vld.sshfl [vmem:[%s10483_s7 + $0x10] sm:$0x3 pattern:$0x76325410] }
 0x11b   : > { %9108 = vmatmul.mubr.msk.bf16.vlgmr.msra.gmra.mrb[0].mxu1 %vm395_vm2, %v10912_v21 }
 0x11c   : > { %9112 = vmatpush3.bf16.msra.mxu1 %v1983_v26  ;;  %9113 = vmatprep.mubr.msk.bf16.mxu1 %vm10359_vm0, %v10358_v3  ;;  %v11031_v26 = vld [vmem:[%s10533_s17 + $0xa] sm:$0x3] }
 0x11d   : > { %9117 = vmatprep.subr.bf16.mxu1 %v10358_v3  ;;  %v5595_v31 = vrot.slane %v11031_v26, %v10472_v6 }
 0x11f   : > { %5596 = vrot.lane.b32.xlu1 %v5595_v31, %s10360_s10  ;;  %v10290_v31 = vld.sshfl [vmem:[%s10483_s7 + $0xe] sm:$0x3 pattern:$0x76325410] }
 0x123   : > { %9018 = vmatmul.mubr.msk.bf16.vlgmr.msra.gmra.mrb[0].mxu0 %vm395_vm2, %v10931_v29  ;;  %5695 = vrot.lane.b32.xlu1 %v5694_v42, %s10360_s10  ;;  %v3414_v42 = vpop.permute.xlu1 %3413 }
 0x124   : > { %9022 = vmatpush3.bf16.msra.mxu0 %v1089_v33  ;;  %9023 = vmatprep.mubr.msk.bf16.mxu0 %vm10359_vm0, %v10358_v3  ;;  %v11038_v33 = vld [vmem:[%s10533_s17 + $0x8] sm:$0x3] }
 0x125   : > { %9027 = vmatprep.subr.bf16.mxu0 %v10358_v3 }
 0x127   : > { %9114 = vmatmul.mubr.msk.bf16.vlgmr.msra.gmra.mrb[0].mxu1 %vm395_vm2, %v10931_v29 }
 0x128   : > { %9118 = vmatpush3.bf16.msra.mxu1 %v2037_v20  ;;  %9119 = vmatprep.mubr.msk.bf16.mxu1 %vm10359_vm0, %v10358_v3  ;;  %v2377_v20 = vsel %vm399_vm1, %v10599_v39, 0  ;;  %v3318_v39 = vsel %vm399_vm1, %v10604_v41, 0  ;;  %v5795_v41 = vrot.slane %v11069_v37, %v10472_v6 }
 0x129   : > { %9123 = vmatprep.subr.bf16.mxu1 %v10358_v3 }
 0x12a   : > { %5796 = vrot.lane.b32.xlu1 %v5795_v41, %s10360_s10  ;;  %v10293_v41 = vld.sshfl [vmem:[%s10533_s17 + $0xe] sm:$0x3 pattern:$0x76325410] }
 0x12f   : > { %9024 = vmatmul.mubr.msk.bf16.vlgmr.msra.gmra.mrb[0].mxu0 %vm395_vm2, %v10948_v34 }
 0x130   : > { %9028 = vmatpush3.bf16.msra.mxu0 %v1139_v38  ;;  %9029 = vmatprep.mubr.msk.bf16.mxu0 %vm10359_vm0, %v10358_v3  ;;  %v4654_v38 = vrot.slane %v11038_v33, %v10472_v6 }
 0x131   : > { %9033 = vmatprep.subr.bf16.mxu0 %v10358_v3 }
 0x132   : > { %4655 = vrot.lane.b32.xlu0 %v4654_v38, %s10360_s10  ;;  %v2475_v38 = vsel %vm399_vm1, %v2473_v45, 0  ;;  %v3516_v45 = vpop.permute.xlu1 %3515 }
 0x133   : > { %9120 = vmatmul.mubr.msk.bf16.vlgmr.msra.gmra.mrb[0].mxu1 %vm395_vm2, %v10948_v34 }
 0x134   : > { %9124 = vmatpush3.bf16.msra.mxu1 %v2084_v46  ;;  %9125 = vmatprep.mubr.msk.bf16.mxu1 %vm10359_vm0, %v10358_v3  ;;  %v11062_v46 = vld [vmem:[%s10552_s30 + $0x8] sm:$0x3] }
 0x135   : > { %9129 = vmatprep.subr.bf16.mxu1 %v10358_v3  ;;  %v4753_v48 = vrot.slane %v11062_v46, %v10472_v6 }
 0x137   : > { %4754 = vrot.lane.b32.xlu0 %v4753_v48, %s10360_s10  ;;  %v10292_v48 = vld.sshfl [vmem:[%s10486_s9 + $0xe] sm:$0x3 pattern:$0x76325410] }
 0x13b   : > { %9030 = vmatmul.mubr.msk.bf16.vlgmr.msra.gmra.mrb[0].mxu0 %vm395_vm2, %v10979_v23 }
 0x13c   : > { %9034 = vmatpush3.bf16.msra.mxu0 %v1196_v24  ;;  %9035 = vmatprep.mubr.msk.bf16.mxu0 %vm10359_vm0, %v10358_v3  ;;  %v11079_v24 = vld [vmem:[%s10533_s17 + $0xa] sm:$0x3] }
 0x13d   : > { %9135 = vmatprep.subr.bf16.mxu0 %v10358_v3  ;;  %v4854_v53 = vrot.slane %v11079_v24, %v10472_v6 }
 0x13f   : > { %9126 = vmatmul.mubr.msk.bf16.vlgmr.msra.gmra.mrb[0].mxu1 %vm395_vm2, %v10979_v23  ;;  %4855 = vrot.lane.b32.xlu0 %v4854_v53, %s10360_s10  ;;  %v10294_v53 = vld.sshfl [vmem:[%s10533_s17 + $0xc] sm:$0x3 pattern:$0x76325410] }
 0x140   : > { %9130 = vmatpush3.bf16.msra.mxu1 %v2138_v55  ;;  %9131 = vmatprep.mubr.msk.bf16.mxu1 %vm10359_vm0, %v10358_v3  ;;  %v11084_v55 = vld [vmem:[%s10552_s30 + $0xc] sm:$0x3] }
 0x141   : > { %9231 = vmatprep.subr.bf16.mxu1 %v10358_v3  ;;  %v5896_v57 = vrot.slane %v11084_v55, %v10472_v6  ;;  %v10286_v6 = vld.sshfl [vmem:[%s10483_s7 + $0xc] sm:$0x3 pattern:$0x76325410] }
 0x143   : > { %5897 = vrot.lane.b32.xlu1 %v5896_v57, %s10360_s10  ;;  %4956 = vrot.lane.b32.xlu0 %v4955_v8, %s10360_s10  ;;  %v10295_v57 = vld.sshfl [vmem:[%s10552_s30 + $0xe] sm:$0x3 pattern:$0x76325410]  ;;  %v3464_v8 = vsel %vm399_vm1, %v10630_v51, 0  ;;  %v2575_v51 = vpop.permute.xlu0 %2574 }
 0x147   : > { %9036 = vmatmul.mubr.msk.bf16.vlgmr.msra.gmra.mrb[0].mxu0 %vm395_vm2, %v11002_v62  ;;  %6093 = vrot.lane.b32.xlu0 %v10286_v6, %s10360_s10  ;;  %v10300_v6 = vld.sshfl [vmem:[%s10552_s30 + $0xe] sm:$0x3 pattern:$0x76325410] }
 0x148   : > { %9136 = vmatpush3.bf16.msra.mxu0 %v2334_v27  ;;  %9137 = vmatprep.mubr.msk.bf16.mxu0 %vm10359_vm0, %v10358_v3  ;;  %v10285_v27 = vld.sshfl [vmem:[%s10483_s7 + $0xe] sm:$0x3 pattern:$0x76325410] }
 0x149   : > { %9141 = vmatprep.subr.bf16.mxu0 %v10358_v3  ;;  %7034 = vrot.lane.b32.xlu1 %v10285_v27, %s10360_s10  ;;  %v10296_v27 = vld.sshfl [vmem:[%s10552_s30 + $0xc] sm:$0x3 pattern:$0x76325410] }
 0x14b   : > { %9132 = vmatmul.mubr.msk.bf16.vlgmr.msra.gmra.mrb[0].mxu1 %vm395_vm2, %v11002_v62 }
 0x14c   : > { %9232 = vmatpush3.bf16.msra.mxu1 %v3275_v14  ;;  %9233 = vmatprep.mubr.msk.bf16.mxu1 %vm10359_vm0, %v10358_v3  ;;  %v10288_v14 = vld.sshfl [vmem:[%s10486_s9 + $0xc] sm:$0x3 pattern:$0x76325410] }
 0x14d   : > { %9237 = vmatprep.subr.bf16.mxu1 %v10358_v3  ;;  %7175 = vrot.lane.b32.xlu1 %v10287_v11, %s10360_s10  ;;  %v2577_v11 = vsel %vm399_vm1, %v2575_v51, 0  ;;  %v10362_v51 = vmov 286326784  }
 0x14e   : > { %6234 = vrot.lane.b32.xlu0 %v10288_v14, %s10360_s10  ;;  %v2624_v14 = vsel %vm399_vm1, %v10674_v61, 0  ;;  %v2676_v61 = vpop.permute.xlu0 %2675 }
 0x14f   : > { %9138 = vmatmul.mubr.msk.bf16.vlgmr.msra.gmra.mrb[4].mxu0 %vm395_vm2, %v10635_v52 }
 0x150   : > { %9142 = vmatpush3.bf16.msra.mxu0 %v2377_v20  ;;  %9143 = vmatprep.mubr.msk.bf16.mxu0 %vm10359_vm0, %v10358_v3  ;;  %v10291_v20 = vld.sshfl [vmem:[%s10486_s9 + $0x10] sm:$0x3 pattern:$0x76325410] }
 0x151   : > { %9147 = vmatprep.subr.bf16.mxu0 %v10358_v3  ;;  %7277 = vrot.lane.b32.xlu1 %v10289_v22, %s10360_s10  ;;  %v3565_v22 = vsel %vm399_vm1, %v10683_v0, 0 }
 0x152   : > { %6336 = vrot.lane.b32.xlu0 %v10290_v31, %s10360_s10  ;;  %v3617_v31 = vpop.permute.xlu1 %3616 }
 0x153   : > { %9234 = vmatmul.mubr.msk.bf16.vlgmr.msra.gmra.mrb[4].mxu1 %vm395_vm2, %v10635_v52  ;;  %v3619_v0 = vsel %vm399_vm1, %v3617_v31, 0 }
 0x154   : > { %9238 = vmatpush3.bf16.msra.mxu1 %v3318_v39  ;;  %9239 = vmatprep.mubr.msk.bf16.mxu1 %vm10359_vm0, %v10358_v3  ;;  %v3416_v39 = vsel %vm399_vm1, %v3414_v42, 0  ;;  %v3763_v42 = vsel %vm399_vm1, %v10777_v32, 0 }
 0x155   : > { %9243 = vmatprep.subr.bf16.mxu1 %v10358_v3  ;;  %7378 = vrot.lane.b32.xlu1 %v10291_v20, %s10360_s10  ;;  %v3664_v20 = vsel %vm399_vm1, %v10731_v15, 0 }
 0x156   : > { %6437 = vrot.lane.b32.xlu0 %v10292_v48, %s10360_s10  ;;  %v3864_v48 = vsel %vm399_vm1, %v10825_v50, 0 }
 0x159   : > { %7477 = vrot.lane.b32.xlu1 %v10293_v41, %s10360_s10 }
 0x15a   : > { %6536 = vrot.lane.b32.xlu0 %v10294_v53, %s10360_s10  ;;  %v3965_v53 = vsel %vm399_vm1, %v10873_v2, 0 }
 0x15b   : > { %9144 = vmatmul.mubr.msk.bf16.vlgmr.msra.gmra.mrb[4].mxu0 %vm395_vm2, %v10660_v58 }
 0x15c   : > { %9148 = vmatpush3.bf16.msra.mxu0 %v2421_v28  ;;  %9149 = vmatprep.mubr.msk.bf16.mxu0 %vm10359_vm0, %v10358_v3  ;;  %v10297_v28 = vld.sshfl [vmem:[%s10533_s17 + $0x10] sm:$0x3 pattern:$0x76325410] }
 0x15d   : > { %9153 = vmatprep.subr.bf16.mxu0 %v10358_v3  ;;  %7576 = vrot.lane.b32.xlu1 %v10295_v57, %s10360_s10 }
 0x15e   : > { %6635 = vrot.lane.b32.xlu0 %v10296_v27, %s10360_s10 }
 0x15f   : > { %9240 = vmatmul.mubr.msk.bf16.vlgmr.msra.gmra.mrb[4].mxu1 %vm395_vm2, %v10660_v58 }
 0x160   : > { %9244 = vmatpush3.bf16.msra.mxu1 %v3362_v43  ;;  %9245 = vmatprep.mubr.msk.bf16.mxu1 %vm10359_vm0, %v10358_v3  ;;  %v10299_v43 = vld.sshfl [vmem:[%s10552_s30 + $0x10] sm:$0x3 pattern:$0x76325410] }
 0x161   : > { %9249 = vmatprep.subr.bf16.mxu1 %v10358_v3  ;;  %7677 = vrot.lane.b32.xlu1 %v10297_v28, %s10360_s10 }
 0x165   : > { %7778 = vrot.lane.b32.xlu1 %v10299_v43, %s10360_s10 }
 0x167   : > { %9150 = vmatmul.mubr.msk.bf16.vlgmr.msra.gmra.mrb[4].mxu0 %vm395_vm2, %v10688_v1 }
 0x168   : > { %9154 = vmatpush3.bf16.msra.mxu0 %v2475_v38  ;;  %9155 = vmatprep.mubr.msk.bf16.mxu0 %vm10359_vm0, %v10358_v3  ;;  %v3716_v38 = vpop.permute.xlu1 %3715 }
 0x169   : > { %9159 = vmatprep.subr.bf16.mxu0 %v10358_v3  ;;  %v3718_v15 = vsel %vm399_vm1, %v3716_v38, 0 }
 0x16b   : > { %9246 = vmatmul.mubr.msk.bf16.vlgmr.msra.gmra.mrb[4].mxu1 %vm395_vm2, %v10688_v1  ;;  %v2523_v1 = vsel %vm399_vm1, %v10623_v47, 0  ;;  %v10298_v47 = vld.sshfl [vmem:[%s10533_s17 + $0xe] sm:$0x3 pattern:$0x76325410] }
 0x16c   : > { %9250 = vmatpush3.bf16.msra.mxu1 %v3416_v39  ;;  %9251 = vmatprep.mubr.msk.bf16.mxu1 %vm10359_vm0, %v10358_v3  ;;  %v3815_v39 = vpop.permute.xlu1 %3814 }
 0x16d   : > { %9255 = vmatprep.subr.bf16.mxu1 %v10358_v3  ;;  %6736 = vrot.lane.b32.xlu0 %v10298_v47, %s10360_s10  ;;  %v3817_v32 = vsel %vm399_vm1, %v3815_v39, 0  ;;  %v4302_v47 = vsel %vm399_vm1, %v10955_v40, 0 }
 0x170   : > { %v3916_v41 = vpop.permute.xlu1 %3915 }
 0x171   : > { %6837 = vrot.lane.b32.xlu0 %v10300_v6, %s10360_s10  ;;  %v3918_v50 = vsel %vm399_vm1, %v3916_v41, 0  ;;  %v5243_v6 = vsel %vm399_vm1, %v10968_v35, 0  ;;  %s304_s10 = sand.u32 1, %s10331_s21  }
 0x172   : > { %s11352_s14 = sshll.u32 %s304_s10, 5 }
 0x173   : > { %9156 = vmatmul.mubr.msk.bf16.vlgmr.msra.gmra.mrb[4].mxu0 %vm395_vm2, %v10708_v9  ;;  %s11376_s21 = scalar_lea.vmem [#allocation2], %s11352_s14 }
 0x174   : > { %9160 = vmatpush3.bf16.msra.mxu0 %v2523_v1  ;;  %9161 = vmatprep.mubr.msk.bf16.mxu0 %vm10359_vm0, %v10358_v3  ;;  %v4017_v57 = vpop.permute.xlu1 %4016 }
 0x175   : > { %9165 = vmatprep.subr.bf16.mxu0 %v10358_v3  ;;  %v4019_v2 = vsel %vm399_vm1, %v4017_v57, 0  ;;  %v1348_v57 = vld [vmem:[%s11376_s21] sm:$0x1] }
 0x177   : > { %9252 = vmatmul.mubr.msk.bf16.vlgmr.msra.gmra.mrb[4].mxu1 %vm395_vm2, %v10708_v9  ;;  %v3518_v9 = vsel %vm399_vm1, %v3516_v45, 0 }
 0x178   : > { %9256 = vmatpush3.bf16.msra.mxu1 %v3464_v8  ;;  %9257 = vmatprep.mubr.msk.bf16.mxu1 %vm10359_vm0, %v10358_v3  ;;  %v5154_v28 = vpop.permute.xlu1 %5153  ;;  %v5199_v8 = vsel %vm399_vm1, %v10902_v17, 0  ;;  %v1282_v17 = vunpack.c.l.s4 %v10362_v51  ;;  %v1360_v51 = vld [vmem:[%s11376_s21 + $0x10] sm:$0x1] }
 0x179   : > { %9261 = vmatprep.subr.bf16.mxu1 %v10358_v3  ;;  %v5156_v1 = vsel %vm399_vm1, %v5154_v28, 0 }
 0x17a   : > { %v1283_v40 = vunpack.c.0.s8 %v1282_v17 }
 0x17f   : > { %9162 = vmatmul.mubr.msk.bf16.vlgmr.msra.gmra.mrb[4].mxu0 %vm395_vm2, %v10736_v16 }
 0x180   : > { %9166 = vmatpush3.bf16.msra.mxu0 %v2577_v11  ;;  %9167 = vmatprep.mubr.msk.bf16.mxu0 %vm10359_vm0, %v10358_v3 }
 0x181   : > { %9171 = vmatprep.subr.bf16.mxu0 %v10358_v3 }
 0x183   : > { %9258 = vmatmul.mubr.msk.bf16.vlgmr.msra.gmra.mrb[4].mxu1 %vm395_vm2, %v10736_v16  ;;  %v2678_v16 = vsel %vm399_vm1, %v2676_v61, 0 }
 0x184   : > { %9262 = vmatpush3.bf16.msra.mxu1 %v3518_v9  ;;  %9263 = vmatprep.mubr.msk.bf16.mxu1 %vm10359_vm0, %v10358_v3 }
 0x185   : > { %9267 = vmatprep.subr.bf16.mxu1 %v10358_v3 }
 0x18b   : > { %9168 = vmatmul.mubr.msk.bf16.vlgmr.msra.gmra.mrb[4].mxu0 %vm395_vm2, %v10756_v25 }
 0x18c   : > { %9172 = vmatpush3.bf16.msra.mxu0 %v2624_v14  ;;  %9173 = vmatprep.mubr.msk.bf16.mxu0 %vm10359_vm0, %v10358_v3 }
 0x18d   : > { %9177 = vmatprep.subr.bf16.mxu0 %v10358_v3 }
 0x18f   : > { %9264 = vmatmul.mubr.msk.bf16.vlgmr.msra.gmra.mrb[4].mxu1 %vm395_vm2, %v10756_v25  ;;  %v2723_v25 = vsel %vm399_vm1, %v10722_v12, 0  ;;  %v2775_v12 = vpop.permute.xlu0 %2774 }
 0x190   : > { %9268 = vmatpush3.bf16.msra.mxu1 %v3565_v22  ;;  %9269 = vmatprep.mubr.msk.bf16.mxu1 %vm10359_vm0, %v10358_v3 }
 0x191   : > { %9273 = vmatprep.subr.bf16.mxu1 %v10358_v3 }
 0x197   : > { %9174 = vmatmul.mubr.msk.bf16.vlgmr.msra.gmra.mrb[4].mxu0 %vm395_vm2, %v10787_v36 }
 0x198   : > { %9178 = vmatpush3.bf16.msra.mxu0 %v2678_v16  ;;  %9179 = vmatprep.mubr.msk.bf16.mxu0 %vm10359_vm0, %v10358_v3 }
 0x199   : > { %9183 = vmatprep.subr.bf16.mxu0 %v10358_v3 }
 0x19b   : > { %9270 = vmatmul.mubr.msk.bf16.vlgmr.msra.gmra.mrb[4].mxu1 %vm395_vm2, %v10787_v36  ;;  %v2777_v36 = vsel %vm399_vm1, %v2775_v12, 0 }
 0x19c   : > { %9274 = vmatpush3.bf16.msra.mxu1 %v3619_v0  ;;  %9275 = vmatprep.mubr.msk.bf16.mxu1 %vm10359_vm0, %v10358_v3 }
 0x19d   : > { %9279 = vmatprep.subr.bf16.mxu1 %v10358_v3 }
 0x1a3   : > { %9180 = vmatmul.mubr.msk.bf16.vlgmr.msra.gmra.mrb[4].mxu0 %vm395_vm2, %v10804_v44 }
 0x1a4   : > { %9184 = vmatpush3.bf16.msra.mxu0 %v2723_v25  ;;  %9185 = vmatprep.mubr.msk.bf16.mxu0 %vm10359_vm0, %v10358_v3 }
 0x1a5   : > { %9189 = vmatprep.subr.bf16.mxu0 %v10358_v3 }
 0x1a7   : > { %9276 = vmatmul.mubr.msk.bf16.vlgmr.msra.gmra.mrb[4].mxu1 %vm395_vm2, %v10804_v44  ;;  %v2822_v44 = vsel %vm399_vm1, %v10770_v30, 0  ;;  %v2874_v30 = vpop.permute.xlu0 %2873 }
 0x1a8   : > { %9280 = vmatpush3.bf16.msra.mxu1 %v3664_v20  ;;  %9281 = vmatprep.mubr.msk.bf16.mxu1 %vm10359_vm0, %v10358_v3 }
 0x1a9   : > { %9285 = vmatprep.subr.bf16.mxu1 %v10358_v3 }
 0x1af   : > { %9186 = vmatmul.mubr.msk.bf16.vlgmr.msra.gmra.mrb[4].mxu0 %vm395_vm2, %v10835_v54 }
 0x1b0   : > { %9190 = vmatpush3.bf16.msra.mxu0 %v2777_v36  ;;  %9191 = vmatprep.mubr.msk.bf16.mxu0 %vm10359_vm0, %v10358_v3 }
 0x1b1   : > { %9195 = vmatprep.subr.bf16.mxu0 %v10358_v3 }
 0x1b3   : > { %9282 = vmatmul.mubr.msk.bf16.vlgmr.msra.gmra.mrb[4].mxu1 %vm395_vm2, %v10835_v54  ;;  %v2876_v54 = vsel %vm399_vm1, %v2874_v30, 0 }
 0x1b4   : > { %9286 = vmatpush3.bf16.msra.mxu1 %v3718_v15  ;;  %9287 = vmatprep.mubr.msk.bf16.mxu1 %vm10359_vm0, %v10358_v3 }
 0x1b5   : > { %9291 = vmatprep.subr.bf16.mxu1 %v10358_v3 }
 0x1bb   : > { %9192 = vmatmul.mubr.msk.bf16.vlgmr.msra.gmra.mrb[4].mxu0 %vm395_vm2, %v10852_v59 }
 0x1bc   : > { %9196 = vmatpush3.bf16.msra.mxu0 %v2822_v44  ;;  %9197 = vmatprep.mubr.msk.bf16.mxu0 %vm10359_vm0, %v10358_v3  ;;  %v5295_v44 = vpop.permute.xlu1 %5294 }
 0x1bd   : > { %9201 = vmatprep.subr.bf16.mxu0 %v10358_v3  ;;  %v5297_v41 = vsel %vm399_vm1, %v5295_v44, 0 }
 0x1bf   : > { %9288 = vmatmul.mubr.msk.bf16.vlgmr.msra.gmra.mrb[4].mxu1 %vm395_vm2, %v10852_v59  ;;  %v2923_v59 = vsel %vm399_vm1, %v10818_v49, 0  ;;  %v2975_v49 = vpop.permute.xlu0 %2974 }
 0x1c0   : > { %9292 = vmatpush3.bf16.msra.mxu1 %v3763_v42  ;;  %9293 = vmatprep.mubr.msk.bf16.mxu1 %vm10359_vm0, %v10358_v3 }
 0x1c1   : > { %9297 = vmatprep.subr.bf16.mxu1 %v10358_v3 }
 0x1c7   : > { %9198 = vmatmul.mubr.msk.bf16.vlgmr.msra.gmra.mrb[4].mxu0 %vm395_vm2, %v10883_v7 }
 0x1c8   : > { %9202 = vmatpush3.bf16.msra.mxu0 %v2876_v54  ;;  %9203 = vmatprep.mubr.msk.bf16.mxu0 %vm10359_vm0, %v10358_v3 }
 0x1c9   : > { %9207 = vmatprep.subr.bf16.mxu0 %v10358_v3 }
 0x1cb   : > { %9294 = vmatmul.mubr.msk.bf16.vlgmr.msra.gmra.mrb[4].mxu1 %vm395_vm2, %v10883_v7  ;;  %v2977_v7 = vsel %vm399_vm1, %v2975_v49, 0 }
 0x1cc   : > { %9298 = vmatpush3.bf16.msra.mxu1 %v3817_v32  ;;  %9299 = vmatprep.mubr.msk.bf16.mxu1 %vm10359_vm0, %v10358_v3 }
 0x1cd   : > { %9303 = vmatprep.subr.bf16.mxu1 %v10358_v3 }
 0x1d3   : > { %9204 = vmatmul.mubr.msk.bf16.vlgmr.msra.gmra.mrb[4].mxu0 %vm395_vm2, %v10912_v21 }
 0x1d4   : > { %9208 = vmatpush3.bf16.msra.mxu0 %v2923_v59  ;;  %9209 = vmatprep.mubr.msk.bf16.mxu0 %vm10359_vm0, %v10358_v3 }
 0x1d5   : > { %9213 = vmatprep.subr.bf16.mxu0 %v10358_v3 }
 0x1d7   : > { %9300 = vmatmul.mubr.msk.bf16.vlgmr.msra.gmra.mrb[4].mxu1 %vm395_vm2, %v10912_v21  ;;  %v3024_v21 = vsel %vm399_vm1, %v10866_v63, 0  ;;  %v3076_v63 = vpop.permute.xlu0 %3075 }
 0x1d8   : > { %9304 = vmatpush3.bf16.msra.mxu1 %v3864_v48  ;;  %9305 = vmatprep.mubr.msk.bf16.mxu1 %vm10359_vm0, %v10358_v3 }
 0x1d9   : > { %9309 = vmatprep.subr.bf16.mxu1 %v10358_v3 }
 0x1df   : > { %9210 = vmatmul.mubr.msk.bf16.vlgmr.msra.gmra.mrb[4].mxu0 %vm395_vm2, %v10931_v29 }
 0x1e0   : > { %9214 = vmatpush3.bf16.msra.mxu0 %v2977_v7  ;;  %9215 = vmatprep.mubr.msk.bf16.mxu0 %vm10359_vm0, %v10358_v3 }
 0x1e1   : > { %9219 = vmatprep.subr.bf16.mxu0 %v10358_v3 }
 0x1e3   : > { %9306 = vmatmul.mubr.msk.bf16.vlgmr.msra.gmra.mrb[4].mxu1 %vm395_vm2, %v10931_v29  ;;  %v3078_v29 = vsel %vm399_vm1, %v3076_v63, 0 }
 0x1e4   : > { %9310 = vmatpush3.bf16.msra.mxu1 %v3918_v50  ;;  %9311 = vmatprep.mubr.msk.bf16.mxu1 %vm10359_vm0, %v10358_v3 }
 0x1e5   : > { %9315 = vmatprep.subr.bf16.mxu1 %v10358_v3 }
 0x1eb   : > { %9216 = vmatmul.mubr.msk.bf16.vlgmr.msra.gmra.mrb[4].mxu0 %vm395_vm2, %v10948_v34 }
 0x1ec   : > { %9220 = vmatpush3.bf16.msra.mxu0 %v3024_v21  ;;  %9221 = vmatprep.mubr.msk.bf16.mxu0 %vm10359_vm0, %v10358_v3 }
 0x1ed   : > { %9225 = vmatprep.subr.bf16.mxu0 %v10358_v3 }
 0x1ef   : > { %9312 = vmatmul.mubr.msk.bf16.vlgmr.msra.gmra.mrb[4].mxu1 %vm395_vm2, %v10948_v34  ;;  %v4213_v34 = vpop.permute.xlu0 %4212 }
 0x1f0   : > { %9316 = vmatpush3.bf16.msra.mxu1 %v3965_v53  ;;  %9317 = vmatprep.mubr.msk.bf16.mxu1 %vm10359_vm0, %v10358_v3  ;;  %v4215_v27 = vsel %vm399_vm1, %v4213_v34, 0 }
 0x1f1   : > { %9321 = vmatprep.subr.bf16.mxu1 %v10358_v3 }
 0x1f3   : > { %v4354_v0 = vpop.permute.xlu0 %4353 }
 0x1f4   : > { %v4356_v30 = vsel %vm399_vm1, %v4354_v0, 0 }
 0x1f7   : > { %9222 = vmatmul.mubr.msk.bf16.vlgmr.msra.gmra.mrb[4].mxu0 %vm395_vm2, %v10979_v23 }
 0x1f8   : > { %9226 = vmatpush3.bf16.msra.mxu0 %v3078_v29  ;;  %9227 = vmatprep.mubr.msk.bf16.mxu0 %vm10359_vm0, %v10358_v3 }
 0x1f9   : > { %9327 = vmatprep.subr.bf16.mxu0 %v10358_v3 }
 0x1fb   : > { %9318 = vmatmul.mubr.msk.bf16.vlgmr.msra.gmra.mrb[4].mxu1 %vm395_vm2, %v10979_v23  ;;  %v4258_v23 = vsel %vm399_vm1, %v10895_v13, 0  ;;  %v10361_v13 = vmov 1966171168  }
 0x1fc   : > { %9322 = vmatpush3.bf16.msra.mxu1 %v4019_v2  ;;  %9323 = vmatprep.mubr.msk.bf16.mxu1 %vm10359_vm0, %v10358_v3  ;;  %v11382_v2 = vld [vmem:[%s12263_s0 + $0x4] sm:$0xf] }
 0x1fd   : > { %9423 = vmatprep.subr.bf16.mxu1 %v10358_v3 }
 0x203   : > { %9228 = vmatmul.mubr.msk.bf16.vlgmr.msra.gmra.mrb[4].mxu0 %vm395_vm2, %v11002_v62 }
 0x204   : > { %9328 = vmatpush3.bf16.msra.mxu0 %v4215_v27  ;;  %9329 = vmatprep.mubr.msk.bf16.mxu0 %vm10359_vm0, %v10358_v3 }
 0x205   : > { %9333 = vmatprep.subr.bf16.mxu0 %v10358_v3 }
 0x207   : > { %9324 = vmatmul.mubr.msk.bf16.vlgmr.msra.gmra.mrb[4].mxu1 %vm395_vm2, %v11002_v62  ;;  %v1242_v62 = vunpack.c.l.s4 %v10361_v13 }
 0x208   : > { %9424 = vmatpush3.bf16.msra.mxu1 %v5156_v1  ;;  %9425 = vmatprep.mubr.msk.bf16.mxu1 %vm10359_vm0, %v10358_v3 }
 0x209   : > { %9429 = vmatprep.subr.bf16.mxu1 %v10358_v3  ;;  %v1243_v43 = vunpack.c.0.s8 %v1242_v62 }
 0x20b   : > { %9330 = vmatmul.mubr.msk.bf16.vlgmr.msra.gmra.mrb[8].mxu0 %vm395_vm2, %v10635_v52 }
 0x20c   : > { %9334 = vmatpush3.bf16.msra.mxu0 %v4258_v23  ;;  %9335 = vmatprep.mubr.msk.bf16.mxu0 %vm10359_vm0, %v10358_v3 }
 0x20d   : > { %9339 = vmatprep.subr.bf16.mxu0 %v10358_v3 }
 0x20f   : > { %9426 = vmatmul.mubr.msk.bf16.vlgmr.msra.gmra.mrb[8].mxu1 %vm395_vm2, %v10635_v52  ;;  %v11343_v52 = vsub.s32 %v1243_v43, %v10460_v4  ;;  %v1354_v43 = vld [vmem:[%s11376_s21 + $0x8] sm:$0x1] }
 0x210   : > { %9430 = vmatpush3.bf16.msra.mxu1 %v5199_v8  ;;  %9431 = vmatprep.mubr.msk.bf16.mxu1 %vm10359_vm0, %v10358_v3 }
 0x211   : > { %9435 = vmatprep.subr.bf16.mxu1 %v10358_v3 }
 0x217   : > { %9336 = vmatmul.mubr.msk.bf16.vlgmr.msra.gmra.mrb[8].mxu0 %vm395_vm2, %v10660_v58 }
 0x218   : > { %9340 = vmatpush3.bf16.msra.mxu0 %v4302_v47  ;;  %9341 = vmatprep.mubr.msk.bf16.mxu0 %vm10359_vm0, %v10358_v3  ;;  %v1351_v47 = vld [vmem:[%s11376_s21 + $0x4] sm:$0x1] }
 0x219   : > { %9345 = vmatprep.subr.bf16.mxu0 %v10358_v3 }
 0x21a   : > { %v1232_v11 = vpop.f32.mrb[0].mxu0 }
 0x21b   : > { %v1239_v45 = vpack.c.bf16 %v1232_v11, %v1232_v11  ;;  %v9037_v9 = vpop.f32.mrb[1].mxu0  ;;  %9432 = vmatmul.mubr.msk.bf16.vlgmr.msra.gmra.mrb[8].mxu1 %vm395_vm2, %v10660_v58  ;;  %v1373_v14 = vsel %vm1372_vm3, %v1232_v11, 0.0  ;;  %v1377_v22 = vmul.f32 %v1232_v11, %v1232_v11  ;;  %v11360_v58 = vsub.s32 %v1283_v40, %v10460_v4 }
 0x21c   : > { %9436 = vmatpush3.bf16.msra.mxu1 %v5243_v6  ;;  %1374 = vadd.xlane.f32.xlu0 %v1373_v14  ;;  %v1235_v61 = vpop.f32.mrb[2].mxu0  ;;  %v1363_v9 = vld [vmem:[%s11376_s21 + $0x14] sm:$0x1]  ;;  %v1366_v14 = vld [vmem:[%s11376_s21 + $0x18] sm:$0x1] }
 0x21d   : > { %v1247_v35 = vrot.slane %v1239_v45, %v11343_v52  ;;  %v9038_v16 = vpop.f32.mrb[3].mxu0  ;;  %v1378_v31 = vsel %vm1372_vm3, %v1377_v22, 0.0  ;;  %9437 = vmatprep.mubr.msk.bf16.mxu1 %vm10359_vm0, %v10358_v3  ;;  %9441 = vmatprep.subr.bf16.mxu1 %v10358_v3  ;;  %v1357_v45 = vld [vmem:[%s11376_s21 + $0xc] sm:$0x1] }
 0x21e   : > { %v2174_v25 = vpop.f32.mrb[0].mxu1  ;;  %1379 = vadd.xlane.f32.xlu1 %v1378_v31 }
 0x21f   : > { %v1248_v20 = vcombine.high %v1247_v35, %v1247_v35  ;;  %v1255_v12 = vrot.slane %v1247_v35, %v11343_v52  ;;  %v2181_v36 = vpack.c.bf16 %v2174_v25, %v2174_v25  ;;  %v9133_v38 = vpop.f32.mrb[1].mxu1  ;;  %v2313_v15 = vsel %vm1372_vm3, %v2174_v25, 0.0 }
 0x220   : > { %v2177_v42 = vpop.f32.mrb[2].mxu1  ;;  %2314 = vadd.xlane.f32.xlu0 %v2313_v15  ;;  %v2317_v54 = vmul.f32 %v2174_v25, %v2174_v25 }
 0x221   : > { %v1262_v4 = vrot.slane %v1248_v20, %v11343_v52  ;;  %v1263_v39 = vcombine.high %v1255_v12, %v1255_v12  ;;  %v1266_v32 = vunpack.i.h.s16 %v1255_v12  ;;  %v8390_v59 = vpack.i.b16 %v1255_v12, %v1255_v12  ;;  %v9134_v48 = vpop.f32.mrb[3].mxu1  ;;  %v1369_v20 = vld [vmem:[%s11376_s21 + $0x1c] sm:$0x1] }
 0x222   : > { %v2189_v49 = vrot.slane %v2181_v36, %v11343_v52  ;;  %v2318_v7 = vsel %vm1372_vm3, %v2317_v54, 0.0 }
 0x223   : > { %v1264_v50 = vcombine.high %v1262_v4, %v1262_v4  ;;  %v1268_v21 = vunpack.i.h.s16 %v1262_v4  ;;  %v1270_v53 = vunpack.i.h.s16 %v1263_v39  ;;  %v1274_v63 = vpack.i.b16 %v1266_v32, %v1266_v32  ;;  %9342 = vmatmul.mubr.msk.bf16.vlgmr.msra.gmra.mrb[8].mxu0 %vm395_vm2, %v11382_v2 }
 0x224   : > { %v8391_v34 = vpack.i.b16 %v1262_v4, %v1262_v4  ;;  %v8392_v27 = vpack.i.b16 %v1263_v39, %v1263_v39  ;;  %v1287_v28 = vrot.slane %v8390_v59, %v11360_v58  ;;  %v2190_v1 = vcombine.high %v2189_v49, %v2189_v49  ;;  %2319 = vadd.xlane.f32.xlu0 %v2318_v7 }
 0x225   : > { %v1272_v23 = vunpack.i.h.s16 %v1264_v50  ;;  %v1276_v8 = vpack.i.b16 %v1268_v21, %v1268_v21  ;;  %v1278_v13 = vpack.i.b16 %v1270_v53, %v1270_v53  ;;  %v8393_v62 = vpack.i.b16 %v1264_v50, %v1264_v50  ;;  %9346 = vmatpush3.bf16.msra.mxu0 %v4356_v30  ;;  %9347 = vmatprep.mubr.msk.bf16.mxu0 %vm10359_vm0, %v10358_v3 }
 0x226   : > { %v1294_v17 = vrot.slane %v1274_v63, %v11360_v58  ;;  %v1301_v6 = vrot.slane %v8391_v34, %v11360_v58  ;;  %v1315_v40 = vrot.slane %v8392_v27, %v11360_v58  ;;  %v1349_v11 = vsel %vm11371_vm7, %v1287_v28, %v1348_v57  ;;  %9351 = vmatprep.subr.bf16.mxu0 %v10358_v3 }
 0x227   : > { %v1280_v22 = vpack.i.b16 %v1272_v23, %v1272_v23  ;;  %v1308_v61 = vrot.slane %v1276_v8, %v11360_v58  ;;  %v1322_v35 = vrot.slane %v1278_v13, %v11360_v58  ;;  %v1329_v16 = vrot.slane %v8393_v62, %v11360_v58  ;;  %1350 = vst [vmem:[%s11376_s21] sm:$0x1] %v1349_v11 }
 0x228   : > { %9438 = vmatmul.mubr.msk.bf16.vlgmr.msra.gmra.mrb[8].mxu1 %vm395_vm2, %v11382_v2  ;;  %v1352_v31 = vsel %vm11371_vm7, %v1294_v17, %v1351_v47  ;;  %v1355_v0 = vsel %vm11371_vm7, %v1301_v6, %v1354_v43  ;;  %v1361_v25 = vsel %vm11371_vm7, %v1315_v40, %v1360_v51  ;;  %v2197_v12 = vrot.slane %v2189_v49, %v11343_v52 }
 0x229   : > { %9442 = vmatpush3.bf16.msra.mxu1 %v5297_v41  ;;  %v1336_v36 = vrot.slane %v1280_v22, %v11360_v58  ;;  %1353 = vst [vmem:[%s11376_s21 + $0x4] sm:$0x1] %v1352_v31  ;;  %1356 = vst [vmem:[%s11376_s21 + $0x8] sm:$0x1] %v1355_v0  ;;  %v1358_v38 = vsel %vm11371_vm7, %v1308_v61, %v1357_v45  ;;  %v1364_v15 = vsel %vm11371_vm7, %v1322_v35, %v1363_v9  ;;  %v11576_v41 = vld [vmem:[%s12263_s0 + $0x10] sm:$0xf] }
 0x22a   : > { %1362 = vst [vmem:[%s11376_s21 + $0x10] sm:$0x1] %v1361_v25  ;;  %v1367_v44 = vsel %vm11371_vm7, %v1329_v16, %v1366_v14  ;;  %9443 = vmatprep.mubr.msk.bf16.mxu1 %vm10359_vm0, %v10358_v3  ;;  %1359 = vst [vmem:[%s11376_s21 + $0xc] sm:$0x1] %v1358_v38  ;;  %v2204_v42 = vrot.slane %v2190_v1, %v11343_v52  ;;  %v2205_v30 = vcombine.high %v2197_v12, %v2197_v12  ;;  %v11504_v38 = vld [vmem:[%s12263_s0 + $0x20] sm:$0xf] }
 0x22b   : > { %1365 = vst [vmem:[%s11376_s21 + $0x14] sm:$0x1] %v1364_v15  ;;  %1368 = vst [vmem:[%s11376_s21 + $0x18] sm:$0x1] %v1367_v44  ;;  %v2208_v54 = vunpack.i.h.s16 %v2197_v12  ;;  %v8426_v4 = vpack.i.b16 %v2197_v12, %v2197_v12  ;;  %9447 = vmatprep.subr.bf16.mxu1 %v10358_v3  ;;  %v1370_v39 = vsel %vm11371_vm7, %v1336_v36, %v1369_v20  ;;  %v4404_v32 = vsel %vm399_vm1, %v11006_v5, 0  ;;  %v4456_v20 = vpop.permute.xlu0 %4455  ;;  %v5397_v36 = vpop.permute.xlu1 %5396 }
 0x22c   : > { %1371 = vst [vmem:[%s11376_s21 + $0x1c] sm:$0x1] %v1370_v39  ;;  %v2206_v59 = vcombine.high %v2204_v42, %v2204_v42  ;;  %v2210_v48 = vunpack.i.h.s16 %v2204_v42  ;;  %v2212_v49 = vunpack.i.h.s16 %v2205_v30  ;;  %v8427_v50 = vpack.i.b16 %v2204_v42, %v2204_v42  ;;  %v11522_v42 = vld [vmem:[%s12263_s0 + $0x28] sm:$0xf]  ;;  %v11540_v39 = vld [vmem:[%s12263_s0 + $0x24] sm:$0xf]  ;;  %vm12128_vm7 = vmand %vm6989_vm4, %vm6990_vm5 }
 0x22d   : > { %v2216_v7 = vpack.i.b16 %v2208_v54, %v2208_v54  ;;  %v8428_v21 = vpack.i.b16 %v2205_v30, %v2205_v30  ;;  %v2229_v53 = vrot.slane %v8426_v4, %v11360_v58  ;;  %v5345_v63 = vsel %vm399_vm1, %v10993_v56, 0  ;;  %v11455_v56 = vld [vmem:[%s12263_s0 + $0xc] sm:$0xf] }
 0x22e   : > { %v2214_v5 = vunpack.i.h.s16 %v2206_v59  ;;  %v2218_v29 = vpack.i.b16 %v2210_v48, %v2210_v48  ;;  %v2220_v57 = vpack.i.b16 %v2212_v49, %v2212_v49  ;;  %v8429_v34 = vpack.i.b16 %v2206_v59, %v2206_v59  ;;  %v2289_v27 = vld [vmem:[%s11376_s21] sm:$0x1]  ;;  %v11558_v59 = vld [vmem:[%s12263_s0 + $0x2c] sm:$0xf] }
 0x22f   : > { %v2236_v28 = vrot.slane %v2216_v7, %v11360_v58  ;;  %v2243_v1 = vrot.slane %v8427_v50, %v11360_v58  ;;  %v2257_v23 = vrot.slane %v8428_v21, %v11360_v58  ;;  %v2290_v8 = vsel %vm11439_vm8, %v2229_v53, %v2289_v27  ;;  %9348 = vmatmul.mubr.msk.bf16.vlgmr.msra.gmra.mrb[8].mxu0 %vm395_vm2, %v11455_v56  ;;  %v5498_v4 = vpop.permute.xlu1 %5497  ;;  %v11594_v21 = vld [vmem:[%s12263_s0 + $0x18] sm:$0xf] }
 0x230   : > { %v2222_v13 = vpack.i.b16 %v2214_v5, %v2214_v5  ;;  %v2250_v62 = vrot.slane %v2218_v29, %v11360_v58  ;;  %v2264_v47 = vrot.slane %v2220_v57, %v11360_v58  ;;  %v2271_v43 = vrot.slane %v8429_v34, %v11360_v58  ;;  %2291 = vst [vmem:[%s11376_s21] sm:$0x1] %v2290_v8  ;;  %v2292_v51 = vld [vmem:[%s11376_s21 + $0x4] sm:$0x1]  ;;  %v2295_v17 = vld [vmem:[%s11376_s21 + $0x8] sm:$0x1] }
 0x231   : > { %v2301_v6 = vld [vmem:[%s11376_s21 + $0x10] sm:$0x1]  ;;  %9352 = vmatpush3.bf16.msra.mxu0 %v4404_v32  ;;  %v2293_v40 = vsel %vm11439_vm8, %v2236_v28, %v2292_v51  ;;  %v2296_v11 = vsel %vm11439_vm8, %v2243_v1, %v2295_v17  ;;  %v2298_v45 = vld [vmem:[%s11376_s21 + $0xc] sm:$0x1]  ;;  %9353 = vmatprep.mubr.msk.bf16.mxu0 %vm10359_vm0, %v10358_v3  ;;  %v4458_v12 = vsel %vm399_vm1, %v4456_v20, 0  ;;  %v5399_v15 = vsel %vm399_vm1, %v5397_v36, 0 }
 0x232   : > { %v2302_v9 = vsel %vm11439_vm8, %v2257_v23, %v2301_v6  ;;  %v2304_v14 = vld [vmem:[%s11376_s21 + $0x14] sm:$0x1]  ;;  %v2307_v22 = vld [vmem:[%s11376_s21 + $0x18] sm:$0x1]  ;;  %9357 = vmatprep.subr.bf16.mxu0 %v10358_v3  ;;  %v2278_v61 = vrot.slane %v2222_v13, %v11360_v58  ;;  %2294 = vst [vmem:[%s11376_s21 + $0x4] sm:$0x1] %v2293_v40  ;;  %v2299_v35 = vsel %vm11439_vm8, %v2250_v62, %v2298_v45 }
 0x233   : > { %2297 = vst [vmem:[%s11376_s21 + $0x8] sm:$0x1] %v2296_v11  ;;  %2303 = vst [vmem:[%s11376_s21 + $0x10] sm:$0x1] %v2302_v9  ;;  %v2305_v16 = vsel %vm11439_vm8, %v2264_v47, %v2304_v14  ;;  %v2308_v31 = vsel %vm11439_vm8, %v2271_v43, %v2307_v22  ;;  %v2310_v0 = vld [vmem:[%s11376_s21 + $0x1c] sm:$0x1]  ;;  %v5597_v7 = vpop.permute.xlu1 %5596 }
 0x234   : > { %2300 = vst [vmem:[%s11376_s21 + $0xc] sm:$0x1] %v2299_v35  ;;  %2306 = vst [vmem:[%s11376_s21 + $0x14] sm:$0x1] %v2305_v16  ;;  %9444 = vmatmul.mubr.msk.bf16.vlgmr.msra.gmra.mrb[8].mxu1 %vm395_vm2, %v11455_v56  ;;  %v2311_v25 = vsel %vm11439_vm8, %v2278_v61, %v2310_v0  ;;  %v4505_v44 = vsel %vm399_vm1, %v11024_v18, 0  ;;  %v5446_v30 = vsel %vm399_vm1, %v11013_v10, 0  ;;  %v4557_v18 = vpop.permute.xlu0 %4556 }
 0x235   : > { %2309 = vst [vmem:[%s11376_s21 + $0x18] sm:$0x1] %v2308_v31  ;;  %9448 = vmatpush3.bf16.msra.mxu1 %v5345_v63  ;;  %9449 = vmatprep.mubr.msk.bf16.mxu1 %vm10359_vm0, %v10358_v3  ;;  %2312 = vst [vmem:[%s11376_s21 + $0x1c] sm:$0x1] %v2311_v25  ;;  %v4559_v54 = vsel %vm399_vm1, %v4557_v18, 0  ;;  %v5500_v10 = vsel %vm399_vm1, %v5498_v4, 0 }
 0x236   : > { %9453 = vmatprep.subr.bf16.mxu1 %v10358_v3  ;;  %v4604_v32 = vsel %vm399_vm1, %v11038_v33, 0  ;;  %v5545_v48 = vsel %vm399_vm1, %v11031_v26, 0  ;;  %v5599_v26 = vsel %vm399_vm1, %v5597_v7, 0  ;;  %v4703_v50 = vsel %vm399_vm1, %v11062_v46, 0  ;;  %v11612_v5 = vld [vmem:[%s12263_s0 + $0x14] sm:$0xf] }
 0x237   : > { %v5644_v53 = vsel %vm399_vm1, %v11041_v19, 0  ;;  %v5696_v19 = vpop.permute.xlu1 %5695  ;;  %v4804_v57 = vsel %vm399_vm1, %v11079_v24, 0  ;;  %v11630_v34 = vld [vmem:[%s12263_s0 + $0x1c] sm:$0xf]  ;;  %v5745_v27 = vsel %vm399_vm1, %v11069_v37, 0  ;;  %v4905_v8 = vsel %vm399_vm1, %v11089_v60, 0 }
 0x238   : > { %v4656_v33 = vpop.permute.xlu0 %4655  ;;  %v5698_v29 = vsel %vm399_vm1, %v5696_v19, 0  ;;  %v11648_v1 = vld [vmem:[%s12263_s0 + $0x30] sm:$0xf]  ;;  %v11666_v13 = vld [vmem:[%s12263_s0 + $0x38] sm:$0xf]  ;;  %v5846_v62 = vsel %vm399_vm1, %v11084_v55, 0 }
 0x239   : > { %v4658_v49 = vsel %vm399_vm1, %v4656_v33, 0  ;;  %v11684_v43 = vld [vmem:[%s12263_s0 + $0x34] sm:$0xf]  ;;  %v11701_v40 = vld [vmem:[%s12263_s0 + $0x3c] sm:$0xf]  ;;  %vm7965_vm8 = vcmask 7168  }
 0x23a   : > { %v10267_v9 = vld [vmem:[%s10483_s7 + $0xc] sm:$0x3]  ;;  %v10268_v22 = vld [vmem:[%s12263_s0 + $0x8] sm:$0xf]  ;;  %v10269_v61 = vld [vmem:[%s10483_s7 + $0xe] sm:$0x3] }
 0x23b   : > { %9354 = vmatmul.mubr.msk.bf16.vlgmr.msra.gmra.mrb[8].mxu0 %vm395_vm2, %v11504_v38  ;;  %v5797_v37 = vpop.permute.xlu1 %5796  ;;  %v6139_v14 = vsel %vm399_vm1, %v10267_v9, 0  ;;  %v7080_v35 = vsel %vm399_vm1, %v10269_v61, 0  ;;  %v10270_v16 = vld [vmem:[%s10486_s9 + $0xc] sm:$0x3]  ;;  %v10271_v0 = vld [vmem:[%s12263_s0] sm:$0xf] }
 0x23c   : > { %9358 = vmatpush3.bf16.msra.mxu0 %v4458_v12  ;;  %9359 = vmatprep.mubr.msk.bf16.mxu0 %vm10359_vm0, %v10358_v3  ;;  %v4755_v46 = vpop.permute.xlu0 %4754  ;;  %v5799_v23 = vsel %vm399_vm1, %v5797_v37, 0  ;;  %v6183_v31 = vsel %vm399_vm1, %v10270_v16, 0  ;;  %v10272_v25 = vld [vmem:[%s10486_s9 + $0xe] sm:$0x3]  ;;  %v3233_v16 = vld [vmem:[%s11376_s21 + $0x4] sm:$0x2] }
 0x23d   : > { %9363 = vmatprep.subr.bf16.mxu0 %v10358_v3  ;;  %v4757_v63 = vsel %vm399_vm1, %v4755_v46, 0  ;;  %v7124_v20 = vsel %vm399_vm1, %v10272_v25, 0 }
 0x23f   : > { %v5898_v55 = vpop.permute.xlu1 %5897 }
 0x240   : > { %9450 = vmatmul.mubr.msk.bf16.vlgmr.msra.gmra.mrb[8].mxu1 %vm395_vm2, %v11504_v38  ;;  %v4856_v24 = vpop.permute.xlu0 %4855  ;;  %v5900_v51 = vsel %vm399_vm1, %v5898_v55, 0 }
 0x241   : > { %9454 = vmatpush3.bf16.msra.mxu1 %v5399_v15  ;;  %9455 = vmatprep.mubr.msk.bf16.mxu1 %vm10359_vm0, %v10358_v3  ;;  %v4858_v28 = vsel %vm399_vm1, %v4856_v24, 0 }
 0x242   : > { %9459 = vmatprep.subr.bf16.mxu1 %v10358_v3 }
 0x243   : > { %v7035_v11 = vpop.permute.xlu1 %7034 }
 0x244   : > { %v4957_v60 = vpop.permute.xlu0 %4956  ;;  %v7037_v45 = vsel %vm399_vm1, %v7035_v11, 0 }
 0x245   : > { %v4959_v47 = vsel %vm399_vm1, %v4957_v60, 0 }
 0x247   : > { %9360 = vmatmul.mubr.msk.bf16.vlgmr.msra.gmra.mrb[8].mxu0 %vm395_vm2, %v11522_v42  ;;  %v7176_v19 = vpop.permute.xlu1 %7175 }
 0x248   : > { %9364 = vmatpush3.bf16.msra.mxu0 %v4505_v44  ;;  %9365 = vmatprep.mubr.msk.bf16.mxu0 %vm10359_vm0, %v10358_v3  ;;  %v6094_v17 = vpop.permute.xlu0 %6093  ;;  %v7178_v37 = vsel %vm399_vm1, %v7176_v19, 0 }
 0x249   : > { %9369 = vmatprep.subr.bf16.mxu0 %v10358_v3  ;;  %v6096_v6 = vsel %vm399_vm1, %v6094_v17, 0  ;;  %v3230_v17 = vld [vmem:[%s11376_s21] sm:$0x2] }
 0x24c   : > { %9456 = vmatmul.mubr.msk.bf16.vlgmr.msra.gmra.mrb[8].mxu1 %vm395_vm2, %v11522_v42 }
 0x24d   : > { %9460 = vmatpush3.bf16.msra.mxu1 %v5446_v30  ;;  %9461 = vmatprep.mubr.msk.bf16.mxu1 %vm10359_vm0, %v10358_v3 }
 0x24e   : > { %9465 = vmatprep.subr.bf16.mxu1 %v10358_v3 }
 0x253   : > { %9366 = vmatmul.mubr.msk.bf16.vlgmr.msra.gmra.mrb[8].mxu0 %vm395_vm2, %v11540_v39 }
 0x254   : > { %9370 = vmatpush3.bf16.msra.mxu0 %v4559_v54  ;;  %9371 = vmatprep.mubr.msk.bf16.mxu0 %vm10359_vm0, %v10358_v3 }
 0x255   : > { %9375 = vmatprep.subr.bf16.mxu0 %v10358_v3 }
 0x258   : > { %9462 = vmatmul.mubr.msk.bf16.vlgmr.msra.gmra.mrb[8].mxu1 %vm395_vm2, %v11540_v39 }
 0x259   : > { %9466 = vmatpush3.bf16.msra.mxu1 %v5500_v10  ;;  %9467 = vmatprep.mubr.msk.bf16.mxu1 %vm10359_vm0, %v10358_v3 }
 0x25a   : > { %9471 = vmatprep.subr.bf16.mxu1 %v10358_v3 }
 0x25f   : > { %9372 = vmatmul.mubr.msk.bf16.vlgmr.msra.gmra.mrb[8].mxu0 %vm395_vm2, %v11558_v59 }
 0x260   : > { %9376 = vmatpush3.bf16.msra.mxu0 %v4604_v32  ;;  %9377 = vmatprep.mubr.msk.bf16.mxu0 %vm10359_vm0, %v10358_v3 }
 0x261   : > { %9381 = vmatprep.subr.bf16.mxu0 %v10358_v3 }
 0x264   : > { %9468 = vmatmul.mubr.msk.bf16.vlgmr.msra.gmra.mrb[8].mxu1 %vm395_vm2, %v11558_v59 }
 0x265   : > { %9472 = vmatpush3.bf16.msra.mxu1 %v5545_v48  ;;  %9473 = vmatprep.mubr.msk.bf16.mxu1 %vm10359_vm0, %v10358_v3  ;;  %v6235_v48 = vpop.permute.xlu0 %6234 }
 0x266   : > { %9477 = vmatprep.subr.bf16.mxu1 %v10358_v3 }
 0x26b   : > { %9378 = vmatmul.mubr.msk.bf16.vlgmr.msra.gmra.mrb[8].mxu0 %vm395_vm2, %v11576_v41 }
 0x26c   : > { %9382 = vmatpush3.bf16.msra.mxu0 %v4658_v49  ;;  %9383 = vmatprep.mubr.msk.bf16.mxu0 %vm10359_vm0, %v10358_v3 }
 0x26d   : > { %9387 = vmatprep.subr.bf16.mxu0 %v10358_v3 }
 0x270   : > { %9474 = vmatmul.mubr.msk.bf16.vlgmr.msra.gmra.mrb[8].mxu1 %vm395_vm2, %v11576_v41 }
 0x271   : > { %9478 = vmatpush3.bf16.msra.mxu1 %v5599_v26  ;;  %9479 = vmatprep.mubr.msk.bf16.mxu1 %vm10359_vm0, %v10358_v3 }
 0x272   : > { %9483 = vmatprep.subr.bf16.mxu1 %v10358_v3 }
 0x277   : > { %9384 = vmatmul.mubr.msk.bf16.vlgmr.msra.gmra.mrb[8].mxu0 %vm395_vm2, %v11594_v21 }
 0x278   : > { %9388 = vmatpush3.bf16.msra.mxu0 %v4703_v50  ;;  %9389 = vmatprep.mubr.msk.bf16.mxu0 %vm10359_vm0, %v10358_v3 }
 0x279   : > { %9393 = vmatprep.subr.bf16.mxu0 %v10358_v3 }
 0x27c   : > { %9480 = vmatmul.mubr.msk.bf16.vlgmr.msra.gmra.mrb[8].mxu1 %vm395_vm2, %v11594_v21 }
 0x27d   : > { %9484 = vmatpush3.bf16.msra.mxu1 %v5644_v53  ;;  %9485 = vmatprep.mubr.msk.bf16.mxu1 %vm10359_vm0, %v10358_v3  ;;  %v6237_v53 = vsel %vm399_vm1, %v6235_v48, 0 }
 0x27e   : > { %9489 = vmatprep.subr.bf16.mxu1 %v10358_v3 }
 0x283   : > { %9390 = vmatmul.mubr.msk.bf16.vlgmr.msra.gmra.mrb[8].mxu0 %vm395_vm2, %v11612_v5 }
 0x284   : > { %9394 = vmatpush3.bf16.msra.mxu0 %v4757_v63  ;;  %9395 = vmatprep.mubr.msk.bf16.mxu0 %vm10359_vm0, %v10358_v3 }
 0x285   : > { %9399 = vmatprep.subr.bf16.mxu0 %v10358_v3 }
 0x288   : > { %9486 = vmatmul.mubr.msk.bf16.vlgmr.msra.gmra.mrb[8].mxu1 %vm395_vm2, %v11612_v5 }
 0x289   : > { %9490 = vmatpush3.bf16.msra.mxu1 %v5698_v29  ;;  %9491 = vmatprep.mubr.msk.bf16.mxu1 %vm10359_vm0, %v10358_v3 }
 0x28a   : > { %9495 = vmatprep.subr.bf16.mxu1 %v10358_v3 }
 0x28f   : > { %9396 = vmatmul.mubr.msk.bf16.vlgmr.msra.gmra.mrb[8].mxu0 %vm395_vm2, %v11630_v34 }
 0x290   : > { %9400 = vmatpush3.bf16.msra.mxu0 %v4804_v57  ;;  %9401 = vmatprep.mubr.msk.bf16.mxu0 %vm10359_vm0, %v10358_v3 }
 0x291   : > { %9405 = vmatprep.subr.bf16.mxu0 %v10358_v3 }
 0x294   : > { %9492 = vmatmul.mubr.msk.bf16.vlgmr.msra.gmra.mrb[8].mxu1 %vm395_vm2, %v11630_v34 }
 0x295   : > { %9496 = vmatpush3.bf16.msra.mxu1 %v5745_v27  ;;  %9497 = vmatprep.mubr.msk.bf16.mxu1 %vm10359_vm0, %v10358_v3 }
 0x296   : > { %9501 = vmatprep.subr.bf16.mxu1 %v10358_v3 }
 0x29b   : > { %9402 = vmatmul.mubr.msk.bf16.vlgmr.msra.gmra.mrb[8].mxu0 %vm395_vm2, %v11648_v1 }
 0x29c   : > { %9406 = vmatpush3.bf16.msra.mxu0 %v4858_v28  ;;  %9407 = vmatprep.mubr.msk.bf16.mxu0 %vm10359_vm0, %v10358_v3 }
 0x29d   : > { %9411 = vmatprep.subr.bf16.mxu0 %v10358_v3 }
 0x2a0   : > { %9498 = vmatmul.mubr.msk.bf16.vlgmr.msra.gmra.mrb[8].mxu1 %vm395_vm2, %v11648_v1 }
 0x2a1   : > { %9502 = vmatpush3.bf16.msra.mxu1 %v5799_v23  ;;  %9503 = vmatprep.mubr.msk.bf16.mxu1 %vm10359_vm0, %v10358_v3 }
 0x2a2   : > { %9507 = vmatprep.subr.bf16.mxu1 %v10358_v3 }
 0x2a7   : > { %9408 = vmatmul.mubr.msk.bf16.vlgmr.msra.gmra.mrb[8].mxu0 %vm395_vm2, %v11666_v13 }
 0x2a8   : > { %9412 = vmatpush3.bf16.msra.mxu0 %v4905_v8  ;;  %9413 = vmatprep.mubr.msk.bf16.mxu0 %vm10359_vm0, %v10358_v3 }
 0x2a9   : > { %9417 = vmatprep.subr.bf16.mxu0 %v10358_v3 }
 0x2ac   : > { %9504 = vmatmul.mubr.msk.bf16.vlgmr.msra.gmra.mrb[8].mxu1 %vm395_vm2, %v11666_v13 }
 0x2ad   : > { %9508 = vmatpush3.bf16.msra.mxu1 %v5846_v62  ;;  %9509 = vmatprep.mubr.msk.bf16.mxu1 %vm10359_vm0, %v10358_v3 }
 0x2ae   : > { %9513 = vmatprep.subr.bf16.mxu1 %v10358_v3 }
 0x2b3   : > { %9414 = vmatmul.mubr.msk.bf16.vlgmr.msra.gmra.mrb[8].mxu0 %vm395_vm2, %v11684_v43 }
 0x2b4   : > { %9418 = vmatpush3.bf16.msra.mxu0 %v4959_v47  ;;  %9419 = vmatprep.mubr.msk.bf16.mxu0 %vm10359_vm0, %v10358_v3 }
 0x2b5   : > { %9519 = vmatprep.subr.bf16.mxu0 %v10358_v3 }
 0x2b8   : > { %9510 = vmatmul.mubr.msk.bf16.vlgmr.msra.gmra.mrb[8].mxu1 %vm395_vm2, %v11684_v43 }
 0x2b9   : > { %9514 = vmatpush3.bf16.msra.mxu1 %v5900_v51  ;;  %9515 = vmatprep.mubr.msk.bf16.mxu1 %vm10359_vm0, %v10358_v3  ;;  %v10274_v51 = vld [vmem:[%s10483_s7 + $0x10] sm:$0x3] }
 0x2ba   : > { %9615 = vmatprep.subr.bf16.mxu1 %v10358_v3 }
 0x2bf   : > { %9420 = vmatmul.mubr.msk.bf16.vlgmr.msra.gmra.mrb[8].mxu0 %vm395_vm2, %v11701_v40 }
 0x2c0   : > { %9520 = vmatpush3.bf16.msra.mxu0 %v6096_v6  ;;  %9521 = vmatprep.mubr.msk.bf16.mxu0 %vm10359_vm0, %v10358_v3 }
 0x2c1   : > { %9525 = vmatprep.subr.bf16.mxu0 %v10358_v3 }
 0x2c4   : > { %9516 = vmatmul.mubr.msk.bf16.vlgmr.msra.gmra.mrb[8].mxu1 %vm395_vm2, %v11701_v40 }
 0x2c5   : > { %9616 = vmatpush3.bf16.msra.mxu1 %v7037_v45  ;;  %9617 = vmatprep.mubr.msk.bf16.mxu1 %vm10359_vm0, %v10358_v3 }
 0x2c6   : > { %9621 = vmatprep.subr.bf16.mxu1 %v10358_v3 }
 0x2c7   : > { %9522 = vmatmul.mubr.msk.bf16.vlgmr.msra.gmra.mrb[12].mxu0 %vm395_vm2, %v10268_v22 }
 0x2c8   : > { %9526 = vmatpush3.bf16.msra.mxu0 %v6139_v14  ;;  %9527 = vmatprep.mubr.msk.bf16.mxu0 %vm10359_vm0, %v10358_v3 }
 0x2c9   : > { %9531 = vmatprep.subr.bf16.mxu0 %v10358_v3 }
 0x2cc   : > { %9618 = vmatmul.mubr.msk.bf16.vlgmr.msra.gmra.mrb[12].mxu1 %vm395_vm2, %v10268_v22 }
 0x2cd   : > { %9622 = vmatpush3.bf16.msra.mxu1 %v7080_v35  ;;  %9623 = vmatprep.mubr.msk.bf16.mxu1 %vm10359_vm0, %v10358_v3 }
 0x2ce   : > { %9627 = vmatprep.subr.bf16.mxu1 %v10358_v3 }
 0x2d3   : > { %9528 = vmatmul.mubr.msk.bf16.vlgmr.msra.gmra.mrb[12].mxu0 %vm395_vm2, %v10271_v0 }
 0x2d4   : > { %9532 = vmatpush3.bf16.msra.mxu0 %v6183_v31  ;;  %9533 = vmatprep.mubr.msk.bf16.mxu0 %vm10359_vm0, %v10358_v3  ;;  %v3236_v31 = vld [vmem:[%s11376_s21 + $0x8] sm:$0x2] }
 0x2d5   : > { %9537 = vmatprep.subr.bf16.mxu0 %v10358_v3 }
 0x2d6   : > { %v3114_v12 = vpop.f32.mrb[4].mxu0 }
 0x2d7   : > { %v3121_v36 = vpack.c.bf16 %v3114_v12, %v3114_v12  ;;  %v9229_v15 = vpop.f32.mrb[5].mxu0  ;;  %v3254_v44 = vsel %vm1372_vm3, %v3114_v12, 0.0  ;;  %v3258_v30 = vmul.f32 %v3114_v12, %v3114_v12 }
 0x2d8   : > { %9624 = vmatmul.mubr.msk.bf16.vlgmr.msra.gmra.mrb[12].mxu1 %vm395_vm2, %v10271_v0  ;;  %3255 = vadd.xlane.f32.xlu1 %v3254_v44  ;;  %v3117_v18 = vpop.f32.mrb[6].mxu0  ;;  %v3242_v0 = vld [vmem:[%s11376_s21 + $0x10] sm:$0x2]  ;;  %v3239_v15 = vld [vmem:[%s11376_s21 + $0xc] sm:$0x2] }
 0x2d9   : > { %9628 = vmatpush3.bf16.msra.mxu1 %v7124_v20  ;;  %v3129_v54 = vrot.slane %v3121_v36, %v11343_v52  ;;  %v9230_v4 = vpop.f32.mrb[7].mxu0  ;;  %v3259_v10 = vsel %vm1372_vm3, %v3258_v30, 0.0  ;;  %9629 = vmatprep.mubr.msk.bf16.mxu1 %vm10359_vm0, %v10358_v3  ;;  %v3245_v44 = vld [vmem:[%s11376_s21 + $0x14] sm:$0x2]  ;;  %v3248_v30 = vld [vmem:[%s11376_s21 + $0x18] sm:$0x2] }
 0x2da   : > { %9633 = vmatprep.subr.bf16.mxu1 %v10358_v3  ;;  %v4055_v32 = vpop.f32.mrb[4].mxu1  ;;  %3260 = vadd.xlane.f32.xlu0 %v3259_v10 }
 0x2db   : > { %v3130_v33 = vcombine.high %v3129_v54, %v3129_v54  ;;  %v3137_v49 = vrot.slane %v3129_v54, %v11343_v52  ;;  %v4062_v7 = vpack.c.bf16 %v4055_v32, %v4055_v32  ;;  %v9325_v26 = vpop.f32.mrb[5].mxu1  ;;  %v4194_v50 = vsel %vm1372_vm3, %v4055_v32, 0.0 }
 0x2dc   : > { %v4058_v46 = vpop.f32.mrb[6].mxu1  ;;  %4195 = vadd.xlane.f32.xlu1 %v4194_v50  ;;  %v4198_v63 = vmul.f32 %v4055_v32, %v4055_v32 }
 0x2dd   : > { %v3144_v29 = vrot.slane %v3130_v33, %v11343_v52  ;;  %v3145_v57 = vcombine.high %v3137_v49, %v3137_v49  ;;  %v3148_v27 = vunpack.i.h.s16 %v3137_v49  ;;  %v8462_v24 = vpack.i.b16 %v3137_v49, %v3137_v49  ;;  %v9326_v28 = vpop.f32.mrb[7].mxu1  ;;  %v3251_v49 = vld [vmem:[%s11376_s21 + $0x1c] sm:$0x2] }
 0x2de   : > { %v4070_v23 = vrot.slane %v4062_v7, %v11343_v52  ;;  %v4199_v8 = vsel %vm1372_vm3, %v4198_v63, 0.0 }
 0x2df   : > { %v3146_v62 = vcombine.high %v3144_v29, %v3144_v29  ;;  %v3150_v60 = vunpack.i.h.s16 %v3144_v29  ;;  %v3152_v47 = vunpack.i.h.s16 %v3145_v57  ;;  %v3156_v55 = vpack.i.b16 %v3148_v27, %v3148_v27  ;;  %4200 = vadd.xlane.f32.xlu0 %v4199_v8  ;;  %9534 = vmatmul.mubr.msk.bf16.vlgmr.msra.gmra.mrb[12].mxu0 %vm395_vm2, %v11382_v2  ;;  %v10273_v27 = vld [vmem:[%s10483_s7 + $0xe] sm:$0x3]  ;;  %s342_s7 = scalar_select %p341_p10, %s10343_s24, 1 }
 0x2e0   : > { %v8463_v6 = vpack.i.b16 %v3144_v29, %v3144_v29  ;;  %v8464_v11 = vpack.i.b16 %v3145_v57, %v3145_v57  ;;  %v3169_v45 = vrot.slane %v8462_v24, %v11360_v58  ;;  %v4071_v9 = vcombine.high %v4070_v23, %v4070_v23  ;;  %9538 = vmatpush3.bf16.msra.mxu0 %v6237_v53 }
 0x2e1   : > { %v3154_v14 = vunpack.i.h.s16 %v3146_v62  ;;  %v3158_v22 = vpack.i.b16 %v3150_v60, %v3150_v60  ;;  %v3160_v61 = vpack.i.b16 %v3152_v47, %v3152_v47  ;;  %v8465_v35 = vpack.i.b16 %v3146_v62, %v3146_v62  ;;  %9539 = vmatprep.mubr.msk.bf16.mxu0 %vm10359_vm0, %v10358_v3  ;;  %9543 = vmatprep.subr.bf16.mxu0 %v10358_v3 }
 0x2e2   : > { %v3176_v25 = vrot.slane %v3156_v55, %v11360_v58  ;;  %v3183_v20 = vrot.slane %v8463_v6, %v11360_v58  ;;  %v3197_v12 = vrot.slane %v8464_v11, %v11360_v58  ;;  %v3231_v36 = vsel %vm11756_vm12, %v3169_v45, %v3230_v17 }
 0x2e3   : > { %v3162_v18 = vpack.i.b16 %v3154_v14, %v3154_v14  ;;  %v3190_v54 = vrot.slane %v3158_v22, %v11360_v58  ;;  %v3204_v4 = vrot.slane %v3160_v61, %v11360_v58  ;;  %v3211_v10 = vrot.slane %v8465_v35, %v11360_v58  ;;  %3232 = vst [vmem:[%s11376_s21] sm:$0x2] %v3231_v36 }
 0x2e4   : > { %9630 = vmatmul.mubr.msk.bf16.vlgmr.msra.gmra.mrb[12].mxu1 %vm395_vm2, %v11382_v2  ;;  %v3234_v32 = vsel %vm11756_vm12, %v3176_v25, %v3233_v16  ;;  %v3237_v48 = vsel %vm11756_vm12, %v3183_v20, %v3236_v31  ;;  %v3243_v33 = vsel %vm11756_vm12, %v3197_v12, %v3242_v0  ;;  %v4078_v7 = vrot.slane %v4070_v23, %v11343_v52 }
 0x2e5   : > { %9634 = vmatpush3.bf16.msra.mxu1 %v7178_v37  ;;  %v3218_v26 = vrot.slane %v3162_v18, %v11360_v58  ;;  %3235 = vst [vmem:[%s11376_s21 + $0x4] sm:$0x2] %v3234_v32  ;;  %3238 = vst [vmem:[%s11376_s21 + $0x8] sm:$0x2] %v3237_v48  ;;  %v3240_v2 = vsel %vm11756_vm12, %v3190_v54, %v3239_v15  ;;  %v3246_v50 = vsel %vm11756_vm12, %v3204_v4, %v3245_v44 }
 0x2e6   : > { %3244 = vst [vmem:[%s11376_s21 + $0x10] sm:$0x2] %v3243_v33  ;;  %v3249_v53 = vsel %vm11756_vm12, %v3211_v10, %v3248_v30  ;;  %9635 = vmatprep.mubr.msk.bf16.mxu1 %vm10359_vm0, %v10358_v3  ;;  %3241 = vst [vmem:[%s11376_s21 + $0xc] sm:$0x2] %v3240_v2  ;;  %v4085_v46 = vrot.slane %v4071_v9, %v11343_v52  ;;  %v4086_v63 = vcombine.high %v4078_v7, %v4078_v7  ;;  %v6337_v2 = vpop.permute.xlu0 %6336 }
 0x2e7   : > { %3247 = vst [vmem:[%s11376_s21 + $0x14] sm:$0x2] %v3246_v50  ;;  %3250 = vst [vmem:[%s11376_s21 + $0x18] sm:$0x2] %v3249_v53  ;;  %v4089_v19 = vunpack.i.h.s16 %v4078_v7  ;;  %v8498_v29 = vpack.i.b16 %v4078_v7, %v4078_v7  ;;  %9639 = vmatprep.subr.bf16.mxu1 %v10358_v3  ;;  %v3252_v57 = vsel %vm11756_vm12, %v3218_v26, %v3251_v49  ;;  %v6285_v24 = vsel %vm399_vm1, %v10273_v27, 0  ;;  %v7278_v53 = vpop.permute.xlu1 %7277 }
 0x2e8   : > { %3253 = vst [vmem:[%s11376_s21 + $0x1c] sm:$0x2] %v3252_v57  ;;  %v4087_v28 = vcombine.high %v4085_v46, %v4085_v46  ;;  %v4091_v37 = vunpack.i.h.s16 %v4085_v46  ;;  %v4093_v23 = vunpack.i.h.s16 %v4086_v63  ;;  %v8499_v60 = vpack.i.b16 %v4085_v46, %v4085_v46  ;;  %v10275_v46 = vld [vmem:[%s10486_s9 + $0xe] sm:$0x3] }
 0x2e9   : > { %v4097_v8 = vpack.i.b16 %v4089_v19, %v4089_v19  ;;  %v8500_v47 = vpack.i.b16 %v4086_v63, %v4086_v63  ;;  %v4110_v55 = vrot.slane %v8498_v29, %v11360_v58  ;;  %v7226_v17 = vsel %vm399_vm1, %v10274_v51, 0  ;;  %v10276_v19 = vld [vmem:[%s10486_s9 + $0x10] sm:$0x3]  ;;  %s344_s9 = scalar_select %p343_p11, %s10339_s23, 1 }
 0x2ea   : > { %v4095_v6 = vunpack.i.h.s16 %v4087_v28  ;;  %v4099_v11 = vpack.i.b16 %v4091_v37, %v4091_v37  ;;  %v4101_v45 = vpack.i.b16 %v4093_v23, %v4093_v23  ;;  %v8501_v9 = vpack.i.b16 %v4087_v28, %v4087_v28  ;;  %v4170_v14 = vld [vmem:[%s11376_s21] sm:$0x2]  ;;  %v10278_v37 = vld [vmem:[%s10533_s17 + $0xe] sm:$0x3] }
 0x2eb   : > { %v4117_v22 = vrot.slane %v4097_v8, %v11360_v58  ;;  %v4124_v61 = vrot.slane %v8499_v60, %v11360_v58  ;;  %v4138_v35 = vrot.slane %v8500_v47, %v11360_v58  ;;  %v4171_v16 = vsel %vm11816_vm13, %v4110_v55, %v4170_v14  ;;  %9540 = vmatmul.mubr.msk.bf16.vlgmr.msra.gmra.mrb[12].mxu0 %vm395_vm2, %v11455_v56  ;;  %v7379_v27 = vpop.permute.xlu1 %7378  ;;  %v10279_v60 = vld [vmem:[%s10552_s30 + $0xc] sm:$0x3]  ;;  %v10280_v55 = vld [vmem:[%s10552_s30 + $0xe] sm:$0x3] }
 0x2ec   : > { %v4103_v31 = vpack.i.b16 %v4095_v6, %v4095_v6  ;;  %v4131_v0 = vrot.slane %v4099_v11, %v11360_v58  ;;  %v4145_v25 = vrot.slane %v4101_v45, %v11360_v58  ;;  %v4152_v20 = vrot.slane %v8501_v9, %v11360_v58  ;;  %4172 = vst [vmem:[%s11376_s21] sm:$0x2] %v4171_v16  ;;  %v4173_v12 = vld [vmem:[%s11376_s21 + $0x4] sm:$0x2]  ;;  %v4176_v36 = vld [vmem:[%s11376_s21 + $0x8] sm:$0x2] }
 0x2ed   : > { %v4182_v15 = vld [vmem:[%s11376_s21 + $0x10] sm:$0x2]  ;;  %9544 = vmatpush3.bf16.msra.mxu0 %v6285_v24  ;;  %v4174_v44 = vsel %vm11816_vm13, %v4117_v22, %v4173_v12  ;;  %v4177_v30 = vsel %vm11816_vm13, %v4124_v61, %v4176_v36  ;;  %v4179_v18 = vld [vmem:[%s11376_s21 + $0xc] sm:$0x2]  ;;  %9545 = vmatprep.mubr.msk.bf16.mxu0 %vm10359_vm0, %v10358_v3  ;;  %v6339_v50 = vsel %vm399_vm1, %v6337_v2, 0  ;;  %v6386_v63 = vsel %vm399_vm1, %v10275_v46, 0 }
 0x2ee   : > { %v4183_v54 = vsel %vm11816_vm13, %v4138_v35, %v4182_v15  ;;  %v4185_v4 = vld [vmem:[%s11376_s21 + $0x14] sm:$0x2]  ;;  %v4188_v10 = vld [vmem:[%s11376_s21 + $0x18] sm:$0x2]  ;;  %9549 = vmatprep.subr.bf16.mxu0 %v10358_v3  ;;  %v4159_v32 = vrot.slane %v4103_v31, %v11360_v58  ;;  %4175 = vst [vmem:[%s11376_s21 + $0x4] sm:$0x2] %v4174_v44  ;;  %v4180_v48 = vsel %vm11816_vm13, %v4131_v0, %v4179_v18 }
 0x2ef   : > { %4178 = vst [vmem:[%s11376_s21 + $0x8] sm:$0x2] %v4177_v30  ;;  %4184 = vst [vmem:[%s11376_s21 + $0x10] sm:$0x2] %v4183_v54  ;;  %v4186_v33 = vsel %vm11816_vm13, %v4145_v25, %v4185_v4  ;;  %v4189_v49 = vsel %vm11816_vm13, %v4152_v20, %v4188_v10  ;;  %v4191_v7 = vld [vmem:[%s11376_s21 + $0x1c] sm:$0x2]  ;;  %v7478_v62 = vpop.permute.xlu1 %7477 }
 0x2f0   : > { %4181 = vst [vmem:[%s11376_s21 + $0xc] sm:$0x2] %v4180_v48  ;;  %4187 = vst [vmem:[%s11376_s21 + $0x14] sm:$0x2] %v4186_v33  ;;  %9636 = vmatmul.mubr.msk.bf16.vlgmr.msra.gmra.mrb[12].mxu1 %vm395_vm2, %v11455_v56  ;;  %v4192_v26 = vsel %vm11816_vm13, %v4159_v32, %v4191_v7  ;;  %v7280_v56 = vsel %vm399_vm1, %v7278_v53, 0  ;;  %v7327_v29 = vsel %vm399_vm1, %v10276_v19, 0 }
 0x2f1   : > { %4190 = vst [vmem:[%s11376_s21 + $0x18] sm:$0x2] %v4189_v49  ;;  %9640 = vmatpush3.bf16.msra.mxu1 %v7226_v17  ;;  %9641 = vmatprep.mubr.msk.bf16.mxu1 %vm10359_vm0, %v10358_v3  ;;  %4193 = vst [vmem:[%s11376_s21 + $0x1c] sm:$0x2] %v4192_v26  ;;  %v10277_v24 = vld [vmem:[%s10533_s17 + $0xc] sm:$0x3] }
 0x2f2   : > { %9645 = vmatprep.subr.bf16.mxu1 %v10358_v3  ;;  %v6485_v28 = vsel %vm399_vm1, %v10277_v24, 0  ;;  %v7426_v23 = vsel %vm399_vm1, %v10278_v37, 0  ;;  %v6584_v47 = vsel %vm399_vm1, %v10279_v60, 0  ;;  %v7525_v51 = vsel %vm399_vm1, %v10280_v55, 0  ;;  %v10281_v11 = vld [vmem:[%s10533_s17 + $0xe] sm:$0x3] }
 0x2f3   : > { %v7577_v6 = vpop.permute.xlu1 %7576  ;;  %v6685_v45 = vsel %vm399_vm1, %v10281_v11, 0  ;;  %v10282_v9 = vld [vmem:[%s10533_s17 + $0x10] sm:$0x3]  ;;  %v10283_v35 = vld [vmem:[%s10552_s30 + $0xe] sm:$0x3]  ;;  %s8340_s17 = sshll.u32 %s342_s7, 1 }
 0x2f4   : > { %v7626_v14 = vsel %vm399_vm1, %v10282_v9, 0  ;;  %v6786_v16 = vsel %vm399_vm1, %v10283_v35, 0  ;;  %v10284_v31 = vld [vmem:[%s10552_s30 + $0x10] sm:$0x3]  ;;  %v5114_v60 = vld [vmem:[%s11376_s21 + $0x4] sm:$0x4]  ;;  %s346_s30 = sadd.s32 %s8340_s17, %s344_s9 }
 0x2f5   : > { %v7727_v0 = vsel %vm399_vm1, %v10284_v31, 0  ;;  %v5123_v55 = vld [vmem:[%s11376_s21 + $0x10] sm:$0x4]  ;;  %v5126_v11 = vld [vmem:[%s11376_s21 + $0x14] sm:$0x4]  ;;  %s8341_s19 = sshll.u32 %s346_s30, 3 }
 0x2f6   : > { %s348_s14 = scalar_lea.vmem %s12269_s6, %s8341_s19 }
 0x2f7   : > { %9546 = vmatmul.mubr.msk.bf16.vlgmr.msra.gmra.mrb[12].mxu0 %vm395_vm2, %v11504_v38  ;;  %v7678_v61 = vpop.permute.xlu1 %7677 }
 0x2f8   : > { %9550 = vmatpush3.bf16.msra.mxu0 %v6339_v50  ;;  %9551 = vmatprep.mubr.msk.bf16.mxu0 %vm10359_vm0, %v10358_v3 }
 0x2f9   : > { %9555 = vmatprep.subr.bf16.mxu0 %v10358_v3 }
 0x2fb   : > { %v7779_v20 = vpop.permute.xlu1 %7778 }
 0x2fc   : > { %9642 = vmatmul.mubr.msk.bf16.vlgmr.msra.gmra.mrb[12].mxu1 %vm395_vm2, %v11504_v38  ;;  %v6438_v38 = vpop.permute.xlu0 %6437  ;;  %v7781_v12 = vsel %vm399_vm1, %v7779_v20, 0 }
 0x2fd   : > { %9646 = vmatpush3.bf16.msra.mxu1 %v7280_v56  ;;  %9647 = vmatprep.mubr.msk.bf16.mxu1 %vm10359_vm0, %v10358_v3  ;;  %v6440_v57 = vsel %vm399_vm1, %v6438_v38, 0 }
 0x2fe   : > { %9651 = vmatprep.subr.bf16.mxu1 %v10358_v3 }
 0x303   : > { %9552 = vmatmul.mubr.msk.bf16.vlgmr.msra.gmra.mrb[12].mxu0 %vm395_vm2, %v11522_v42 }
 0x304   : > { %9556 = vmatpush3.bf16.msra.mxu0 %v6386_v63  ;;  %9557 = vmatprep.mubr.msk.bf16.mxu0 %vm10359_vm0, %v10358_v3 }
 0x305   : > { %9561 = vmatprep.subr.bf16.mxu0 %v10358_v3 }
 0x308   : > { %9648 = vmatmul.mubr.msk.bf16.vlgmr.msra.gmra.mrb[12].mxu1 %vm395_vm2, %v11522_v42  ;;  %v7381_v42 = vsel %vm399_vm1, %v7379_v27, 0 }
 0x309   : > { %9652 = vmatpush3.bf16.msra.mxu1 %v7327_v29  ;;  %9653 = vmatprep.mubr.msk.bf16.mxu1 %vm10359_vm0, %v10358_v3 }
 0x30a   : > { %9657 = vmatprep.subr.bf16.mxu1 %v10358_v3 }
 0x30f   : > { %9558 = vmatmul.mubr.msk.bf16.vlgmr.msra.gmra.mrb[12].mxu0 %vm395_vm2, %v11540_v39 }
 0x310   : > { %9562 = vmatpush3.bf16.msra.mxu0 %v6440_v57  ;;  %9563 = vmatprep.mubr.msk.bf16.mxu0 %vm10359_vm0, %v10358_v3 }
 0x311   : > { %9567 = vmatprep.subr.bf16.mxu0 %v10358_v3 }
 0x314   : > { %9654 = vmatmul.mubr.msk.bf16.vlgmr.msra.gmra.mrb[12].mxu1 %vm395_vm2, %v11540_v39  ;;  %v6537_v39 = vpop.permute.xlu0 %6536 }
 0x315   : > { %9658 = vmatpush3.bf16.msra.mxu1 %v7381_v42  ;;  %9659 = vmatprep.mubr.msk.bf16.mxu1 %vm10359_vm0, %v10358_v3  ;;  %v6539_v8 = vsel %vm399_vm1, %v6537_v39, 0  ;;  %v5111_v42 = vld [vmem:[%s11376_s21] sm:$0x4] }
 0x316   : > { %9663 = vmatprep.subr.bf16.mxu1 %v10358_v3 }
 0x31b   : > { %9564 = vmatmul.mubr.msk.bf16.vlgmr.msra.gmra.mrb[12].mxu0 %vm395_vm2, %v11558_v59 }
 0x31c   : > { %9568 = vmatpush3.bf16.msra.mxu0 %v6485_v28  ;;  %9569 = vmatprep.mubr.msk.bf16.mxu0 %vm10359_vm0, %v10358_v3 }
 0x31d   : > { %9573 = vmatprep.subr.bf16.mxu0 %v10358_v3 }
 0x320   : > { %9660 = vmatmul.mubr.msk.bf16.vlgmr.msra.gmra.mrb[12].mxu1 %vm395_vm2, %v11558_v59  ;;  %v7480_v59 = vsel %vm399_vm1, %v7478_v62, 0 }
 0x321   : > { %9664 = vmatpush3.bf16.msra.mxu1 %v7426_v23  ;;  %9665 = vmatprep.mubr.msk.bf16.mxu1 %vm10359_vm0, %v10358_v3 }
 0x322   : > { %9669 = vmatprep.subr.bf16.mxu1 %v10358_v3 }
 0x327   : > { %9570 = vmatmul.mubr.msk.bf16.vlgmr.msra.gmra.mrb[12].mxu0 %vm395_vm2, %v11576_v41 }
 0x328   : > { %9574 = vmatpush3.bf16.msra.mxu0 %v6539_v8  ;;  %9575 = vmatprep.mubr.msk.bf16.mxu0 %vm10359_vm0, %v10358_v3 }
 0x329   : > { %9579 = vmatprep.subr.bf16.mxu0 %v10358_v3 }
 0x32c   : > { %9666 = vmatmul.mubr.msk.bf16.vlgmr.msra.gmra.mrb[12].mxu1 %vm395_vm2, %v11576_v41  ;;  %v6636_v41 = vpop.permute.xlu0 %6635 }
 0x32d   : > { %9670 = vmatpush3.bf16.msra.mxu1 %v7480_v59  ;;  %9671 = vmatprep.mubr.msk.bf16.mxu1 %vm10359_vm0, %v10358_v3  ;;  %v6638_v17 = vsel %vm399_vm1, %v6636_v41, 0 }
 0x32e   : > { %9675 = vmatprep.subr.bf16.mxu1 %v10358_v3 }
 0x333   : > { %9576 = vmatmul.mubr.msk.bf16.vlgmr.msra.gmra.mrb[12].mxu0 %vm395_vm2, %v11594_v21 }
 0x334   : > { %9580 = vmatpush3.bf16.msra.mxu0 %v6584_v47  ;;  %9581 = vmatprep.mubr.msk.bf16.mxu0 %vm10359_vm0, %v10358_v3  ;;  %v5117_v47 = vld [vmem:[%s11376_s21 + $0x8] sm:$0x4] }
 0x335   : > { %9585 = vmatprep.subr.bf16.mxu0 %v10358_v3 }
 0x338   : > { %9672 = vmatmul.mubr.msk.bf16.vlgmr.msra.gmra.mrb[12].mxu1 %vm395_vm2, %v11594_v21  ;;  %v7579_v21 = vsel %vm399_vm1, %v7577_v6, 0 }
 0x339   : > { %9676 = vmatpush3.bf16.msra.mxu1 %v7525_v51  ;;  %9677 = vmatprep.mubr.msk.bf16.mxu1 %vm10359_vm0, %v10358_v3 }
 0x33a   : > { %9681 = vmatprep.subr.bf16.mxu1 %v10358_v3 }
 0x33f   : > { %9582 = vmatmul.mubr.msk.bf16.vlgmr.msra.gmra.mrb[12].mxu0 %vm395_vm2, %v11612_v5 }
 0x340   : > { %9586 = vmatpush3.bf16.msra.mxu0 %v6638_v17  ;;  %9587 = vmatprep.mubr.msk.bf16.mxu0 %vm10359_vm0, %v10358_v3 }
 0x341   : > { %9591 = vmatprep.subr.bf16.mxu0 %v10358_v3 }
 0x344   : > { %9678 = vmatmul.mubr.msk.bf16.vlgmr.msra.gmra.mrb[12].mxu1 %vm395_vm2, %v11612_v5  ;;  %v6737_v5 = vpop.permute.xlu0 %6736 }
 0x345   : > { %9682 = vmatpush3.bf16.msra.mxu1 %v7579_v21  ;;  %9683 = vmatprep.mubr.msk.bf16.mxu1 %vm10359_vm0, %v10358_v3  ;;  %v6739_v22 = vsel %vm399_vm1, %v6737_v5, 0  ;;  %v5120_v21 = vld [vmem:[%s11376_s21 + $0xc] sm:$0x4] }
 0x346   : > { %9687 = vmatprep.subr.bf16.mxu1 %v10358_v3 }
 0x34b   : > { %9588 = vmatmul.mubr.msk.bf16.vlgmr.msra.gmra.mrb[12].mxu0 %vm395_vm2, %v11630_v34 }
 0x34c   : > { %9592 = vmatpush3.bf16.msra.mxu0 %v6685_v45  ;;  %9593 = vmatprep.mubr.msk.bf16.mxu0 %vm10359_vm0, %v10358_v3  ;;  %v5129_v45 = vld [vmem:[%s11376_s21 + $0x18] sm:$0x4] }
 0x34d   : > { %9597 = vmatprep.subr.bf16.mxu0 %v10358_v3 }
 0x350   : > { %9684 = vmatmul.mubr.msk.bf16.vlgmr.msra.gmra.mrb[12].mxu1 %vm395_vm2, %v11630_v34  ;;  %v7680_v34 = vsel %vm399_vm1, %v7678_v61, 0 }
 0x351   : > { %9688 = vmatpush3.bf16.msra.mxu1 %v7626_v14  ;;  %9689 = vmatprep.mubr.msk.bf16.mxu1 %vm10359_vm0, %v10358_v3 }
 0x352   : > { %9693 = vmatprep.subr.bf16.mxu1 %v10358_v3 }
 0x357   : > { %9594 = vmatmul.mubr.msk.bf16.vlgmr.msra.gmra.mrb[12].mxu0 %vm395_vm2, %v11648_v1 }
 0x358   : > { %9598 = vmatpush3.bf16.msra.mxu0 %v6739_v22  ;;  %9599 = vmatprep.mubr.msk.bf16.mxu0 %vm10359_vm0, %v10358_v3 }
 0x359   : > { %9603 = vmatprep.subr.bf16.mxu0 %v10358_v3 }
 0x35c   : > { %9690 = vmatmul.mubr.msk.bf16.vlgmr.msra.gmra.mrb[12].mxu1 %vm395_vm2, %v11648_v1  ;;  %v6838_v1 = vpop.permute.xlu0 %6837 }
 0x35d   : > { %9694 = vmatpush3.bf16.msra.mxu1 %v7680_v34  ;;  %9695 = vmatprep.mubr.msk.bf16.mxu1 %vm10359_vm0, %v10358_v3  ;;  %v6840_v25 = vsel %vm399_vm1, %v6838_v1, 0  ;;  %vm12026_vm1 = vmand %vm5108_vm14, %vm5109_vm15 }
 0x35e   : > { %9699 = vmatprep.subr.bf16.mxu1 %v10358_v3 }
 0x363   : > { %9600 = vmatmul.mubr.msk.bf16.vlgmr.msra.gmra.mrb[12].mxu0 %vm395_vm2, %v11666_v13 }
 0x364   : > { %9604 = vmatpush3.bf16.msra.mxu0 %v6786_v16  ;;  %9605 = vmatprep.mubr.msk.bf16.mxu0 %vm10359_vm0, %v10358_v3  ;;  %v5132_v16 = vld [vmem:[%s11376_s21 + $0x1c] sm:$0x4] }
 0x365   : > { %9609 = vmatprep.subr.bf16.mxu0 %v10358_v3 }
 0x368   : > { %9696 = vmatmul.mubr.msk.bf16.vlgmr.msra.gmra.mrb[12].mxu1 %vm395_vm2, %v11666_v13 }
 0x369   : > { %9700 = vmatpush3.bf16.msra.mxu1 %v7727_v0  ;;  %9701 = vmatprep.mubr.msk.bf16.mxu1 %vm10359_vm0, %v10358_v3 }
 0x36a   : > { %9705 = vmatprep.subr.bf16.mxu1 %v10358_v3 }
 0x36f   : > { %9606 = vmatmul.mubr.msk.bf16.vlgmr.msra.gmra.mrb[12].mxu0 %vm395_vm2, %v11684_v43 }
 0x370   : > { %9610 = vmatpush3.bf16.msra.mxu0 %v6840_v25  ;;  %9611 = vmatprep.mubr.msk.bf16.mxu0 %vm10359_vm0, %v10358_v3 }
 0x374   : > { %9702 = vmatmul.mubr.msk.bf16.vlgmr.msra.gmra.mrb[12].mxu1 %vm395_vm2, %v11684_v43 }
 0x375   : > { %9706 = vmatpush3.bf16.msra.mxu1 %v7781_v12  ;;  %9707 = vmatprep.mubr.msk.bf16.mxu1 %vm10359_vm0, %v10358_v3  ;;  %vm6049_vm0 = vsmask.f32 7946 }
 0x37b   : > { %9612 = vmatmul.mubr.msk.bf16.vlgmr.msra.gmra.mrb[12].mxu0 %vm395_vm2, %v11701_v40 }
 0x380   : > { %9708 = vmatmul.mubr.msk.bf16.vlgmr.msra.gmra.mrb[12].mxu1 %vm395_vm2, %v11701_v40  ;;  %vm12074_vm2 = vmand %vm5108_vm14, %vm6049_vm0 }
 0x392   : > { %v4995_v13 = vpop.f32.mrb[8].mxu0 }
 0x393   : > { %v5002_v36 = vpack.c.bf16 %v4995_v13, %v4995_v13  ;;  %v9421_v15 = vpop.f32.mrb[9].mxu0  ;;  %v5135_v44 = vsel %vm1372_vm3, %v4995_v13, 0.0  ;;  %v5139_v30 = vmul.f32 %v4995_v13, %v4995_v13 }
 0x394   : > { %5136 = vadd.xlane.f32.xlu1 %v5135_v44  ;;  %v4998_v18 = vpop.f32.mrb[10].mxu0 }
 0x395   : > { %v5010_v43 = vrot.slane %v5002_v36, %v11343_v52  ;;  %v9422_v54 = vpop.f32.mrb[11].mxu0  ;;  %v5140_v4 = vsel %vm1372_vm3, %v5139_v30, 0.0 }
 0x396   : > { %5141 = vadd.xlane.f32.xlu0 %v5140_v4 }
 0x397   : > { %v5936_v3 = vpop.f32.mrb[8].mxu1  ;;  %v5011_v10 = vcombine.high %v5010_v43, %v5010_v43  ;;  %v5018_v32 = vrot.slane %v5010_v43, %v11343_v52 }
 0x398   : > { %v5943_v48 = vpack.c.bf16 %v5936_v3, %v5936_v3  ;;  %v9517_v40 = vpop.f32.mrb[9].mxu1  ;;  %v6075_v33 = vsel %vm1372_vm3, %v5936_v3, 0.0  ;;  %v6079_v7 = vmul.f32 %v5936_v3, %v5936_v3 }
 0x399   : > { %v5939_v49 = vpop.f32.mrb[10].mxu1  ;;  %6076 = vadd.xlane.f32.xlu1 %v6075_v33  ;;  %v5025_v26 = vrot.slane %v5011_v10, %v11343_v52  ;;  %v5026_v2 = vcombine.high %v5018_v32, %v5018_v32  ;;  %v5029_v50 = vunpack.i.h.s16 %v5018_v32  ;;  %v8534_v53 = vpack.i.b16 %v5018_v32, %v5018_v32 }
 0x39a   : > { %v9518_v56 = vpop.f32.mrb[11].mxu1  ;;  %v5951_v46 = vrot.slane %v5943_v48, %v11343_v52  ;;  %v6080_v63 = vsel %vm1372_vm3, %v6079_v7, 0.0 }
 0x39b   : > { %v5027_v19 = vcombine.high %v5025_v26, %v5025_v26  ;;  %v5031_v29 = vunpack.i.h.s16 %v5025_v26  ;;  %v5033_v38 = vunpack.i.h.s16 %v5026_v2  ;;  %v5037_v57 = vpack.i.b16 %v5029_v50, %v5029_v50  ;;  %6081 = vadd.xlane.f32.xlu0 %v6080_v63 }
 0x39c   : > { %v8535_v24 = vpack.i.b16 %v5025_v26, %v5025_v26  ;;  %v8536_v28 = vpack.i.b16 %v5026_v2, %v5026_v2  ;;  %v5050_v37 = vrot.slane %v8534_v53, %v11360_v58  ;;  %v5952_v23 = vcombine.high %v5951_v46, %v5951_v46 }
 0x39d   : > { %v5035_v39 = vunpack.i.h.s16 %v5027_v19  ;;  %v5039_v8 = vpack.i.b16 %v5031_v29, %v5031_v29  ;;  %v5041_v62 = vpack.i.b16 %v5033_v38, %v5033_v38  ;;  %v8537_v59 = vpack.i.b16 %v5027_v19, %v5027_v19 }
 0x39e   : > { %v5057_v51 = vrot.slane %v5037_v57, %v11360_v58  ;;  %v5064_v41 = vrot.slane %v8535_v24, %v11360_v58  ;;  %v5078_v17 = vrot.slane %v8536_v28, %v11360_v58  ;;  %v5112_v6 = vsel %vm12026_vm1, %v5050_v37, %v5111_v42 }
 0x39f   : > { %v5043_v9 = vpack.i.b16 %v5035_v39, %v5035_v39  ;;  %v5071_v14 = vrot.slane %v5039_v8, %v11360_v58  ;;  %v5085_v5 = vrot.slane %v5041_v62, %v11360_v58  ;;  %v5092_v22 = vrot.slane %v8537_v59, %v11360_v58  ;;  %5113 = vst [vmem:[%s11376_s21] sm:$0x4] %v5112_v6 }
 0x3a0   : > { %v5115_v61 = vsel %vm12026_vm1, %v5057_v51, %v5114_v60  ;;  %v5118_v34 = vsel %vm12026_vm1, %v5064_v41, %v5117_v47  ;;  %v5124_v35 = vsel %vm12026_vm1, %v5078_v17, %v5123_v55  ;;  %v5959_v31 = vrot.slane %v5951_v46, %v11343_v52 }
 0x3a1   : > { %v5099_v0 = vrot.slane %v5043_v9, %v11360_v58  ;;  %5116 = vst [vmem:[%s11376_s21 + $0x4] sm:$0x4] %v5115_v61  ;;  %5119 = vst [vmem:[%s11376_s21 + $0x8] sm:$0x4] %v5118_v34  ;;  %v5121_v1 = vsel %vm12026_vm1, %v5071_v14, %v5120_v21  ;;  %v5127_v25 = vsel %vm12026_vm1, %v5085_v5, %v5126_v11 }
 0x3a2   : > { %5125 = vst [vmem:[%s11376_s21 + $0x10] sm:$0x4] %v5124_v35  ;;  %v5130_v20 = vsel %vm12026_vm1, %v5092_v22, %v5129_v45  ;;  %5122 = vst [vmem:[%s11376_s21 + $0xc] sm:$0x4] %v5121_v1  ;;  %v5966_v12 = vrot.slane %v5952_v23, %v11343_v52  ;;  %v5967_v13 = vcombine.high %v5959_v31, %v5959_v31  ;;  %v5970_v36 = vunpack.i.h.s16 %v5959_v31 }
 0x3a3   : > { %5128 = vst [vmem:[%s11376_s21 + $0x14] sm:$0x4] %v5127_v25  ;;  %5131 = vst [vmem:[%s11376_s21 + $0x18] sm:$0x4] %v5130_v20  ;;  %v8570_v15 = vpack.i.b16 %v5959_v31, %v5959_v31  ;;  %v5133_v44 = vsel %vm12026_vm1, %v5099_v0, %v5132_v16 }
 0x3a4   : > { %5134 = vst [vmem:[%s11376_s21 + $0x1c] sm:$0x4] %v5133_v44  ;;  %v5968_v30 = vcombine.high %v5966_v12, %v5966_v12  ;;  %v5972_v18 = vunpack.i.h.s16 %v5966_v12  ;;  %v5974_v43 = vunpack.i.h.s16 %v5967_v13  ;;  %v5978_v54 = vpack.i.b16 %v5970_v36, %v5970_v36 }
 0x3a5   : > { %v8571_v3 = vpack.i.b16 %v5966_v12, %v5966_v12  ;;  %v8572_v10 = vpack.i.b16 %v5967_v13, %v5967_v13  ;;  %v5991_v32 = vrot.slane %v8570_v15, %v11360_v58 }
 0x3a6   : > { %v5976_v48 = vunpack.i.h.s16 %v5968_v30  ;;  %v5980_v40 = vpack.i.b16 %v5972_v18, %v5972_v18  ;;  %v5982_v33 = vpack.i.b16 %v5974_v43, %v5974_v43  ;;  %v8573_v49 = vpack.i.b16 %v5968_v30, %v5968_v30  ;;  %v6051_v7 = vld [vmem:[%s11376_s21] sm:$0x4] }
 0x3a7   : > { %v5998_v26 = vrot.slane %v5978_v54, %v11360_v58  ;;  %v6005_v2 = vrot.slane %v8571_v3, %v11360_v58  ;;  %v6019_v50 = vrot.slane %v8572_v10, %v11360_v58  ;;  %v6052_v53 = vsel %vm12074_vm2, %v5991_v32, %v6051_v7  ;;  %v6992_v54 = vld [vmem:[%s11376_s21] sm:$0x8]  ;;  %v6995_v7 = vld [vmem:[%s11376_s21 + $0x4] sm:$0x8] }
 0x3a8   : > { %v5984_v56 = vpack.i.b16 %v5976_v48, %v5976_v48  ;;  %v6012_v46 = vrot.slane %v5980_v40, %v11360_v58  ;;  %v6026_v63 = vrot.slane %v5982_v33, %v11360_v58  ;;  %v6033_v19 = vrot.slane %v8573_v49, %v11360_v58  ;;  %6053 = vst [vmem:[%s11376_s21] sm:$0x4] %v6052_v53  ;;  %v6054_v29 = vld [vmem:[%s11376_s21 + $0x4] sm:$0x4]  ;;  %v6057_v38 = vld [vmem:[%s11376_s21 + $0x8] sm:$0x4] }
 0x3a9   : > { %v6063_v57 = vld [vmem:[%s11376_s21 + $0x10] sm:$0x4]  ;;  %v6055_v27 = vsel %vm12074_vm2, %v5998_v26, %v6054_v29  ;;  %v6058_v42 = vsel %vm12074_vm2, %v6005_v2, %v6057_v38  ;;  %v6060_v24 = vld [vmem:[%s11376_s21 + $0xc] sm:$0x4]  ;;  %v6998_v26 = vld [vmem:[%s11376_s21 + $0x8] sm:$0x8] }
 0x3aa   : > { %v6064_v28 = vsel %vm12074_vm2, %v6019_v50, %v6063_v57  ;;  %v6066_v37 = vld [vmem:[%s11376_s21 + $0x14] sm:$0x4]  ;;  %v6069_v23 = vld [vmem:[%s11376_s21 + $0x18] sm:$0x4]  ;;  %v6040_v39 = vrot.slane %v5984_v56, %v11360_v58  ;;  %6056 = vst [vmem:[%s11376_s21 + $0x4] sm:$0x4] %v6055_v27  ;;  %v6061_v8 = vsel %vm12074_vm2, %v6012_v46, %v6060_v24 }
 0x3ab   : > { %6059 = vst [vmem:[%s11376_s21 + $0x8] sm:$0x4] %v6058_v42  ;;  %6065 = vst [vmem:[%s11376_s21 + $0x10] sm:$0x4] %v6064_v28  ;;  %v6067_v62 = vsel %vm12074_vm2, %v6026_v63, %v6066_v37  ;;  %v6070_v59 = vsel %vm12074_vm2, %v6033_v19, %v6069_v23  ;;  %v6072_v60 = vld [vmem:[%s11376_s21 + $0x1c] sm:$0x4] }
 0x3ac   : > { %6062 = vst [vmem:[%s11376_s21 + $0xc] sm:$0x4] %v6061_v8  ;;  %6068 = vst [vmem:[%s11376_s21 + $0x14] sm:$0x4] %v6067_v62  ;;  %v6073_v47 = vsel %vm12074_vm2, %v6040_v39, %v6072_v60  ;;  %v7004_v2 = vld [vmem:[%s11376_s21 + $0x10] sm:$0x8] }
 0x3ad   : > { %6071 = vst [vmem:[%s11376_s21 + $0x18] sm:$0x4] %v6070_v59  ;;  %6074 = vst [vmem:[%s11376_s21 + $0x1c] sm:$0x4] %v6073_v47  ;;  %v7001_v63 = vld [vmem:[%s11376_s21 + $0xc] sm:$0x8] }
 0x3ae   : > { %v7007_v19 = vld [vmem:[%s11376_s21 + $0x14] sm:$0x8]  ;;  %v7010_v29 = vld [vmem:[%s11376_s21 + $0x18] sm:$0x8]  ;;  %v7013_v23 = vld [vmem:[%s11376_s21 + $0x1c] sm:$0x8] }
 0x44e   : > { %v6876_v55 = vpop.f32.mrb[12].mxu0 }
 0x44f   : > { %v6883_v51 = vpack.c.bf16 %v6876_v55, %v6876_v55  ;;  %v9613_v41 = vpop.f32.mrb[13].mxu0  ;;  %v7016_v17 = vsel %vm1372_vm3, %v6876_v55, 0.0  ;;  %v7020_v6 = vmul.f32 %v6876_v55, %v6876_v55 }
 0x450   : > { %7017 = vadd.xlane.f32.xlu1 %v7016_v17  ;;  %v6879_v21 = vpop.f32.mrb[14].mxu0 }
 0x451   : > { %v6891_v11 = vrot.slane %v6883_v51, %v11343_v52  ;;  %v9614_v45 = vpop.f32.mrb[15].mxu0  ;;  %v7021_v9 = vsel %vm1372_vm3, %v7020_v6, 0.0 }
 0x452   : > { %7022 = vadd.xlane.f32.xlu0 %v7021_v9 }
 0x453   : > { %v7817_v14 = vpop.f32.mrb[12].mxu1  ;;  %v6892_v5 = vcombine.high %v6891_v11, %v6891_v11  ;;  %v6899_v22 = vrot.slane %v6891_v11, %v11343_v52 }
 0x454   : > { %v7824_v61 = vpack.c.bf16 %v7817_v14, %v7817_v14  ;;  %v9709_v34 = vpop.f32.mrb[13].mxu1  ;;  %v7956_v35 = vsel %vm1372_vm3, %v7817_v14, 0.0  ;;  %v7960_v31 = vmul.f32 %v7817_v14, %v7817_v14 }
 0x455   : > { %v7820_v16 = vpop.f32.mrb[14].mxu1  ;;  %7957 = vadd.xlane.f32.xlu1 %v7956_v35  ;;  %v6906_v0 = vrot.slane %v6892_v5, %v11343_v52  ;;  %v6907_v1 = vcombine.high %v6899_v22, %v6899_v22  ;;  %v6910_v25 = vunpack.i.h.s16 %v6899_v22  ;;  %v8606_v20 = vpack.i.b16 %v6899_v22, %v6899_v22 }
 0x456   : > { %v9710_v12 = vpop.f32.mrb[15].mxu1  ;;  %v7832_v13 = vrot.slane %v7824_v61, %v11343_v52  ;;  %v7961_v36 = vsel %vm1372_vm3, %v7960_v31, 0.0  ;;  %vm12176_vm3 = vmand %vm6989_vm4, %vm7930_vm6 }
 0x457   : > { %v6908_v15 = vcombine.high %v6906_v0, %v6906_v0  ;;  %v6912_v44 = vunpack.i.h.s16 %v6906_v0  ;;  %v6914_v30 = vunpack.i.h.s16 %v6907_v1  ;;  %v6918_v18 = vpack.i.b16 %v6910_v25, %v6910_v25  ;;  %7962 = vadd.xlane.f32.xlu0 %v7961_v36 }
 0x458   : > { %v8607_v4 = vpack.i.b16 %v6906_v0, %v6906_v0  ;;  %v8608_v3 = vpack.i.b16 %v6907_v1, %v6907_v1  ;;  %v6931_v10 = vrot.slane %v8606_v20, %v11360_v58  ;;  %v7833_v32 = vcombine.high %v7832_v13, %v7832_v13 }
 0x459   : > { %v6916_v48 = vunpack.i.h.s16 %v6908_v15  ;;  %v6920_v40 = vpack.i.b16 %v6912_v44, %v6912_v44  ;;  %v6922_v33 = vpack.i.b16 %v6914_v30, %v6914_v30  ;;  %v8609_v49 = vpack.i.b16 %v6908_v15, %v6908_v15 }
 0x45a   : > { %v6938_v50 = vrot.slane %v6918_v18, %v11360_v58  ;;  %v6945_v53 = vrot.slane %v8607_v4, %v11360_v58  ;;  %v6959_v56 = vrot.slane %v8608_v3, %v11360_v58  ;;  %v6993_v46 = vsel %vm12128_vm7, %v6931_v10, %v6992_v54 }
 0x45b   : > { %v6924_v38 = vpack.i.b16 %v6916_v48, %v6916_v48  ;;  %v6952_v57 = vrot.slane %v6920_v40, %v11360_v58  ;;  %v6966_v27 = vrot.slane %v6922_v33, %v11360_v58  ;;  %v6973_v42 = vrot.slane %v8609_v49, %v11360_v58  ;;  %6994 = vst [vmem:[%s11376_s21] sm:$0x8] %v6993_v46 }
 0x45c   : > { %v6996_v24 = vsel %vm12128_vm7, %v6938_v50, %v6995_v7  ;;  %v6999_v28 = vsel %vm12128_vm7, %v6945_v53, %v6998_v26  ;;  %v7005_v37 = vsel %vm12128_vm7, %v6959_v56, %v7004_v2  ;;  %v7840_v39 = vrot.slane %v7832_v13, %v11343_v52  ;;  %v1375_v7 = vpop.xlane.xlu0 %1374  ;;  %v1380_v2 = vpop.xlane.xlu1 %1379 }
 0x45d   : > { %v6980_v8 = vrot.slane %v6924_v38, %v11360_v58  ;;  %6997 = vst [vmem:[%s11376_s21 + $0x4] sm:$0x8] %v6996_v24  ;;  %7000 = vst [vmem:[%s11376_s21 + $0x8] sm:$0x8] %v6999_v28  ;;  %v7002_v62 = vsel %vm12128_vm7, %v6952_v57, %v7001_v63  ;;  %v7008_v59 = vsel %vm12128_vm7, %v6966_v27, %v7007_v19 }
 0x45e   : > { %7006 = vst [vmem:[%s11376_s21 + $0x10] sm:$0x8] %v7005_v37  ;;  %v7011_v60 = vsel %vm12128_vm7, %v6973_v42, %v7010_v29  ;;  %7003 = vst [vmem:[%s11376_s21 + $0xc] sm:$0x8] %v7002_v62  ;;  %v7847_v47 = vrot.slane %v7833_v32, %v11343_v52  ;;  %v7848_v55 = vcombine.high %v7840_v39, %v7840_v39  ;;  %v7851_v51 = vunpack.i.h.s16 %v7840_v39 }
 0x45f   : > { %7009 = vst [vmem:[%s11376_s21 + $0x14] sm:$0x8] %v7008_v59  ;;  %7012 = vst [vmem:[%s11376_s21 + $0x18] sm:$0x8] %v7011_v60  ;;  %v8642_v41 = vpack.i.b16 %v7840_v39, %v7840_v39  ;;  %v7014_v17 = vsel %vm12128_vm7, %v6980_v8, %v7013_v23 }
 0x460   : > { %7015 = vst [vmem:[%s11376_s21 + $0x1c] sm:$0x8] %v7014_v17  ;;  %v7849_v6 = vcombine.high %v7847_v47, %v7847_v47  ;;  %v7853_v21 = vunpack.i.h.s16 %v7847_v47  ;;  %v7855_v11 = vunpack.i.h.s16 %v7848_v55  ;;  %v7859_v45 = vpack.i.b16 %v7851_v51, %v7851_v51  ;;  %v2315_v26 = vpop.xlane.xlu0 %2314  ;;  %v3256_v53 = vpop.xlane.xlu1 %3255 }
 0x461   : > { %v8643_v14 = vpack.i.b16 %v7847_v47, %v7847_v47  ;;  %v8644_v52 = vpack.i.b16 %v7848_v55, %v7848_v55  ;;  %v7872_v5 = vrot.slane %v8642_v41, %v11360_v58  ;;  %v2316_v38 = vadd.f32 %v2315_v26, %v1375_v7 }
 0x462   : > { %v7857_v22 = vunpack.i.h.s16 %v7849_v6  ;;  %v7861_v61 = vpack.i.b16 %v7853_v21, %v7853_v21  ;;  %v7863_v34 = vpack.i.b16 %v7855_v11, %v7855_v11  ;;  %v8645_v35 = vpack.i.b16 %v7849_v6, %v7849_v6  ;;  %v7932_v16 = vld [vmem:[%s11376_s21] sm:$0x8] }
 0x463   : > { %v7879_v31 = vrot.slane %v7859_v45, %v11360_v58  ;;  %v7886_v0 = vrot.slane %v8643_v14, %v11360_v58  ;;  %v7900_v1 = vrot.slane %v8644_v52, %v11360_v58  ;;  %v7933_v25 = vsel %vm12176_vm3, %v7872_v5, %v7932_v16 }
 0x464   : > { %v7865_v20 = vpack.i.b16 %v7857_v22, %v7857_v22  ;;  %v7893_v12 = vrot.slane %v7861_v61, %v11360_v58  ;;  %v7907_v13 = vrot.slane %v7863_v34, %v11360_v58  ;;  %v7914_v36 = vrot.slane %v8645_v35, %v11360_v58  ;;  %7934 = vst [vmem:[%s11376_s21] sm:$0x8] %v7933_v25  ;;  %v7935_v15 = vld [vmem:[%s11376_s21 + $0x4] sm:$0x8]  ;;  %v7938_v44 = vld [vmem:[%s11376_s21 + $0x8] sm:$0x8]  ;;  %v2320_v50 = vpop.xlane.xlu0 %2319  ;;  %v4196_v46 = vpop.xlane.xlu1 %4195 }
 0x465   : > { %v7944_v30 = vld [vmem:[%s11376_s21 + $0x10] sm:$0x8]  ;;  %v7936_v18 = vsel %vm12176_vm3, %v7879_v31, %v7935_v15  ;;  %v7939_v43 = vsel %vm12176_vm3, %v7886_v0, %v7938_v44  ;;  %v7941_v54 = vld [vmem:[%s11376_s21 + $0xc] sm:$0x8]  ;;  %v3257_v57 = vadd.f32 %v3256_v53, %v2316_v38  ;;  %v2321_v27 = vadd.f32 %v2320_v50, %v1380_v2 }
 0x466   : > { %v7945_v4 = vsel %vm12176_vm3, %v7900_v1, %v7944_v30  ;;  %v7947_v3 = vld [vmem:[%s11376_s21 + $0x14] sm:$0x8]  ;;  %v7950_v10 = vld [vmem:[%s11376_s21 + $0x18] sm:$0x8]  ;;  %v7921_v32 = vrot.slane %v7865_v20, %v11360_v58  ;;  %7937 = vst [vmem:[%s11376_s21 + $0x4] sm:$0x8] %v7936_v18  ;;  %v7942_v48 = vsel %vm12176_vm3, %v7893_v12, %v7941_v54 }
 0x467   : > { %7940 = vst [vmem:[%s11376_s21 + $0x8] sm:$0x8] %v7939_v43  ;;  %7946 = vst [vmem:[%s11376_s21 + $0x10] sm:$0x8] %v7945_v4  ;;  %v7948_v40 = vsel %vm12176_vm3, %v7907_v13, %v7947_v3  ;;  %v7951_v33 = vsel %vm12176_vm3, %v7914_v36, %v7950_v10  ;;  %v7953_v49 = vld [vmem:[%s11376_s21 + $0x1c] sm:$0x8]  ;;  %v4197_v24 = vadd.f32 %v4196_v46, %v3257_v57 }
 0x468   : > { %7943 = vst [vmem:[%s11376_s21 + $0xc] sm:$0x8] %v7942_v48  ;;  %7949 = vst [vmem:[%s11376_s21 + $0x14] sm:$0x8] %v7948_v40  ;;  %v7954_v58 = vsel %vm12176_vm3, %v7921_v32, %v7953_v49  ;;  %v3261_v56 = vpop.xlane.xlu0 %3260  ;;  %v5137_v19 = vpop.xlane.xlu1 %5136 }
 0x469   : > { %7952 = vst [vmem:[%s11376_s21 + $0x18] sm:$0x8] %v7951_v33  ;;  %7955 = vst [vmem:[%s11376_s21 + $0x1c] sm:$0x8] %v7954_v58  ;;  %v3262_v28 = vadd.f32 %v3261_v56, %v2321_v27  ;;  %v5138_v23 = vadd.f32 %v5137_v19, %v4197_v24 }
 0x46b   : > { %v8003_v11 = vld [vmem:[%s11376_s21] sm:$0xf] (%p10444_p5) }
 0x46c   : > { %v4201_v63 = vpop.xlane.xlu0 %4200  ;;  %v6077_v42 = vpop.xlane.xlu1 %6076  ;;  %8004 = vst [vmem:[%s7987_s18] sm:$0xf] (%p10444_p5), %v8003_v11 }
 0x46d   : > { %v4202_v39 = vadd.f32 %v4201_v63, %v3262_v28  ;;  %v6078_v62 = vadd.f32 %v6077_v42, %v5138_v23  ;;  %v8005_v45 = vld [vmem:[%s11376_s21 + $0x4] sm:$0xf] (%p10444_p5) }
 0x46e   : > { %v8007_v9 = vld [vmem:[%s11376_s21 + $0x8] sm:$0xf] (%p10444_p5)  ;;  %v8011_v52 = vld [vmem:[%s11376_s21 + $0x10] sm:$0xf] (%p10444_p5)  ;;  %8006 = vst [vmem:[%s7987_s18 + $0x8] sm:$0xf] (%p10444_p5), %v8005_v45 }
 0x46f   : > { %v8009_v14 = vld [vmem:[%s11376_s21 + $0xc] sm:$0xf] (%p10444_p5)  ;;  %v8013_v5 = vld [vmem:[%s11376_s21 + $0x14] sm:$0xf] (%p10444_p5)  ;;  %8008 = vst [vmem:[%s7987_s18 + $0x10] sm:$0xf] (%p10444_p5), %v8007_v9 }
 0x470   : > { %v5142_v29 = vpop.xlane.xlu0 %5141  ;;  %v8015_v22 = vld [vmem:[%s11376_s21 + $0x18] sm:$0xf] (%p10444_p5)  ;;  %v8017_v61 = vld [vmem:[%s11376_s21 + $0x1c] sm:$0xf] (%p10444_p5)  ;;  %8010 = vst [vmem:[%s7987_s18 + $0x18] sm:$0xf] (%p10444_p5), %v8009_v14 }
 0x471   : > { %v5143_v59 = vadd.f32 %v5142_v29, %v4202_v39  ;;  %8012 = vst [vmem:[%s7987_s18 + $0x20] sm:$0xf] (%p10444_p5), %v8011_v52  ;;  %8014 = vst [vmem:[%s7987_s18 + $0x28] sm:$0xf] (%p10444_p5), %v8013_v5 }
 0x472   : > { %8016 = vst [vmem:[%s7987_s18 + $0x30] sm:$0xf] (%p10444_p5), %v8015_v22  ;;  %8018 = vst [vmem:[%s7987_s18 + $0x38] sm:$0xf] (%p10444_p5), %v8017_v61 }
 0x474   : > { %v6082_v37 = vpop.xlane.xlu0 %6081 }
 0x475   : > { %v6083_v55 = vadd.f32 %v6082_v37, %v5143_v59 }
 0x4dd   : > { %v7018_v8 = vpop.xlane.xlu1 %7017 }
 0x4de   : > { %v7019_v47 = vadd.f32 %v7018_v8, %v6078_v62 }
 0x4df   : > { %v7023_v60 = vpop.xlane.xlu0 %7022 }
 0x4e0   : > { %v7024_v17 = vadd.f32 %v7023_v60, %v6083_v55 }
 0x4e1   : > { %7983 = sbr.rel (!%p10444_p5) target bundleno = 1256 (0x4e8), region = 44 }
 0x4e2   : > { %v7958_v51 = vpop.xlane.xlu1 %7957 }
 0x4e3   : > { %v7959_v41 = vadd.f32 %v7958_v51, %v7019_v47 }
 0x4e4   : > { %v7963_v6 = vpop.xlane.xlu0 %7962 }
 0x4e5   : > { %7966 = vst.msk [vmem:[%s348_s14] sm:$0xff] %vm7965_vm8, %v7959_v41  ;;  %v7964_v21 = vadd.f32 %v7963_v6, %v7024_v17 }
 0x4e7   : > { %7968 = vst.msk [vmem:[%s348_s14] sm:$0xff] %vm7967_vm9, %v7964_v21 }
 0x4e8 PF: > { %s17_s27 = sadd.s32 1, %s10355_s27   ;;  %s12287_s21 = smov %s10335_s22 }
 0x4e9   : > { %p14_p12 = scmp.ge.s32.totalorder %s17_s27, 6   ;;  %s12288_s22 = smov %s10455_s12 }
 0x4ea   : > { %s12289_s23 = smov %s10347_s25  ;;  %s12290_s24 = smov %s10351_s26 }
 0x4eb   : > { %s12291_s25 = smov %s12294_s28  ;;  %s12292_s26 = smov %s12298_s29 }
 0x4ec   :  { %16 = sbr.rel (!%p14_p12) target bundleno = 4 (0x4), region = 183 }

</bundles_post_ra>
